<compile_context>
chip_gen: v7x
topology: tpu7x:2x2x1
jax: 0.10.0
libtpu: 0.0.40
codegen_flags: <defaults>
</compile_context>

<pallas_src>
import functools

import jax
import jax.numpy as jnp
from jax import lax
from jax.experimental import pallas as pl
from jax.experimental.pallas import tpu as pltpu


_LANE = 128
_SUB = 8
_STATIC_UNROLL_T = 64       # fully-static chunk loop at or below this sequence length
_CHUNK_ROWS = 256           # target GEMM rows per projection chunk (bounds vreg pressure)


def _round_up(x, m):
    return (x + m - 1) // m * m


def _tpu_tiling_info():
    """Returns (vmem_capacity_bytes, mxu_rows) with safe fallbacks."""
    vmem_cap = 128 * 1024 * 1024
    mxu_rows = 128
    try:
        info = pltpu.get_tpu_info()
        vmem_cap = int(getattr(info, "vmem_capacity_bytes", vmem_cap))
    except Exception:
        pass
    try:
        kind = jax.devices()[0].device_kind.lower()
        v5e_like = ("v5 lite" in kind) or ("v5e" in kind) or ("v5litepod" in kind)
        mxu_rows = 128 if v5e_like else 256
    except Exception:
        pass
    return vmem_cap, mxu_rows


def _rnn_kernel(num_layers, seq_len, chunk_t, *refs):
    """Ref layout:
       x_ref (T, Bt, In_pad) bf16,
       [w_ih_t (F_in_pad, H_pad) bf16, w_hh_t (H_pad, H_pad) bf16, bias (1, H_pad) f32] * L,
       w_fc_t (H_pad, Out_pad) bf16, b_fc (1, Out_pad) f32,
       out_ref (Bt, Out_pad) f32,
       acts_ref (T or 1, Bt, H_pad) bf16 scratch   (inter-layer tanh activations),
       proj_ref (chunk_t, Bt, H_pad) f32 scratch   (pre-activation chunk buffer).
    """
    x_ref = refs[0]
    layer_refs = refs[1:1 + 3 * num_layers]
    w_fc_ref = refs[1 + 3 * num_layers]
    b_fc_ref = refs[2 + 3 * num_layers]
    out_ref = refs[3 + 3 * num_layers]
    acts_ref = refs[4 + 3 * num_layers]
    proj_ref = refs[5 + 3 * num_layers]

    b_tile = x_ref.shape[1]
    h_pad = proj_ref.shape[2]

    n_full = seq_len // chunk_t
    rem = seq_len - n_full * chunk_t
    use_fori = (seq_len > _STATIC_UNROLL_T) and (n_full > 1)

    h_last = None
    for l in range(num_layers):
        # Weight/bias loads hoisted out of the time loop (loaded once per layer).
        w_ih = layer_refs[3 * l + 0][...]            # (F_in_pad, H_pad) bf16
        w_hh = layer_refs[3 * l + 1][...]            # (H_pad,  H_pad)   bf16
        bias = layer_refs[3 * l + 2][...]            # (1, H_pad)        f32  (= b_ih + b_hh)
        inp_ref = x_ref if l == 0 else acts_ref
        f_in = inp_ref.shape[-1]
        write_back = l < num_layers - 1              # last layer only needs the final h

        def run_chunk(t0, ct, h, *, _w_ih=w_ih, _w_hh=w_hh, _bias=bias,
                      _inp_ref=inp_ref, _f_in=f_in, _write=write_back):
            # Non-recurrent input projection for `ct` timesteps as one MXU GEMM, staged
            # through a small f32 VMEM chunk buffer (bounds vreg live ranges / spills).
            inp = _inp_ref[pl.ds(t0, ct)]                           # (ct, Bt, f_in) bf16
            proj = jnp.dot(inp.reshape(ct * b_tile, _f_in), _w_ih,
                           preferred_element_type=jnp.float32) + _bias
            proj_ref[pl.ds(0, ct)] = proj.reshape(ct, b_tile, h_pad)
            # Serial recurrence: only h_prev @ W_hh + tanh on the critical path.
            # TODO(synk): make W_hh weight-stationary across timesteps with
            #   pltpu.matmul_push_rhs / matmul_acc_lhs / matmul_pop once a bundle dump
            #   confirms the compiler re-pushes the RHS every step.
            for j in range(ct):
                z = proj_ref[j] + jnp.dot(h, _w_hh, preferred_element_type=jnp.float32)
                h = jnp.tanh(z).astype(jnp.bfloat16)   # bf16 h carry (matmul-operand dtype)
                if _write:
                    acts_ref[t0 + j] = h
            return h

        h = jnp.zeros((b_tile, h_pad), jnp.bfloat16)
        if use_fori:
            def chunk_body(c, hc, _run=run_chunk):
                t0 = pl.multiple_of(c * chunk_t, chunk_t)
                return _run(t0, chunk_t, hc)
            h = lax.fori_loop(0, n_full, chunk_body, h)
            if rem:
                h = run_chunk(n_full * chunk_t, rem, h)
        else:
            t0 = 0
            while t0 < seq_len:
                ct = min(chunk_t, seq_len - t0)
                h = run_chunk(t0, ct, h)
                t0 += ct
        h_last = h

    # Final Linear on the last timestep of the top layer.
    out_ref[...] = (jnp.dot(h_last, w_fc_ref[...], preferred_element_type=jnp.float32)
                    + b_fc_ref[...])


def rnn_model_forward(x, params, *, num_layers, hidden_size, output_size):
    """Forward pass matching RNNModel.forward. x: (B, T, input_size) or (T, input_size)."""
    if x.ndim == 2:                      # mirror the unsqueeze(0) in the torch forward
        x = x[None, ...]
    x = x.astype(jnp.float32)
    batch, seq_len, in_size = x.shape

    h_pad = _round_up(hidden_size, _LANE)
    o_pad = _round_up(output_size, _LANE)
    i_pad = _round_up(in_size, _LANE)

    vmem_cap, mxu_rows = _tpu_tiling_info()
    small_vmem = vmem_cap <= 64 * 1024 * 1024                    # v7x-class part
    vmem_limit = min(96 * 1024 * 1024,
                     max(32 * 1024 * 1024, (vmem_cap * 3) // 4))

    # ---- batch tile: MXU-width rows; >= 2 grid programs on 2-TensorCore (v7x-class) parts ----
    b_pad8 = _round_up(batch, _SUB)
    b_tile = min(b_pad8, mxu_rows)
    if small_vmem and b_pad8 > _SUB:
        b_tile = min(b_tile, _round_up((b_pad8 + 1) // 2, _SUB))

    acts_t = seq_len if num_layers > 1 else 1

    def _chunk_t(bt):
        return max(1, min(32, _CHUNK_ROWS // bt, seq_len))

    def _tile_vmem_bytes(bt):
        ct = _chunk_t(bt)
        n = 2 * seq_len * bt * i_pad * 2          # x block, bf16, double-buffered
        n += acts_t * bt * h_pad * 2              # activation scratch (bf16)
        n += ct * bt * h_pad * 4                  # projection chunk scratch (f32)
        n += 2 * bt * o_pad * 4                   # output block, double-buffered
        f_prev = i_pad                            # weights/biases: single-buffered
        for _ in range(num_layers):
            n += (f_prev * h_pad + h_pad * h_pad) * 2 + h_pad * 4
            f_prev = h_pad
        n += h_pad * o_pad * 2 + o_pad * 4
        return n

    while b_tile > _SUB and _tile_vmem_bytes(b_tile) > (3 * vmem_limit) // 4:
        b_tile = max(_SUB, _round_up(b_tile // 2, _SUB))

    b_pad = _round_up(batch, b_tile)
    chunk_t = _chunk_t(b_tile)
    # TODO(synk): if the (T, b_tile) input slab still overflows the VMEM budget for very long
    #             sequences, stream x / per-layer activations over time chunks with a manual
    #             double-buffered DMA instead of holding the whole slab resident.

    # Time-major, sublane/lane padded, bf16 input (zero padding is exact for this math).
    xt = jnp.transpose(x, (1, 0, 2))                                     # (T, B, In)
    xt = jnp.pad(xt, ((0, 0), (0, b_pad - batch), (0, i_pad - in_size)))
    xt = xt.astype(jnp.bfloat16)

    inputs = [xt]
    f_prev = i_pad
    for l in range(num_layers):
        w_ih, w_hh, b_ih, b_hh = params["layers"][l]
        in_l = w_ih.shape[1]
        w_ih_t = jnp.pad(w_ih.T.astype(jnp.float32),
                         ((0, f_prev - in_l), (0, h_pad - hidden_size)))
        w_hh_t = jnp.pad(w_hh.T.astype(jnp.float32),
                         ((0, h_pad - hidden_size), (0, h_pad - hidden_size)))
        bias = jnp.pad((b_ih + b_hh).astype(jnp.float32),
                       (0, h_pad - hidden_size)).reshape(1, h_pad)
        inputs += [w_ih_t.astype(jnp.bfloat16), w_hh_t.astype(jnp.bfloat16), bias]
        f_prev = h_pad
    w_fc_t = jnp.pad(params["w_fc"].T.astype(jnp.float32),
                     ((0, h_pad - hidden_size), (0, o_pad - output_size)))
    b_fc = jnp.pad(params["b_fc"].astype(jnp.float32),
                   (0, o_pad - output_size)).reshape(1, o_pad)
    inputs += [w_fc_t.astype(jnp.bfloat16), b_fc]

    def _build_specs(single_buffer_weights):
        def const_spec(shape):
            idx = (lambda b, _n=len(shape): (0,) * _n)
            if single_buffer_weights:
                try:
                    # Grid-invariant weight blocks: double-buffering them wastes VMEM.
                    return pl.BlockSpec(shape, idx, pipeline_mode=pl.Buffered(1))
                except TypeError:
                    return pl.BlockSpec(shape, idx)
            return pl.BlockSpec(shape, idx)

        specs = [pl.BlockSpec((seq_len, b_tile, i_pad), lambda b: (0, b, 0))]
        fp = i_pad
        for _ in range(num_layers):
            specs += [const_spec((fp, h_pad)),
                      const_spec((h_pad, h_pad)),
                      const_spec((1, h_pad))]
            fp = h_pad
        specs += [const_spec((h_pad, o_pad)), const_spec((1, o_pad))]
        return specs

    kernel = functools.partial(_rnn_kernel, num_layers, seq_len, chunk_t)

    def _call(single_buffer_weights):
        return pl.pallas_call(
            kernel,
            out_shape=jax.ShapeDtypeStruct((b_pad, o_pad), jnp.float32),
            grid_spec=pltpu.PrefetchScalarGridSpec(
                num_scalar_prefetch=0,
                grid=(b_pad // b_tile,),
                in_specs=_build_specs(single_buffer_weights),
                out_specs=pl.BlockSpec((b_tile, o_pad), lambda b: (b, 0)),
                scratch_shapes=[pltpu.VMEM((acts_t, b_tile, h_pad), jnp.bfloat16),
                                pltpu.VMEM((chunk_t, b_tile, h_pad), jnp.float32)],
            ),
            compiler_params=pltpu.CompilerParams(
                dimension_semantics=("parallel",),
                vmem_limit_bytes=vmem_limit,
            ),
        )(*inputs)

    try:
        out_pad = _call(True)
    except Exception:
        # Fallback if this jax version rejects single-buffered (pl.Buffered(1)) specs.
        out_pad = _call(False)

    return out_pad[:batch, :output_size]


def init_params(key, input_size, hidden_size, output_size, num_layers):
    """Deterministic init mimicking torch defaults (uniform(-1/sqrt(fan), 1/sqrt(fan)))."""
    layers = []
    k_rnn = 1.0 / jnp.sqrt(hidden_size)
    for l in range(num_layers):
        in_l = input_size if l == 0 else hidden_size
        key, k1, k2, k3, k4 = jax.random.split(key, 5)
        w_ih = jax.random.uniform(k1, (hidden_size, in_l), jnp.float32, -k_rnn, k_rnn)
        w_hh = jax.random.uniform(k2, (hidden_size, hidden_size), jnp.float32, -k_rnn, k_rnn)
        b_ih = jax.random.uniform(k3, (hidden_size,), jnp.float32, -k_rnn, k_rnn)
        b_hh = jax.random.uniform(k4, (hidden_size,), jnp.float32, -k_rnn, k_rnn)
        layers.append((w_ih, w_hh, b_ih, b_hh))
    key, k5, k6 = jax.random.split(key, 3)
    k_fc = 1.0 / jnp.sqrt(hidden_size)
    w_fc = jax.random.uniform(k5, (output_size, hidden_size), jnp.float32, -k_fc, k_fc)
    b_fc = jax.random.uniform(k6, (output_size,), jnp.float32, -k_fc, k_fc)
    return {"layers": layers, "w_fc": w_fc, "b_fc": b_fc}


def reference_forward(x, params, *, num_layers, hidden_size, bf16_matmul=False):
    """Pure-JAX reference.  bf16_matmul=True mirrors the kernel's operand precision."""
    def mm(a, b):
        if bf16_matmul:
            a = a.astype(jnp.bfloat16)
            b = b.astype(jnp.bfloat16)
        return jnp.dot(a, b, preferred_element_type=jnp.float32)

    batch, seq_len, _ = x.shape
    h = [jnp.zeros((batch, hidden_size), jnp.float32) for _ in range(num_layers)]
    for t in range(seq_len):
        inp = x[:, t, :]
        for l in range(num_layers):
            w_ih, w_hh, b_ih, b_hh = params["layers"][l]
            h[l] = jnp.tanh(mm(inp, w_ih.T) + mm(h[l], w_hh.T) + b_ih + b_hh)
            inp = h[l]
    return mm(h[-1], params["w_fc"].T) + params["b_fc"]


if __name__ == "__main__":
    def _check(name, *, input_size, hidden_size, output_size, num_layers, B, T, seed,
               tol_bf16, tol_f32):
        key = jax.random.PRNGKey(seed)
        key, kx = jax.random.split(key)
        x = jax.random.normal(kx, (B, T, input_size), jnp.float32)
        params = init_params(key, input_size, hidden_size, output_size, num_layers)

        out = rnn_model_forward(x, params, num_layers=num_layers,
                                hidden_size=hidden_size, output_size=output_size)
        out = jax.block_until_ready(out)
        assert out.shape == (B, output_size)

        # Structural check: same math, matmul operands in bf16 like the kernel.
        ref_bf16 = reference_forward(x, params, num_layers=num_layers,
                                     hidden_size=hidden_size, bf16_matmul=True)
        # Loose sanity check against the full-f32 reference (covers bf16 operand rounding).
        ref_f32 = reference_forward(x, params, num_layers=num_layers,
                                    hidden_size=hidden_size, bf16_matmul=False)

        assert jnp.allclose(out, ref_bf16, atol=tol_bf16, rtol=tol_bf16), \
            f"{name}: mismatch vs bf16-matmul reference"
        assert jnp.allclose(out, ref_f32, atol=tol_f32, rtol=tol_f32), \
            f"{name}: mismatch vs f32 reference"

    # Small config from the spec (fully-static chunk path).
    _check("small", input_size=16, hidden_size=32, output_size=10, num_layers=2,
           B=2, T=8, seed=0, tol_bf16=5e-3, tol_f32=1e-1)
    # Longer sequence / larger batch (exercises the fori_loop chunk path + larger b_tile).
    _check("long", input_size=20, hidden_size=64, output_size=12, num_layers=2,
           B=16, T=72, seed=1, tol_bf16=1e-2, tol_f32=2e-1)

    print("KERNEL_OK")
</pallas_src>

<mosaic_0001>
module attributes {stable_mosaic.version = 11 : i64} {
  func.func @_rnn_kernel(%arg0: i32, %arg1: memref<8x8x128xbf16, #tpu.memory_space<vmem>>, %arg2: memref<128x128xbf16, #tpu.memory_space<vmem>>, %arg3: memref<128x128xbf16, #tpu.memory_space<vmem>>, %arg4: memref<1x128xf32, #tpu.memory_space<vmem>>, %arg5: memref<128x128xbf16, #tpu.memory_space<vmem>>, %arg6: memref<128x128xbf16, #tpu.memory_space<vmem>>, %arg7: memref<1x128xf32, #tpu.memory_space<vmem>>, %arg8: memref<128x128xbf16, #tpu.memory_space<vmem>>, %arg9: memref<1x128xf32, #tpu.memory_space<vmem>>, %arg10: memref<8x128xf32, #tpu.memory_space<vmem>>, %arg11: memref<8x8x128xbf16, #tpu.memory_space<vmem>>, %arg12: memref<8x8x128xf32, #tpu.memory_space<vmem>>) attributes {dimension_semantics = [#tpu.dimension_semantics<parallel>], iteration_bounds = array<i64: 1>, scalar_prefetch = 0 : i64, scratch_operands = 2 : i64, tpu.core_type = #tpu.core_type<tc>, window_params = [{transform_indices = @transform_0, window_bounds = array<i64: 8, 8, 128>}, {pipeline_mode = #tpu.pipeline_mode<synchronous>, transform_indices = @transform_1, window_bounds = array<i64: 128, 128>}, {pipeline_mode = #tpu.pipeline_mode<synchronous>, transform_indices = @transform_2, window_bounds = array<i64: 128, 128>}, {pipeline_mode = #tpu.pipeline_mode<synchronous>, transform_indices = @transform_3, window_bounds = array<i64: 1, 128>}, {pipeline_mode = #tpu.pipeline_mode<synchronous>, transform_indices = @transform_4, window_bounds = array<i64: 128, 128>}, {pipeline_mode = #tpu.pipeline_mode<synchronous>, transform_indices = @transform_5, window_bounds = array<i64: 128, 128>}, {pipeline_mode = #tpu.pipeline_mode<synchronous>, transform_indices = @transform_6, window_bounds = array<i64: 1, 128>}, {pipeline_mode = #tpu.pipeline_mode<synchronous>, transform_indices = @transform_7, window_bounds = array<i64: 128, 128>}, {pipeline_mode = #tpu.pipeline_mode<synchronous>, transform_indices = @transform_8, window_bounds = array<i64: 1, 128>}, {transform_indices = @transform_9, window_bounds = array<i64: 8, 128>}]} {
    %c0 = arith.constant 0 : index
    %c0_0 = arith.constant 0 : index
    %0 = vector.load %arg2[%c0, %c0_0] : memref<128x128xbf16, #tpu.memory_space<vmem>>, vector<128x128xbf16>
    %c0_1 = arith.constant 0 : index
    %c0_2 = arith.constant 0 : index
    %1 = vector.load %arg3[%c0_1, %c0_2] : memref<128x128xbf16, #tpu.memory_space<vmem>>, vector<128x128xbf16>
    %c0_3 = arith.constant 0 : index
    %c0_4 = arith.constant 0 : index
    %2 = vector.load %arg4[%c0_3, %c0_4] : memref<1x128xf32, #tpu.memory_space<vmem>>, vector<1x128xf32>
    %cst = arith.constant 0.000000e+00 : bf16
    %3 = vector.broadcast %cst : bf16 to vector<8x128xbf16>
    %c0_5 = arith.constant 0 : index
    %c0_6 = arith.constant 0 : index
    %c0_7 = arith.constant 0 : index
    %4 = vector.load %arg1[%c0_5, %c0_6, %c0_7] : memref<8x8x128xbf16, #tpu.memory_space<vmem>>, vector<8x8x128xbf16>
    %5 = vector.shape_cast %4 : vector<8x8x128xbf16> to vector<64x128xbf16>
    %cst_8 = arith.constant dense<0.000000e+00> : vector<64x128xf32>
    %6 = tpu.matmul %5, %0, %cst_8 {dimension_numbers = #tpu.dot_dimension_numbers<[1], [0], [0], [1], [0, 0, 1, 1], [], []>} : vector<64x128xbf16>, vector<128x128xbf16>, vector<64x128xf32> -> vector<64x128xf32>
    %7 = vector.broadcast %2 : vector<1x128xf32> to vector<64x128xf32>
    %8 = arith.addf %6, %7 : vector<64x128xf32>
    %9 = vector.shape_cast %8 : vector<64x128xf32> to vector<8x8x128xf32>
    %c0_9 = arith.constant 0 : index
    %c0_10 = arith.constant 0 : index
    %c0_11 = arith.constant 0 : index
    %10 = vector.load %arg12[%c0_9, %c0_10, %c0_11] : memref<8x8x128xf32, #tpu.memory_space<vmem>>, vector<8x8x128xf32>
    tpu.vector_store %arg12[%c0_9, %c0_10, %c0_11], %9 {strides = array<i32>} : memref<8x8x128xf32, #tpu.memory_space<vmem>>, vector<8x8x128xf32>,
    %c0_12 = arith.constant 0 : index
    %c0_13 = arith.constant 0 : index
    %c0_14 = arith.constant 0 : index
    %11 = vector.load %arg12[%c0_12, %c0_13, %c0_14] : memref<8x8x128xf32, #tpu.memory_space<vmem>>, vector<1x8x128xf32>
    %12 = vector.shape_cast %11 : vector<1x8x128xf32> to vector<8x128xf32>
    %cst_15 = arith.constant dense<0.000000e+00> : vector<8x128xf32>
    %13 = tpu.matmul %3, %1, %cst_15 {dimension_numbers = #tpu.dot_dimension_numbers<[1], [0], [0], [1], [0, 0, 1, 1], [], []>} : vector<8x128xbf16>, vector<128x128xbf16>, vector<8x128xf32> -> vector<8x128xf32>
    %14 = arith.addf %12, %13 : vector<8x128xf32>
    %15 = math.tanh %14 : vector<8x128xf32>
    %16 = arith.truncf %15 : vector<8x128xf32> to vector<8x128xbf16>
    %c0_16 = arith.constant 0 : index
    %c0_17 = arith.constant 0 : index
    %c0_18 = arith.constant 0 : index
    %17 = vector.load %arg11[%c0_16, %c0_17, %c0_18] : memref<8x8x128xbf16, #tpu.memory_space<vmem>>, vector<1x8x128xbf16>
    %18 = vector.shape_cast %17 : vector<1x8x128xbf16> to vector<8x128xbf16>
    %19 = vector.shape_cast %16 : vector<8x128xbf16> to vector<1x8x128xbf16>
    tpu.vector_store %arg11[%c0_16, %c0_17, %c0_18], %19 {strides = array<i32>} : memref<8x8x128xbf16, #tpu.memory_space<vmem>>, vector<1x8x128xbf16>,
    %c1 = arith.constant 1 : index
    %c0_19 = arith.constant 0 : index
    %c0_20 = arith.constant 0 : index
    %20 = vector.load %arg12[%c1, %c0_19, %c0_20] : memref<8x8x128xf32, #tpu.memory_space<vmem>>, vector<1x8x128xf32>
    %21 = vector.shape_cast %20 : vector<1x8x128xf32> to vector<8x128xf32>
    %cst_21 = arith.constant dense<0.000000e+00> : vector<8x128xf32>
    %22 = tpu.matmul %16, %1, %cst_21 {dimension_numbers = #tpu.dot_dimension_numbers<[1], [0], [0], [1], [0, 0, 1, 1], [], []>} : vector<8x128xbf16>, vector<128x128xbf16>, vector<8x128xf32> -> vector<8x128xf32>
    %23 = arith.addf %21, %22 : vector<8x128xf32>
    %24 = math.tanh %23 : vector<8x128xf32>
    %25 = arith.truncf %24 : vector<8x128xf32> to vector<8x128xbf16>
    %c1_22 = arith.constant 1 : index
    %c0_23 = arith.constant 0 : index
    %c0_24 = arith.constant 0 : index
    %26 = vector.load %arg11[%c1_22, %c0_23, %c0_24] : memref<8x8x128xbf16, #tpu.memory_space<vmem>>, vector<1x8x128xbf16>
    %27 = vector.shape_cast %26 : vector<1x8x128xbf16> to vector<8x128xbf16>
    %28 = vector.shape_cast %25 : vector<8x128xbf16> to vector<1x8x128xbf16>
    tpu.vector_store %arg11[%c1_22, %c0_23, %c0_24], %28 {strides = array<i32>} : memref<8x8x128xbf16, #tpu.memory_space<vmem>>, vector<1x8x128xbf16>,
    %c2 = arith.constant 2 : index
    %c0_25 = arith.constant 0 : index
    %c0_26 = arith.constant 0 : index
    %29 = vector.load %arg12[%c2, %c0_25, %c0_26] : memref<8x8x128xf32, #tpu.memory_space<vmem>>, vector<1x8x128xf32>
    %30 = vector.shape_cast %29 : vector<1x8x128xf32> to vector<8x128xf32>
    %cst_27 = arith.constant dense<0.000000e+00> : vector<8x128xf32>
    %31 = tpu.matmul %25, %1, %cst_27 {dimension_numbers = #tpu.dot_dimension_numbers<[1], [0], [0], [1], [0, 0, 1, 1], [], []>} : vector<8x128xbf16>, vector<128x128xbf16>, vector<8x128xf32> -> vector<8x128xf32>
    %32 = arith.addf %30, %31 : vector<8x128xf32>
    %33 = math.tanh %32 : vector<8x128xf32>
    %34 = arith.truncf %33 : vector<8x128xf32> to vector<8x128xbf16>
    %c2_28 = arith.constant 2 : index
    %c0_29 = arith.constant 0 : index
    %c0_30 = arith.constant 0 : index
    %35 = vector.load %arg11[%c2_28, %c0_29, %c0_30] : memref<8x8x128xbf16, #tpu.memory_space<vmem>>, vector<1x8x128xbf16>
    %36 = vector.shape_cast %35 : vector<1x8x128xbf16> to vector<8x128xbf16>
    %37 = vector.shape_cast %34 : vector<8x128xbf16> to vector<1x8x128xbf16>
    tpu.vector_store %arg11[%c2_28, %c0_29, %c0_30], %37 {strides = array<i32>} : memref<8x8x128xbf16, #tpu.memory_space<vmem>>, vector<1x8x128xbf16>,
    %c3 = arith.constant 3 : index
    %c0_31 = arith.constant 0 : index
    %c0_32 = arith.constant 0 : index
    %38 = vector.load %arg12[%c3, %c0_31, %c0_32] : memref<8x8x128xf32, #tpu.memory_space<vmem>>, vector<1x8x128xf32>
    %39 = vector.shape_cast %38 : vector<1x8x128xf32> to vector<8x128xf32>
    %cst_33 = arith.constant dense<0.000000e+00> : vector<8x128xf32>
    %40 = tpu.matmul %34, %1, %cst_33 {dimension_numbers = #tpu.dot_dimension_numbers<[1], [0], [0], [1], [0, 0, 1, 1], [], []>} : vector<8x128xbf16>, vector<128x128xbf16>, vector<8x128xf32> -> vector<8x128xf32>
    %41 = arith.addf %39, %40 : vector<8x128xf32>
    %42 = math.tanh %41 : vector<8x128xf32>
    %43 = arith.truncf %42 : vector<8x128xf32> to vector<8x128xbf16>
    %c3_34 = arith.constant 3 : index
    %c0_35 = arith.constant 0 : index
    %c0_36 = arith.constant 0 : index
    %44 = vector.load %arg11[%c3_34, %c0_35, %c0_36] : memref<8x8x128xbf16, #tpu.memory_space<vmem>>, vector<1x8x128xbf16>
    %45 = vector.shape_cast %44 : vector<1x8x128xbf16> to vector<8x128xbf16>
    %46 = vector.shape_cast %43 : vector<8x128xbf16> to vector<1x8x128xbf16>
    tpu.vector_store %arg11[%c3_34, %c0_35, %c0_36], %46 {strides = array<i32>} : memref<8x8x128xbf16, #tpu.memory_space<vmem>>, vector<1x8x128xbf16>,
    %c4 = arith.constant 4 : index
    %c0_37 = arith.constant 0 : index
    %c0_38 = arith.constant 0 : index
    %47 = vector.load %arg12[%c4, %c0_37, %c0_38] : memref<8x8x128xf32, #tpu.memory_space<vmem>>, vector<1x8x128xf32>
    %48 = vector.shape_cast %47 : vector<1x8x128xf32> to vector<8x128xf32>
    %cst_39 = arith.constant dense<0.000000e+00> : vector<8x128xf32>
    %49 = tpu.matmul %43, %1, %cst_39 {dimension_numbers = #tpu.dot_dimension_numbers<[1], [0], [0], [1], [0, 0, 1, 1], [], []>} : vector<8x128xbf16>, vector<128x128xbf16>, vector<8x128xf32> -> vector<8x128xf32>
    %50 = arith.addf %48, %49 : vector<8x128xf32>
    %51 = math.tanh %50 : vector<8x128xf32>
    %52 = arith.truncf %51 : vector<8x128xf32> to vector<8x128xbf16>
    %c4_40 = arith.constant 4 : index
    %c0_41 = arith.constant 0 : index
    %c0_42 = arith.constant 0 : index
    %53 = vector.load %arg11[%c4_40, %c0_41, %c0_42] : memref<8x8x128xbf16, #tpu.memory_space<vmem>>, vector<1x8x128xbf16>
    %54 = vector.shape_cast %53 : vector<1x8x128xbf16> to vector<8x128xbf16>
    %55 = vector.shape_cast %52 : vector<8x128xbf16> to vector<1x8x128xbf16>
    tpu.vector_store %arg11[%c4_40, %c0_41, %c0_42], %55 {strides = array<i32>} : memref<8x8x128xbf16, #tpu.memory_space<vmem>>, vector<1x8x128xbf16>,
    %c5 = arith.constant 5 : index
    %c0_43 = arith.constant 0 : index
    %c0_44 = arith.constant 0 : index
    %56 = vector.load %arg12[%c5, %c0_43, %c0_44] : memref<8x8x128xf32, #tpu.memory_space<vmem>>, vector<1x8x128xf32>
    %57 = vector.shape_cast %56 : vector<1x8x128xf32> to vector<8x128xf32>
    %cst_45 = arith.constant dense<0.000000e+00> : vector<8x128xf32>
    %58 = tpu.matmul %52, %1, %cst_45 {dimension_numbers = #tpu.dot_dimension_numbers<[1], [0], [0], [1], [0, 0, 1, 1], [], []>} : vector<8x128xbf16>, vector<128x128xbf16>, vector<8x128xf32> -> vector<8x128xf32>
    %59 = arith.addf %57, %58 : vector<8x128xf32>
    %60 = math.tanh %59 : vector<8x128xf32>
    %61 = arith.truncf %60 : vector<8x128xf32> to vector<8x128xbf16>
    %c5_46 = arith.constant 5 : index
    %c0_47 = arith.constant 0 : index
    %c0_48 = arith.constant 0 : index
    %62 = vector.load %arg11[%c5_46, %c0_47, %c0_48] : memref<8x8x128xbf16, #tpu.memory_space<vmem>>, vector<1x8x128xbf16>
    %63 = vector.shape_cast %62 : vector<1x8x128xbf16> to vector<8x128xbf16>
    %64 = vector.shape_cast %61 : vector<8x128xbf16> to vector<1x8x128xbf16>
    tpu.vector_store %arg11[%c5_46, %c0_47, %c0_48], %64 {strides = array<i32>} : memref<8x8x128xbf16, #tpu.memory_space<vmem>>, vector<1x8x128xbf16>,
    %c6 = arith.constant 6 : index
    %c0_49 = arith.constant 0 : index
    %c0_50 = arith.constant 0 : index
    %65 = vector.load %arg12[%c6, %c0_49, %c0_50] : memref<8x8x128xf32, #tpu.memory_space<vmem>>, vector<1x8x128xf32>
    %66 = vector.shape_cast %65 : vector<1x8x128xf32> to vector<8x128xf32>
    %cst_51 = arith.constant dense<0.000000e+00> : vector<8x128xf32>
    %67 = tpu.matmul %61, %1, %cst_51 {dimension_numbers = #tpu.dot_dimension_numbers<[1], [0], [0], [1], [0, 0, 1, 1], [], []>} : vector<8x128xbf16>, vector<128x128xbf16>, vector<8x128xf32> -> vector<8x128xf32>
    %68 = arith.addf %66, %67 : vector<8x128xf32>
    %69 = math.tanh %68 : vector<8x128xf32>
    %70 = arith.truncf %69 : vector<8x128xf32> to vector<8x128xbf16>
    %c6_52 = arith.constant 6 : index
    %c0_53 = arith.constant 0 : index
    %c0_54 = arith.constant 0 : index
    %71 = vector.load %arg11[%c6_52, %c0_53, %c0_54] : memref<8x8x128xbf16, #tpu.memory_space<vmem>>, vector<1x8x128xbf16>
    %72 = vector.shape_cast %71 : vector<1x8x128xbf16> to vector<8x128xbf16>
    %73 = vector.shape_cast %70 : vector<8x128xbf16> to vector<1x8x128xbf16>
    tpu.vector_store %arg11[%c6_52, %c0_53, %c0_54], %73 {strides = array<i32>} : memref<8x8x128xbf16, #tpu.memory_space<vmem>>, vector<1x8x128xbf16>,
    %c7 = arith.constant 7 : index
    %c0_55 = arith.constant 0 : index
    %c0_56 = arith.constant 0 : index
    %74 = vector.load %arg12[%c7, %c0_55, %c0_56] : memref<8x8x128xf32, #tpu.memory_space<vmem>>, vector<1x8x128xf32>
    %75 = vector.shape_cast %74 : vector<1x8x128xf32> to vector<8x128xf32>
    %cst_57 = arith.constant dense<0.000000e+00> : vector<8x128xf32>
    %76 = tpu.matmul %70, %1, %cst_57 {dimension_numbers = #tpu.dot_dimension_numbers<[1], [0], [0], [1], [0, 0, 1, 1], [], []>} : vector<8x128xbf16>, vector<128x128xbf16>, vector<8x128xf32> -> vector<8x128xf32>
    %77 = arith.addf %75, %76 : vector<8x128xf32>
    %78 = math.tanh %77 : vector<8x128xf32>
    %79 = arith.truncf %78 : vector<8x128xf32> to vector<8x128xbf16>
    %c7_58 = arith.constant 7 : index
    %c0_59 = arith.constant 0 : index
    %c0_60 = arith.constant 0 : index
    %80 = vector.load %arg11[%c7_58, %c0_59, %c0_60] : memref<8x8x128xbf16, #tpu.memory_space<vmem>>, vector<1x8x128xbf16>
    %81 = vector.shape_cast %80 : vector<1x8x128xbf16> to vector<8x128xbf16>
    %82 = vector.shape_cast %79 : vector<8x128xbf16> to vector<1x8x128xbf16>
    tpu.vector_store %arg11[%c7_58, %c0_59, %c0_60], %82 {strides = array<i32>} : memref<8x8x128xbf16, #tpu.memory_space<vmem>>, vector<1x8x128xbf16>,
    %c0_61 = arith.constant 0 : index
    %c0_62 = arith.constant 0 : index
    %83 = vector.load %arg5[%c0_61, %c0_62] : memref<128x128xbf16, #tpu.memory_space<vmem>>, vector<128x128xbf16>
    %c0_63 = arith.constant 0 : index
    %c0_64 = arith.constant 0 : index
    %84 = vector.load %arg6[%c0_63, %c0_64] : memref<128x128xbf16, #tpu.memory_space<vmem>>, vector<128x128xbf16>
    %c0_65 = arith.constant 0 : index
    %c0_66 = arith.constant 0 : index
    %85 = vector.load %arg7[%c0_65, %c0_66] : memref<1x128xf32, #tpu.memory_space<vmem>>, vector<1x128xf32>
    %cst_67 = arith.constant 0.000000e+00 : bf16
    %86 = vector.broadcast %cst_67 : bf16 to vector<8x128xbf16>
    %c0_68 = arith.constant 0 : index
    %c0_69 = arith.constant 0 : index
    %c0_70 = arith.constant 0 : index
    %87 = vector.load %arg11[%c0_68, %c0_69, %c0_70] : memref<8x8x128xbf16, #tpu.memory_space<vmem>>, vector<8x8x128xbf16>
    %88 = vector.shape_cast %87 : vector<8x8x128xbf16> to vector<64x128xbf16>
    %cst_71 = arith.constant dense<0.000000e+00> : vector<64x128xf32>
    %89 = tpu.matmul %88, %83, %cst_71 {dimension_numbers = #tpu.dot_dimension_numbers<[1], [0], [0], [1], [0, 0, 1, 1], [], []>} : vector<64x128xbf16>, vector<128x128xbf16>, vector<64x128xf32> -> vector<64x128xf32>
    %90 = vector.broadcast %85 : vector<1x128xf32> to vector<64x128xf32>
    %91 = arith.addf %89, %90 : vector<64x128xf32>
    %92 = vector.shape_cast %91 : vector<64x128xf32> to vector<8x8x128xf32>
    %c0_72 = arith.constant 0 : index
    %c0_73 = arith.constant 0 : index
    %c0_74 = arith.constant 0 : index
    %93 = vector.load %arg12[%c0_72, %c0_73, %c0_74] : memref<8x8x128xf32, #tpu.memory_space<vmem>>, vector<8x8x128xf32>
    tpu.vector_store %arg12[%c0_72, %c0_73, %c0_74], %92 {strides = array<i32>} : memref<8x8x128xf32, #tpu.memory_space<vmem>>, vector<8x8x128xf32>,
    %c0_75 = arith.constant 0 : index
    %c0_76 = arith.constant 0 : index
    %c0_77 = arith.constant 0 : index
    %94 = vector.load %arg12[%c0_75, %c0_76, %c0_77] : memref<8x8x128xf32, #tpu.memory_space<vmem>>, vector<1x8x128xf32>
    %95 = vector.shape_cast %94 : vector<1x8x128xf32> to vector<8x128xf32>
    %cst_78 = arith.constant dense<0.000000e+00> : vector<8x128xf32>
    %96 = tpu.matmul %86, %84, %cst_78 {dimension_numbers = #tpu.dot_dimension_numbers<[1], [0], [0], [1], [0, 0, 1, 1], [], []>} : vector<8x128xbf16>, vector<128x128xbf16>, vector<8x128xf32> -> vector<8x128xf32>
    %97 = arith.addf %95, %96 : vector<8x128xf32>
    %98 = math.tanh %97 : vector<8x128xf32>
    %99 = arith.truncf %98 : vector<8x128xf32> to vector<8x128xbf16>
    %c1_79 = arith.constant 1 : index
    %c0_80 = arith.constant 0 : index
    %c0_81 = arith.constant 0 : index
    %100 = vector.load %arg12[%c1_79, %c0_80, %c0_81] : memref<8x8x128xf32, #tpu.memory_space<vmem>>, vector<1x8x128xf32>
    %101 = vector.shape_cast %100 : vector<1x8x128xf32> to vector<8x128xf32>
    %cst_82 = arith.constant dense<0.000000e+00> : vector<8x128xf32>
    %102 = tpu.matmul %99, %84, %cst_82 {dimension_numbers = #tpu.dot_dimension_numbers<[1], [0], [0], [1], [0, 0, 1, 1], [], []>} : vector<8x128xbf16>, vector<128x128xbf16>, vector<8x128xf32> -> vector<8x128xf32>
    %103 = arith.addf %101, %102 : vector<8x128xf32>
    %104 = math.tanh %103 : vector<8x128xf32>
    %105 = arith.truncf %104 : vector<8x128xf32> to vector<8x128xbf16>
    %c2_83 = arith.constant 2 : index
    %c0_84 = arith.constant 0 : index
    %c0_85 = arith.constant 0 : index
    %106 = vector.load %arg12[%c2_83, %c0_84, %c0_85] : memref<8x8x128xf32, #tpu.memory_space<vmem>>, vector<1x8x128xf32>
    %107 = vector.shape_cast %106 : vector<1x8x128xf32> to vector<8x128xf32>
    %cst_86 = arith.constant dense<0.000000e+00> : vector<8x128xf32>
    %108 = tpu.matmul %105, %84, %cst_86 {dimension_numbers = #tpu.dot_dimension_numbers<[1], [0], [0], [1], [0, 0, 1, 1], [], []>} : vector<8x128xbf16>, vector<128x128xbf16>, vector<8x128xf32> -> vector<8x128xf32>
    %109 = arith.addf %107, %108 : vector<8x128xf32>
    %110 = math.tanh %109 : vector<8x128xf32>
    %111 = arith.truncf %110 : vector<8x128xf32> to vector<8x128xbf16>
    %c3_87 = arith.constant 3 : index
    %c0_88 = arith.constant 0 : index
    %c0_89 = arith.constant 0 : index
    %112 = vector.load %arg12[%c3_87, %c0_88, %c0_89] : memref<8x8x128xf32, #tpu.memory_space<vmem>>, vector<1x8x128xf32>
    %113 = vector.shape_cast %112 : vector<1x8x128xf32> to vector<8x128xf32>
    %cst_90 = arith.constant dense<0.000000e+00> : vector<8x128xf32>
    %114 = tpu.matmul %111, %84, %cst_90 {dimension_numbers = #tpu.dot_dimension_numbers<[1], [0], [0], [1], [0, 0, 1, 1], [], []>} : vector<8x128xbf16>, vector<128x128xbf16>, vector<8x128xf32> -> vector<8x128xf32>
    %115 = arith.addf %113, %114 : vector<8x128xf32>
    %116 = math.tanh %115 : vector<8x128xf32>
    %117 = arith.truncf %116 : vector<8x128xf32> to vector<8x128xbf16>
    %c4_91 = arith.constant 4 : index
    %c0_92 = arith.constant 0 : index
    %c0_93 = arith.constant 0 : index
    %118 = vector.load %arg12[%c4_91, %c0_92, %c0_93] : memref<8x8x128xf32, #tpu.memory_space<vmem>>, vector<1x8x128xf32>
    %119 = vector.shape_cast %118 : vector<1x8x128xf32> to vector<8x128xf32>
    %cst_94 = arith.constant dense<0.000000e+00> : vector<8x128xf32>
    %120 = tpu.matmul %117, %84, %cst_94 {dimension_numbers = #tpu.dot_dimension_numbers<[1], [0], [0], [1], [0, 0, 1, 1], [], []>} : vector<8x128xbf16>, vector<128x128xbf16>, vector<8x128xf32> -> vector<8x128xf32>
    %121 = arith.addf %119, %120 : vector<8x128xf32>
    %122 = math.tanh %121 : vector<8x128xf32>
    %123 = arith.truncf %122 : vector<8x128xf32> to vector<8x128xbf16>
    %c5_95 = arith.constant 5 : index
    %c0_96 = arith.constant 0 : index
    %c0_97 = arith.constant 0 : index
    %124 = vector.load %arg12[%c5_95, %c0_96, %c0_97] : memref<8x8x128xf32, #tpu.memory_space<vmem>>, vector<1x8x128xf32>
    %125 = vector.shape_cast %124 : vector<1x8x128xf32> to vector<8x128xf32>
    %cst_98 = arith.constant dense<0.000000e+00> : vector<8x128xf32>
    %126 = tpu.matmul %123, %84, %cst_98 {dimension_numbers = #tpu.dot_dimension_numbers<[1], [0], [0], [1], [0, 0, 1, 1], [], []>} : vector<8x128xbf16>, vector<128x128xbf16>, vector<8x128xf32> -> vector<8x128xf32>
    %127 = arith.addf %125, %126 : vector<8x128xf32>
    %128 = math.tanh %127 : vector<8x128xf32>
    %129 = arith.truncf %128 : vector<8x128xf32> to vector<8x128xbf16>
    %c6_99 = arith.constant 6 : index
    %c0_100 = arith.constant 0 : index
    %c0_101 = arith.constant 0 : index
    %130 = vector.load %arg12[%c6_99, %c0_100, %c0_101] : memref<8x8x128xf32, #tpu.memory_space<vmem>>, vector<1x8x128xf32>
    %131 = vector.shape_cast %130 : vector<1x8x128xf32> to vector<8x128xf32>
    %cst_102 = arith.constant dense<0.000000e+00> : vector<8x128xf32>
    %132 = tpu.matmul %129, %84, %cst_102 {dimension_numbers = #tpu.dot_dimension_numbers<[1], [0], [0], [1], [0, 0, 1, 1], [], []>} : vector<8x128xbf16>, vector<128x128xbf16>, vector<8x128xf32> -> vector<8x128xf32>
    %133 = arith.addf %131, %132 : vector<8x128xf32>
    %134 = math.tanh %133 : vector<8x128xf32>
    %135 = arith.truncf %134 : vector<8x128xf32> to vector<8x128xbf16>
    %c7_103 = arith.constant 7 : index
    %c0_104 = arith.constant 0 : index
    %c0_105 = arith.constant 0 : index
    %136 = vector.load %arg12[%c7_103, %c0_104, %c0_105] : memref<8x8x128xf32, #tpu.memory_space<vmem>>, vector<1x8x128xf32>
    %137 = vector.shape_cast %136 : vector<1x8x128xf32> to vector<8x128xf32>
    %cst_106 = arith.constant dense<0.000000e+00> : vector<8x128xf32>
    %138 = tpu.matmul %135, %84, %cst_106 {dimension_numbers = #tpu.dot_dimension_numbers<[1], [0], [0], [1], [0, 0, 1, 1], [], []>} : vector<8x128xbf16>, vector<128x128xbf16>, vector<8x128xf32> -> vector<8x128xf32>
    %139 = arith.addf %137, %138 : vector<8x128xf32>
    %140 = math.tanh %139 : vector<8x128xf32>
    %141 = arith.truncf %140 : vector<8x128xf32> to vector<8x128xbf16>
    %c0_107 = arith.constant 0 : index
    %c0_108 = arith.constant 0 : index
    %142 = vector.load %arg8[%c0_107, %c0_108] : memref<128x128xbf16, #tpu.memory_space<vmem>>, vector<128x128xbf16>
    %cst_109 = arith.constant dense<0.000000e+00> : vector<8x128xf32>
    %143 = tpu.matmul %141, %142, %cst_109 {dimension_numbers = #tpu.dot_dimension_numbers<[1], [0], [0], [1], [0, 0, 1, 1], [], []>} : vector<8x128xbf16>, vector<128x128xbf16>, vector<8x128xf32> -> vector<8x128xf32>
    %c0_110 = arith.constant 0 : index
    %c0_111 = arith.constant 0 : index
    %144 = vector.load %arg9[%c0_110, %c0_111] : memref<1x128xf32, #tpu.memory_space<vmem>>, vector<1x128xf32>
    %145 = vector.broadcast %144 : vector<1x128xf32> to vector<8x128xf32>
    %146 = arith.addf %143, %145 : vector<8x128xf32>
    %c0_112 = arith.constant 0 : index
    %c0_113 = arith.constant 0 : index
    %147 = vector.load %arg10[%c0_112, %c0_113] : memref<8x128xf32, #tpu.memory_space<vmem>>, vector<8x128xf32>
    tpu.vector_store %arg10[%c0_112, %c0_113], %146 {strides = array<i32>} : memref<8x128xf32, #tpu.memory_space<vmem>>, vector<8x128xf32>,
    return
  }
  func.func @transform_0(%arg0: i32) -> (i32, i32, i32) {
    %c0_i32 = arith.constant 0 : i32
    %c0_i32_0 = arith.constant 0 : i32
    %c0_i32_1 = arith.constant 0 : i32
    return %c0_i32, %arg0, %c0_i32_0 : i32, i32, i32
  }
  func.func @transform_1(%arg0: i32) -> (i32, i32) {
    %c0_i32 = arith.constant 0 : i32
    %c0_i32_0 = arith.constant 0 : i32
    %c0_i32_1 = arith.constant 0 : i32
    return %c0_i32, %c0_i32_0 : i32, i32
  }
  func.func @transform_2(%arg0: i32) -> (i32, i32) {
    %c0_i32 = arith.constant 0 : i32
    %c0_i32_0 = arith.constant 0 : i32
    %c0_i32_1 = arith.constant 0 : i32
    return %c0_i32, %c0_i32_0 : i32, i32
  }
  func.func @transform_3(%arg0: i32) -> (i32, i32) {
    %c0_i32 = arith.constant 0 : i32
    %c0_i32_0 = arith.constant 0 : i32
    %c0_i32_1 = arith.constant 0 : i32
    return %c0_i32, %c0_i32_0 : i32, i32
  }
  func.func @transform_4(%arg0: i32) -> (i32, i32) {
    %c0_i32 = arith.constant 0 : i32
    %c0_i32_0 = arith.constant 0 : i32
    %c0_i32_1 = arith.constant 0 : i32
    return %c0_i32, %c0_i32_0 : i32, i32
  }
  func.func @transform_5(%arg0: i32) -> (i32, i32) {
    %c0_i32 = arith.constant 0 : i32
    %c0_i32_0 = arith.constant 0 : i32
    %c0_i32_1 = arith.constant 0 : i32
    return %c0_i32, %c0_i32_0 : i32, i32
  }
  func.func @transform_6(%arg0: i32) -> (i32, i32) {
    %c0_i32 = arith.constant 0 : i32
    %c0_i32_0 = arith.constant 0 : i32
    %c0_i32_1 = arith.constant 0 : i32
    return %c0_i32, %c0_i32_0 : i32, i32
  }
  func.func @transform_7(%arg0: i32) -> (i32, i32) {
    %c0_i32 = arith.constant 0 : i32
    %c0_i32_0 = arith.constant 0 : i32
    %c0_i32_1 = arith.constant 0 : i32
    return %c0_i32, %c0_i32_0 : i32, i32
  }
  func.func @transform_8(%arg0: i32) -> (i32, i32) {
    %c0_i32 = arith.constant 0 : i32
    %c0_i32_0 = arith.constant 0 : i32
    %c0_i32_1 = arith.constant 0 : i32
    return %c0_i32, %c0_i32_0 : i32, i32
  }
  func.func @transform_9(%arg0: i32) -> (i32, i32) {
    %c0_i32 = arith.constant 0 : i32
    %c0_i32_0 = arith.constant 0 : i32
    return %arg0, %c0_i32 : i32, i32
  }
}

module attributes {stable_mosaic.version = 11 : i64} {
  func.func @_rnn_kernel(%arg0: i32, %arg1: memref<8x8x128xbf16, #tpu.memory_space<vmem>>, %arg2: memref<128x128xbf16, #tpu.memory_space<vmem>>, %arg3: memref<128x128xbf16, #tpu.memory_space<vmem>>, %arg4: memref<1x128xf32, #tpu.memory_space<vmem>>, %arg5: memref<128x128xbf16, #tpu.memory_space<vmem>>, %arg6: memref<128x128xbf16, #tpu.memory_space<vmem>>, %arg7: memref<1x128xf32, #tpu.memory_space<vmem>>, %arg8: memref<128x128xbf16, #tpu.memory_space<vmem>>, %arg9: memref<1x128xf32, #tpu.memory_space<vmem>>, %arg10: memref<8x128xf32, #tpu.memory_space<vmem>>, %arg11: memref<8x8x128xbf16, #tpu.memory_space<vmem>>, %arg12: memref<8x8x128xf32, #tpu.memory_space<vmem>>) attributes {dimension_semantics = [#tpu.dimension_semantics<parallel>], iteration_bounds = array<i64: 1>, scalar_prefetch = 0 : i64, scratch_operands = 2 : i64, tpu.core_type = #tpu.core_type<tc>, window_params = [{transform_indices = @transform_0, window_bounds = array<i64: 8, 8, 128>}, {pipeline_mode = #tpu.pipeline_mode<synchronous>, transform_indices = @transform_1, window_bounds = array<i64: 128, 128>}, {pipeline_mode = #tpu.pipeline_mode<synchronous>, transform_indices = @transform_2, window_bounds = array<i64: 128, 128>}, {pipeline_mode = #tpu.pipeline_mode<synchronous>, transform_indices = @transform_3, window_bounds = array<i64: 1, 128>}, {pipeline_mode = #tpu.pipeline_mode<synchronous>, transform_indices = @transform_4, window_bounds = array<i64: 128, 128>}, {pipeline_mode = #tpu.pipeline_mode<synchronous>, transform_indices = @transform_5, window_bounds = array<i64: 128, 128>}, {pipeline_mode = #tpu.pipeline_mode<synchronous>, transform_indices = @transform_6, window_bounds = array<i64: 1, 128>}, {pipeline_mode = #tpu.pipeline_mode<synchronous>, transform_indices = @transform_7, window_bounds = array<i64: 128, 128>}, {pipeline_mode = #tpu.pipeline_mode<synchronous>, transform_indices = @transform_8, window_bounds = array<i64: 1, 128>}, {transform_indices = @transform_9, window_bounds = array<i64: 8, 128>}]} {
    %c0 = arith.constant 0 : index
    %c0_0 = arith.constant 0 : index
    %0 = vector.load %arg2[%c0, %c0_0] : memref<128x128xbf16, #tpu.memory_space<vmem>>, vector<128x128xbf16>
    %c0_1 = arith.constant 0 : index
    %c0_2 = arith.constant 0 : index
    %1 = vector.load %arg3[%c0_1, %c0_2] : memref<128x128xbf16, #tpu.memory_space<vmem>>, vector<128x128xbf16>
    %c0_3 = arith.constant 0 : index
    %c0_4 = arith.constant 0 : index
    %2 = vector.load %arg4[%c0_3, %c0_4] : memref<1x128xf32, #tpu.memory_space<vmem>>, vector<1x128xf32>
    %cst = arith.constant 0.000000e+00 : bf16
    %3 = vector.broadcast %cst : bf16 to vector<8x128xbf16>
    %c0_5 = arith.constant 0 : index
    %c0_6 = arith.constant 0 : index
    %c0_7 = arith.constant 0 : index
    %4 = vector.load %arg1[%c0_5, %c0_6, %c0_7] : memref<8x8x128xbf16, #tpu.memory_space<vmem>>, vector<8x8x128xbf16>
    %5 = vector.shape_cast %4 : vector<8x8x128xbf16> to vector<64x128xbf16>
    %cst_8 = arith.constant dense<0.000000e+00> : vector<64x128xf32>
    %6 = tpu.matmul %5, %0, %cst_8 {dimension_numbers = #tpu.dot_dimension_numbers<[1], [0], [0], [1], [0, 0, 1, 1], [], []>} : vector<64x128xbf16>, vector<128x128xbf16>, vector<64x128xf32> -> vector<64x128xf32>
    %7 = vector.broadcast %2 : vector<1x128xf32> to vector<64x128xf32>
    %8 = arith.addf %6, %7 : vector<64x128xf32>
    %9 = vector.shape_cast %8 : vector<64x128xf32> to vector<8x8x128xf32>
    %c0_9 = arith.constant 0 : index
    %c0_10 = arith.constant 0 : index
    %c0_11 = arith.constant 0 : index
    %10 = vector.load %arg12[%c0_9, %c0_10, %c0_11] : memref<8x8x128xf32, #tpu.memory_space<vmem>>, vector<8x8x128xf32>
    tpu.vector_store %arg12[%c0_9, %c0_10, %c0_11], %9 {strides = array<i32>} : memref<8x8x128xf32, #tpu.memory_space<vmem>>, vector<8x8x128xf32>,
    %c0_12 = arith.constant 0 : index
    %c0_13 = arith.constant 0 : index
    %c0_14 = arith.constant 0 : index
    %11 = vector.load %arg12[%c0_12, %c0_13, %c0_14] : memref<8x8x128xf32, #tpu.memory_space<vmem>>, vector<1x8x128xf32>
    %12 = vector.shape_cast %11 : vector<1x8x128xf32> to vector<8x128xf32>
    %cst_15 = arith.constant dense<0.000000e+00> : vector<8x128xf32>
    %13 = tpu.matmul %3, %1, %cst_15 {dimension_numbers = #tpu.dot_dimension_numbers<[1], [0], [0], [1], [0, 0, 1, 1], [], []>} : vector<8x128xbf16>, vector<128x128xbf16>, vector<8x128xf32> -> vector<8x128xf32>
    %14 = arith.addf %12, %13 : vector<8x128xf32>
    %15 = math.tanh %14 : vector<8x128xf32>
    %16 = arith.truncf %15 : vector<8x128xf32> to vector<8x128xbf16>
    %c0_16 = arith.constant 0 : index
    %c0_17 = arith.constant 0 : index
    %c0_18 = arith.constant 0 : index
    %17 = vector.load %arg11[%c0_16, %c0_17, %c0_18] : memref<8x8x128xbf16, #tpu.memory_space<vmem>>, vector<1x8x128xbf16>
    %18 = vector.shape_cast %17 : vector<1x8x128xbf16> to vector<8x128xbf16>
    %19 = vector.shape_cast %16 : vector<8x128xbf16> to vector<1x8x128xbf16>
    tpu.vector_store %arg11[%c0_16, %c0_17, %c0_18], %19 {strides = array<i32>} : memref<8x8x128xbf16, #tpu.memory_space<vmem>>, vector<1x8x128xbf16>,
    %c1 = arith.constant 1 : index
    %c0_19 = arith.constant 0 : index
    %c0_20 = arith.constant 0 : index
    %20 = vector.load %arg12[%c1, %c0_19, %c0_20] : memref<8x8x128xf32, #tpu.memory_space<vmem>>, vector<1x8x128xf32>
    %21 = vector.shape_cast %20 : vector<1x8x128xf32> to vector<8x128xf32>
    %cst_21 = arith.constant dense<0.000000e+00> : vector<8x128xf32>
    %22 = tpu.matmul %16, %1, %cst_21 {dimension_numbers = #tpu.dot_dimension_numbers<[1], [0], [0], [1], [0, 0, 1, 1], [], []>} : vector<8x128xbf16>, vector<128x128xbf16>, vector<8x128xf32> -> vector<8x128xf32>
    %23 = arith.addf %21, %22 : vector<8x128xf32>
    %24 = math.tanh %23 : vector<8x128xf32>
    %25 = arith.truncf %24 : vector<8x128xf32> to vector<8x128xbf16>
    %c1_22 = arith.constant 1 : index
    %c0_23 = arith.constant 0 : index
    %c0_24 = arith.constant 0 : index
    %26 = vector.load %arg11[%c1_22, %c0_23, %c0_24] : memref<8x8x128xbf16, #tpu.memory_space<vmem>>, vector<1x8x128xbf16>
    %27 = vector.shape_cast %26 : vector<1x8x128xbf16> to vector<8x128xbf16>
    %28 = vector.shape_cast %25 : vector<8x128xbf16> to vector<1x8x128xbf16>
    tpu.vector_store %arg11[%c1_22, %c0_23, %c0_24], %28 {strides = array<i32>} : memref<8x8x128xbf16, #tpu.memory_space<vmem>>, vector<1x8x128xbf16>,
    %c2 = arith.constant 2 : index
    %c0_25 = arith.constant 0 : index
    %c0_26 = arith.constant 0 : index
    %29 = vector.load %arg12[%c2, %c0_25, %c0_26] : memref<8x8x128xf32, #tpu.memory_space<vmem>>, vector<1x8x128xf32>
    %30 = vector.shape_cast %29 : vector<1x8x128xf32> to vector<8x128xf32>
    %cst_27 = arith.constant dense<0.000000e+00> : vector<8x128xf32>
    %31 = tpu.matmul %25, %1, %cst_27 {dimension_numbers = #tpu.dot_dimension_numbers<[1], [0], [0], [1], [0, 0, 1, 1], [], []>} : vector<8x128xbf16>, vector<128x128xbf16>, vector<8x128xf32> -> vector<8x128xf32>
    %32 = arith.addf %30, %31 : vector<8x128xf32>
    %33 = math.tanh %32 : vector<8x128xf32>
    %34 = arith.truncf %33 : vector<8x128xf32> to vector<8x128xbf16>
    %c2_28 = arith.constant 2 : index
    %c0_29 = arith.constant 0 : index
    %c0_30 = arith.constant 0 : index
    %35 = vector.load %arg11[%c2_28, %c0_29, %c0_30] : memref<8x8x128xbf16, #tpu.memory_space<vmem>>, vector<1x8x128xbf16>
    %36 = vector.shape_cast %35 : vector<1x8x128xbf16> to vector<8x128xbf16>
    %37 = vector.shape_cast %34 : vector<8x128xbf16> to vector<1x8x128xbf16>
    tpu.vector_store %arg11[%c2_28, %c0_29, %c0_30], %37 {strides = array<i32>} : memref<8x8x128xbf16, #tpu.memory_space<vmem>>, vector<1x8x128xbf16>,
    %c3 = arith.constant 3 : index
    %c0_31 = arith.constant 0 : index
    %c0_32 = arith.constant 0 : index
    %38 = vector.load %arg12[%c3, %c0_31, %c0_32] : memref<8x8x128xf32, #tpu.memory_space<vmem>>, vector<1x8x128xf32>
    %39 = vector.shape_cast %38 : vector<1x8x128xf32> to vector<8x128xf32>
    %cst_33 = arith.constant dense<0.000000e+00> : vector<8x128xf32>
    %40 = tpu.matmul %34, %1, %cst_33 {dimension_numbers = #tpu.dot_dimension_numbers<[1], [0], [0], [1], [0, 0, 1, 1], [], []>} : vector<8x128xbf16>, vector<128x128xbf16>, vector<8x128xf32> -> vector<8x128xf32>
    %41 = arith.addf %39, %40 : vector<8x128xf32>
    %42 = math.tanh %41 : vector<8x128xf32>
    %43 = arith.truncf %42 : vector<8x128xf32> to vector<8x128xbf16>
    %c3_34 = arith.constant 3 : index
    %c0_35 = arith.constant 0 : index
    %c0_36 = arith.constant 0 : index
    %44 = vector.load %arg11[%c3_34, %c0_35, %c0_36] : memref<8x8x128xbf16, #tpu.memory_space<vmem>>, vector<1x8x128xbf16>
    %45 = vector.shape_cast %44 : vector<1x8x128xbf16> to vector<8x128xbf16>
    %46 = vector.shape_cast %43 : vector<8x128xbf16> to vector<1x8x128xbf16>
    tpu.vector_store %arg11[%c3_34, %c0_35, %c0_36], %46 {strides = array<i32>} : memref<8x8x128xbf16, #tpu.memory_space<vmem>>, vector<1x8x128xbf16>,
    %c4 = arith.constant 4 : index
    %c0_37 = arith.constant 0 : index
    %c0_38 = arith.constant 0 : index
    %47 = vector.load %arg12[%c4, %c0_37, %c0_38] : memref<8x8x128xf32, #tpu.memory_space<vmem>>, vector<1x8x128xf32>
    %48 = vector.shape_cast %47 : vector<1x8x128xf32> to vector<8x128xf32>
    %cst_39 = arith.constant dense<0.000000e+00> : vector<8x128xf32>
    %49 = tpu.matmul %43, %1, %cst_39 {dimension_numbers = #tpu.dot_dimension_numbers<[1], [0], [0], [1], [0, 0, 1, 1], [], []>} : vector<8x128xbf16>, vector<128x128xbf16>, vector<8x128xf32> -> vector<8x128xf32>
    %50 = arith.addf %48, %49 : vector<8x128xf32>
    %51 = math.tanh %50 : vector<8x128xf32>
    %52 = arith.truncf %51 : vector<8x128xf32> to vector<8x128xbf16>
    %c4_40 = arith.constant 4 : index
    %c0_41 = arith.constant 0 : index
    %c0_42 = arith.constant 0 : index
    %53 = vector.load %arg11[%c4_40, %c0_41, %c0_42] : memref<8x8x128xbf16, #tpu.memory_space<vmem>>, vector<1x8x128xbf16>
    %54 = vector.shape_cast %53 : vector<1x8x128xbf16> to vector<8x128xbf16>
    %55 = vector.shape_cast %52 : vector<8x128xbf16> to vector<1x8x128xbf16>
    tpu.vector_store %arg11[%c4_40, %c0_41, %c0_42], %55 {strides = array<i32>} : memref<8x8x128xbf16, #tpu.memory_space<vmem>>, vector<1x8x128xbf16>,
    %c5 = arith.constant 5 : index
    %c0_43 = arith.constant 0 : index
    %c0_44 = arith.constant 0 : index
    %56 = vector.load %arg12[%c5, %c0_43, %c0_44] : memref<8x8x128xf32, #tpu.memory_space<vmem>>, vector<1x8x128xf32>
    %57 = vector.shape_cast %56 : vector<1x8x128xf32> to vector<8x128xf32>
    %cst_45 = arith.constant dense<0.000000e+00> : vector<8x128xf32>
    %58 = tpu.matmul %52, %1, %cst_45 {dimension_numbers = #tpu.dot_dimension_numbers<[1], [0], [0], [1], [0, 0, 1, 1], [], []>} : vector<8x128xbf16>, vector<128x128xbf16>, vector<8x128xf32> -> vector<8x128xf32>
    %59 = arith.addf %57, %58 : vector<8x128xf32>
    %60 = math.tanh %59 : vector<8x128xf32>
    %61 = arith.truncf %60 : vector<8x128xf32> to vector<8x128xbf16>
    %c5_46 = arith.constant 5 : index
    %c0_47 = arith.constant 0 : index
    %c0_48 = arith.constant 0 : index
    %62 = vector.load %arg11[%c5_46, %c0_47, %c0_48] : memref<8x8x128xbf16, #tpu.memory_space<vmem>>, vector<1x8x128xbf16>
    %63 = vector.shape_cast %62 : vector<1x8x128xbf16> to vector<8x128xbf16>
    %64 = vector.shape_cast %61 : vector<8x128xbf16> to vector<1x8x128xbf16>
    tpu.vector_store %arg11[%c5_46, %c0_47, %c0_48], %64 {strides = array<i32>} : memref<8x8x128xbf16, #tpu.memory_space<vmem>>, vector<1x8x128xbf16>,
    %c6 = arith.constant 6 : index
    %c0_49 = arith.constant 0 : index
    %c0_50 = arith.constant 0 : index
    %65 = vector.load %arg12[%c6, %c0_49, %c0_50] : memref<8x8x128xf32, #tpu.memory_space<vmem>>, vector<1x8x128xf32>
    %66 = vector.shape_cast %65 : vector<1x8x128xf32> to vector<8x128xf32>
    %cst_51 = arith.constant dense<0.000000e+00> : vector<8x128xf32>
    %67 = tpu.matmul %61, %1, %cst_51 {dimension_numbers = #tpu.dot_dimension_numbers<[1], [0], [0], [1], [0, 0, 1, 1], [], []>} : vector<8x128xbf16>, vector<128x128xbf16>, vector<8x128xf32> -> vector<8x128xf32>
    %68 = arith.addf %66, %67 : vector<8x128xf32>
    %69 = math.tanh %68 : vector<8x128xf32>
    %70 = arith.truncf %69 : vector<8x128xf32> to vector<8x128xbf16>
    %c6_52 = arith.constant 6 : index
    %c0_53 = arith.constant 0 : index
    %c0_54 = arith.constant 0 : index
    %71 = vector.load %arg11[%c6_52, %c0_53, %c0_54] : memref<8x8x128xbf16, #tpu.memory_space<vmem>>, vector<1x8x128xbf16>
    %72 = vector.shape_cast %71 : vector<1x8x128xbf16> to vector<8x128xbf16>
    %73 = vector.shape_cast %70 : vector<8x128xbf16> to vector<1x8x128xbf16>
    tpu.vector_store %arg11[%c6_52, %c0_53, %c0_54], %73 {strides = array<i32>} : memref<8x8x128xbf16, #tpu.memory_space<vmem>>, vector<1x8x128xbf16>,
    %c7 = arith.constant 7 : index
    %c0_55 = arith.constant 0 : index
    %c0_56 = arith.constant 0 : index
    %74 = vector.load %arg12[%c7, %c0_55, %c0_56] : memref<8x8x128xf32, #tpu.memory_space<vmem>>, vector<1x8x128xf32>
    %75 = vector.shape_cast %74 : vector<1x8x128xf32> to vector<8x128xf32>
    %cst_57 = arith.constant dense<0.000000e+00> : vector<8x128xf32>
    %76 = tpu.matmul %70, %1, %cst_57 {dimension_numbers = #tpu.dot_dimension_numbers<[1], [0], [0], [1], [0, 0, 1, 1], [], []>} : vector<8x128xbf16>, vector<128x128xbf16>, vector<8x128xf32> -> vector<8x128xf32>
    %77 = arith.addf %75, %76 : vector<8x128xf32>
    %78 = math.tanh %77 : vector<8x128xf32>
    %79 = arith.truncf %78 : vector<8x128xf32> to vector<8x128xbf16>
    %c7_58 = arith.constant 7 : index
    %c0_59 = arith.constant 0 : index
    %c0_60 = arith.constant 0 : index
    %80 = vector.load %arg11[%c7_58, %c0_59, %c0_60] : memref<8x8x128xbf16, #tpu.memory_space<vmem>>, vector<1x8x128xbf16>
    %81 = vector.shape_cast %80 : vector<1x8x128xbf16> to vector<8x128xbf16>
    %82 = vector.shape_cast %79 : vector<8x128xbf16> to vector<1x8x128xbf16>
    tpu.vector_store %arg11[%c7_58, %c0_59, %c0_60], %82 {strides = array<i32>} : memref<8x8x128xbf16, #tpu.memory_space<vmem>>, vector<1x8x128xbf16>,
    %c0_61 = arith.constant 0 : index
    %c0_62 = arith.constant 0 : index
    %83 = vector.load %arg5[%c0_61, %c0_62] : memref<128x128xbf16, #tpu.memory_space<vmem>>, vector<128x128xbf16>
    %c0_63 = arith.constant 0 : index
    %c0_64 = arith.constant 0 : index
    %84 = vector.load %arg6[%c0_63, %c0_64] : memref<128x128xbf16, #tpu.memory_space<vmem>>, vector<128x128xbf16>
    %c0_65 = arith.constant 0 : index
    %c0_66 = arith.constant 0 : index
    %85 = vector.load %arg7[%c0_65, %c0_66] : memref<1x128xf32, #tpu.memory_space<vmem>>, vector<1x128xf32>
    %cst_67 = arith.constant 0.000000e+00 : bf16
    %86 = vector.broadcast %cst_67 : bf16 to vector<8x128xbf16>
    %c0_68 = arith.constant 0 : index
    %c0_69 = arith.constant 0 : index
    %c0_70 = arith.constant 0 : index
    %87 = vector.load %arg11[%c0_68, %c0_69, %c0_70] : memref<8x8x128xbf16, #tpu.memory_space<vmem>>, vector<8x8x128xbf16>
    %88 = vector.shape_cast %87 : vector<8x8x128xbf16> to vector<64x128xbf16>
    %cst_71 = arith.constant dense<0.000000e+00> : vector<64x128xf32>
    %89 = tpu.matmul %88, %83, %cst_71 {dimension_numbers = #tpu.dot_dimension_numbers<[1], [0], [0], [1], [0, 0, 1, 1], [], []>} : vector<64x128xbf16>, vector<128x128xbf16>, vector<64x128xf32> -> vector<64x128xf32>
    %90 = vector.broadcast %85 : vector<1x128xf32> to vector<64x128xf32>
    %91 = arith.addf %89, %90 : vector<64x128xf32>
    %92 = vector.shape_cast %91 : vector<64x128xf32> to vector<8x8x128xf32>
    %c0_72 = arith.constant 0 : index
    %c0_73 = arith.constant 0 : index
    %c0_74 = arith.constant 0 : index
    %93 = vector.load %arg12[%c0_72, %c0_73, %c0_74] : memref<8x8x128xf32, #tpu.memory_space<vmem>>, vector<8x8x128xf32>
    tpu.vector_store %arg12[%c0_72, %c0_73, %c0_74], %92 {strides = array<i32>} : memref<8x8x128xf32, #tpu.memory_space<vmem>>, vector<8x8x128xf32>,
    %c0_75 = arith.constant 0 : index
    %c0_76 = arith.constant 0 : index
    %c0_77 = arith.constant 0 : index
    %94 = vector.load %arg12[%c0_75, %c0_76, %c0_77] : memref<8x8x128xf32, #tpu.memory_space<vmem>>, vector<1x8x128xf32>
    %95 = vector.shape_cast %94 : vector<1x8x128xf32> to vector<8x128xf32>
    %cst_78 = arith.constant dense<0.000000e+00> : vector<8x128xf32>
    %96 = tpu.matmul %86, %84, %cst_78 {dimension_numbers = #tpu.dot_dimension_numbers<[1], [0], [0], [1], [0, 0, 1, 1], [], []>} : vector<8x128xbf16>, vector<128x128xbf16>, vector<8x128xf32> -> vector<8x128xf32>
    %97 = arith.addf %95, %96 : vector<8x128xf32>
    %98 = math.tanh %97 : vector<8x128xf32>
    %99 = arith.truncf %98 : vector<8x128xf32> to vector<8x128xbf16>
    %c1_79 = arith.constant 1 : index
    %c0_80 = arith.constant 0 : index
    %c0_81 = arith.constant 0 : index
    %100 = vector.load %arg12[%c1_79, %c0_80, %c0_81] : memref<8x8x128xf32, #tpu.memory_space<vmem>>, vector<1x8x128xf32>
    %101 = vector.shape_cast %100 : vector<1x8x128xf32> to vector<8x128xf32>
    %cst_82 = arith.constant dense<0.000000e+00> : vector<8x128xf32>
    %102 = tpu.matmul %99, %84, %cst_82 {dimension_numbers = #tpu.dot_dimension_numbers<[1], [0], [0], [1], [0, 0, 1, 1], [], []>} : vector<8x128xbf16>, vector<128x128xbf16>, vector<8x128xf32> -> vector<8x128xf32>
    %103 = arith.addf %101, %102 : vector<8x128xf32>
    %104 = math.tanh %103 : vector<8x128xf32>
    %105 = arith.truncf %104 : vector<8x128xf32> to vector<8x128xbf16>
    %c2_83 = arith.constant 2 : index
    %c0_84 = arith.constant 0 : index
    %c0_85 = arith.constant 0 : index
    %106 = vector.load %arg12[%c2_83, %c0_84, %c0_85] : memref<8x8x128xf32, #tpu.memory_space<vmem>>, vector<1x8x128xf32>
    %107 = vector.shape_cast %106 : vector<1x8x128xf32> to vector<8x128xf32>
    %cst_86 = arith.constant dense<0.000000e+00> : vector<8x128xf32>
    %108 = tpu.matmul %105, %84, %cst_86 {dimension_numbers = #tpu.dot_dimension_numbers<[1], [0], [0], [1], [0, 0, 1, 1], [], []>} : vector<8x128xbf16>, vector<128x128xbf16>, vector<8x128xf32> -> vector<8x128xf32>
    %109 = arith.addf %107, %108 : vector<8x128xf32>
    %110 = math.tanh %109 : vector<8x128xf32>
    %111 = arith.truncf %110 : vector<8x128xf32> to vector<8x128xbf16>
    %c3_87 = arith.constant 3 : index
    %c0_88 = arith.constant 0 : index
    %c0_89 = arith.constant 0 : index
    %112 = vector.load %arg12[%c3_87, %c0_88, %c0_89] : memref<8x8x128xf32, #tpu.memory_space<vmem>>, vector<1x8x128xf32>
    %113 = vector.shape_cast %112 : vector<1x8x128xf32> to vector<8x128xf32>
    %cst_90 = arith.constant dense<0.000000e+00> : vector<8x128xf32>
    %114 = tpu.matmul %111, %84, %cst_90 {dimension_numbers = #tpu.dot_dimension_numbers<[1], [0], [0], [1], [0, 0, 1, 1], [], []>} : vector<8x128xbf16>, vector<128x128xbf16>, vector<8x128xf32> -> vector<8x128xf32>
    %115 = arith.addf %113, %114 : vector<8x128xf32>
    %116 = math.tanh %115 : vector<8x128xf32>
    %117 = arith.truncf %116 : vector<8x128xf32> to vector<8x128xbf16>
    %c4_91 = arith.constant 4 : index
    %c0_92 = arith.constant 0 : index
    %c0_93 = arith.constant 0 : index
    %118 = vector.load %arg12[%c4_91, %c0_92, %c0_93] : memref<8x8x128xf32, #tpu.memory_space<vmem>>, vector<1x8x128xf32>
    %119 = vector.shape_cast %118 : vector<1x8x128xf32> to vector<8x128xf32>
    %cst_94 = arith.constant dense<0.000000e+00> : vector<8x128xf32>
    %120 = tpu.matmul %117, %84, %cst_94 {dimension_numbers = #tpu.dot_dimension_numbers<[1], [0], [0], [1], [0, 0, 1, 1], [], []>} : vector<8x128xbf16>, vector<128x128xbf16>, vector<8x128xf32> -> vector<8x128xf32>
    %121 = arith.addf %119, %120 : vector<8x128xf32>
    %122 = math.tanh %121 : vector<8x128xf32>
    %123 = arith.truncf %122 : vector<8x128xf32> to vector<8x128xbf16>
    %c5_95 = arith.constant 5 : index
    %c0_96 = arith.constant 0 : index
    %c0_97 = arith.constant 0 : index
    %124 = vector.load %arg12[%c5_95, %c0_96, %c0_97] : memref<8x8x128xf32, #tpu.memory_space<vmem>>, vector<1x8x128xf32>
    %125 = vector.shape_cast %124 : vector<1x8x128xf32> to vector<8x128xf32>
    %cst_98 = arith.constant dense<0.000000e+00> : vector<8x128xf32>
    %126 = tpu.matmul %123, %84, %cst_98 {dimension_numbers = #tpu.dot_dimension_numbers<[1], [0], [0], [1], [0, 0, 1, 1], [], []>} : vector<8x128xbf16>, vector<128x128xbf16>, vector<8x128xf32> -> vector<8x128xf32>
    %127 = arith.addf %125, %126 : vector<8x128xf32>
    %128 = math.tanh %127 : vector<8x128xf32>
    %129 = arith.truncf %128 : vector<8x128xf32> to vector<8x128xbf16>
    %c6_99 = arith.constant 6 : index
    %c0_100 = arith.constant 0 : index
    %c0_101 = arith.constant 0 : index
    %130 = vector.load %arg12[%c6_99, %c0_100, %c0_101] : memref<8x8x128xf32, #tpu.memory_space<vmem>>, vector<1x8x128xf32>
    %131 = vector.shape_cast %130 : vector<1x8x128xf32> to vector<8x128xf32>
    %cst_102 = arith.constant dense<0.000000e+00> : vector<8x128xf32>
    %132 = tpu.matmul %129, %84, %cst_102 {dimension_numbers = #tpu.dot_dimension_numbers<[1], [0], [0], [1], [0, 0, 1, 1], [], []>} : vector<8x128xbf16>, vector<128x128xbf16>, vector<8x128xf32> -> vector<8x128xf32>
    %133 = arith.addf %131, %132 : vector<8x128xf32>
    %134 = math.tanh %133 : vector<8x128xf32>
    %135 = arith.truncf %134 : vector<8x128xf32> to vector<8x128xbf16>
    %c7_103 = arith.constant 7 : index
    %c0_104 = arith.constant 0 : index
    %c0_105 = arith.constant 0 : index
    %136 = vector.load %arg12[%c7_103, %c0_104, %c0_105] : memref<8x8x128xf32, #tpu.memory_space<vmem>>, vector<1x8x128xf32>
    %137 = vector.shape_cast %136 : vector<1x8x128xf32> to vector<8x128xf32>
    %cst_106 = arith.constant dense<0.000000e+00> : vector<8x128xf32>
    %138 = tpu.matmul %135, %84, %cst_106 {dimension_numbers = #tpu.dot_dimension_numbers<[1], [0], [0], [1], [0, 0, 1, 1], [], []>} : vector<8x128xbf16>, vector<128x128xbf16>, vector<8x128xf32> -> vector<8x128xf32>
    %139 = arith.addf %137, %138 : vector<8x128xf32>
    %140 = math.tanh %139 : vector<8x128xf32>
    %141 = arith.truncf %140 : vector<8x128xf32> to vector<8x128xbf16>
    %c0_107 = arith.constant 0 : index
    %c0_108 = arith.constant 0 : index
    %142 = vector.load %arg8[%c0_107, %c0_108] : memref<128x128xbf16, #tpu.memory_space<vmem>>, vector<128x128xbf16>
    %cst_109 = arith.constant dense<0.000000e+00> : vector<8x128xf32>
    %143 = tpu.matmul %141, %142, %cst_109 {dimension_numbers = #tpu.dot_dimension_numbers<[1], [0], [0], [1], [0, 0, 1, 1], [], []>} : vector<8x128xbf16>, vector<128x128xbf16>, vector<8x128xf32> -> vector<8x128xf32>
    %c0_110 = arith.constant 0 : index
    %c0_111 = arith.constant 0 : index
    %144 = vector.load %arg9[%c0_110, %c0_111] : memref<1x128xf32, #tpu.memory_space<vmem>>, vector<1x128xf32>
    %145 = vector.broadcast %144 : vector<1x128xf32> to vector<8x128xf32>
    %146 = arith.addf %143, %145 : vector<8x128xf32>
    %c0_112 = arith.constant 0 : index
    %c0_113 = arith.constant 0 : index
    %147 = vector.load %arg10[%c0_112, %c0_113] : memref<8x128xf32, #tpu.memory_space<vmem>>, vector<8x128xf32>
    tpu.vector_store %arg10[%c0_112, %c0_113], %146 {strides = array<i32>} : memref<8x128xf32, #tpu.memory_space<vmem>>, vector<8x128xf32>,
    return
  }
  func.func @transform_0(%arg0: i32) -> (i32, i32, i32) {
    %c0_i32 = arith.constant 0 : i32
    %c0_i32_0 = arith.constant 0 : i32
    %c0_i32_1 = arith.constant 0 : i32
    return %c0_i32, %arg0, %c0_i32_0 : i32, i32, i32
  }
  func.func @transform_1(%arg0: i32) -> (i32, i32) {
    %c0_i32 = arith.constant 0 : i32
    %c0_i32_0 = arith.constant 0 : i32
    %c0_i32_1 = arith.constant 0 : i32
    return %c0_i32, %c0_i32_0 : i32, i32
  }
  func.func @transform_2(%arg0: i32) -> (i32, i32) {
    %c0_i32 = arith.constant 0 : i32
    %c0_i32_0 = arith.constant 0 : i32
    %c0_i32_1 = arith.constant 0 : i32
    return %c0_i32, %c0_i32_0 : i32, i32
  }
  func.func @transform_3(%arg0: i32) -> (i32, i32) {
    %c0_i32 = arith.constant 0 : i32
    %c0_i32_0 = arith.constant 0 : i32
    %c0_i32_1 = arith.constant 0 : i32
    return %c0_i32, %c0_i32_0 : i32, i32
  }
  func.func @transform_4(%arg0: i32) -> (i32, i32) {
    %c0_i32 = arith.constant 0 : i32
    %c0_i32_0 = arith.constant 0 : i32
    %c0_i32_1 = arith.constant 0 : i32
    return %c0_i32, %c0_i32_0 : i32, i32
  }
  func.func @transform_5(%arg0: i32) -> (i32, i32) {
    %c0_i32 = arith.constant 0 : i32
    %c0_i32_0 = arith.constant 0 : i32
    %c0_i32_1 = arith.constant 0 : i32
    return %c0_i32, %c0_i32_0 : i32, i32
  }
  func.func @transform_6(%arg0: i32) -> (i32, i32) {
    %c0_i32 = arith.constant 0 : i32
    %c0_i32_0 = arith.constant 0 : i32
    %c0_i32_1 = arith.constant 0 : i32
    return %c0_i32, %c0_i32_0 : i32, i32
  }
  func.func @transform_7(%arg0: i32) -> (i32, i32) {
    %c0_i32 = arith.constant 0 : i32
    %c0_i32_0 = arith.constant 0 : i32
    %c0_i32_1 = arith.constant 0 : i32
    return %c0_i32, %c0_i32_0 : i32, i32
  }
  func.func @transform_8(%arg0: i32) -> (i32, i32) {
    %c0_i32 = arith.constant 0 : i32
    %c0_i32_0 = arith.constant 0 : i32
    %c0_i32_1 = arith.constant 0 : i32
    return %c0_i32, %c0_i32_0 : i32, i32
  }
  func.func @transform_9(%arg0: i32) -> (i32, i32) {
    %c0_i32 = arith.constant 0 : i32
    %c0_i32_0 = arith.constant 0 : i32
    return %arg0, %c0_i32 : i32, i32
  }
}

</mosaic_0001>

<bundles_post_ra>
// kernel: tpu_custom_call.1
= control target key start
LH: loop header
LB: loop body
LE: loop exit
PB: predicated region body
PF: predicated region fallthrough
CT: control target
= control target key end

     0   :  { %14 = vsyncpa [#allocation5], 0  ;;  %s3046_s0 = inlined_call_operand.hbm [shape: bf16[8,8,128], index: 0, kind: input, shape index: {}]   ;;  %s3047_s1 = inlined_call_operand.hbm [shape: bf16[128,128], index: 1, kind: input, shape index: {}]   ;;  %s3048_s2 = inlined_call_operand.hbm [shape: bf16[128,128], index: 2, kind: input, shape index: {}]   ;;  %s3049_s3 = inlined_call_operand.hbm [shape: f32[1,128], index: 3, kind: input, shape index: {}]   ;;  %s3050_s4 = inlined_call_operand.hbm [shape: bf16[128,128], index: 4, kind: input, shape index: {}]   ;;  %s3051_s5 = inlined_call_operand.hbm [shape: bf16[128,128], index: 5, kind: input, shape index: {}]   ;;  %s3052_s6 = inlined_call_operand.hbm [shape: f32[1,128], index: 6, kind: input, shape index: {}]   ;;  %s3053_s7 = inlined_call_operand.hbm [shape: bf16[128,128], index: 7, kind: input, shape index: {}]   ;;  %s3054_s8 = inlined_call_operand.hbm [shape: f32[1,128], index: 8, kind: input, shape index: {}]   ;;  %s3055_s9 = inlined_call_operand.hbm [shape: f32[8,128], index: 9, kind: output, shape index: {}]  }
   0x1   :  { %15 = vsyncpa [#allocation8], 0 }
   0x2   :  { %16 = vsyncpa [#allocation11], 0 }
   0x3   :  { %17 = vsyncpa [#allocation14], 0 }
   0x4   :  { %18 = vsyncpa [#allocation17], 0 }
   0x5   :  { %19 = vsyncpa [#allocation6], 0  ;;  %s2430_s30 = smov [#allocation7]   ;;  %s2431_s11 = smov [#allocation10]  }
   0x6   :  { %s37_s10 = sshll.u32 %s2430_s30, 4  ;;  %s62_s12 = sshll.u32 %s2431_s11, 4  ;;  %s38_s10 = int_to_ptr.vmem [resolvable:$true] %s37_s10  ;;  %s2495_s12 = int_to_ptr.vmem [resolvable:$true] %s62_s12 }
   0x7   :  { %s2198_s15 = scalar_lea.hbm %s3047_s1, 1024 }
   0x8   :  { %p2199_p0 = scmp.ne.s32.totalorder %s3047_s1, %s2198_s15  ;;  %p2202_p1 = scmp.lt.u32.totalorder %s2198_s15, %s3047_s1 }
   0xa   :  { %p2204_p2 = pnand %p2202_p1, %p2199_p0 }
   0xc   :  { %2207 = shalt.err (!%p2204_p2)
}
   0xd   :  { %s2208_s20 = scalar_lea.vmem %s38_s10, 1024  ;;  %p2213_p4 = scmp.lt.s32.totalorder %s38_s10, %s38_s10 }
   0xe   :  { %p2209_p3 = scmp.ne.s32.totalorder %s38_s10, %s2208_s20  ;;  %p2214_p5 = scmp.lt.s32.totalorder %s2208_s20, %s2208_s20 }
  0x10   :  { %p2215_p6 = por %p2214_p5, %p2213_p4 }
  0x12   :  { %p2216_p7 = pnand %p2215_p6, %p2209_p3 }
  0x14   :  { %2219 = shalt.err (!%p2216_p7)
}
  0x15   :  { %s2432_s21 = smov 64   ;;  %s2433_s22 = smov 4  }
  0x16   :  { %43 = dma.hbm_to_vmem [thread:$0]  %s3047_s1, 1024, %s38_s10, [#allocation8], %s2432_s21, %s2432_s21, %s2433_s22  }
  0x17   :  { %s2220_s27 = scalar_lea.hbm %s3049_s3, 16 }
  0x18   :  { %p2221_p8 = scmp.ne.s32.totalorder %s3049_s3, %s2220_s27  ;;  %p2224_p9 = scmp.lt.u32.totalorder %s2220_s27, %s3049_s3 }
  0x1a   :  { %p2226_p10 = pnand %p2224_p9, %p2221_p8 }
  0x1c   :  { %2229 = shalt.err (!%p2226_p10)
}
  0x1d   :  { %s2230_s13 = scalar_lea.vmem %s2495_s12, 16  ;;  %s2234_s1 = scalar_lea.vmem %s2495_s12, 32 }
  0x1e   :  { %p2231_p11 = scmp.ne.s32.totalorder %s2495_s12, %s2230_s13  ;;  %p2235_p12 = scmp.lt.s32.totalorder %s2495_s12, %s2495_s12 }
  0x1f   :  { %p2236_p13 = scmp.lt.s32.totalorder %s2234_s1, %s2230_s13 }
  0x21   :  { %p2237_p0 = por %p2236_p13, %p2235_p12 }
  0x23   :  { %p2238_p1 = pnand %p2237_p0, %p2231_p11 }
  0x25   :  { %2241 = shalt.err (!%p2238_p1)
}
  0x26   :  { %65 = dma.hbm_to_vmem [thread:$0]  %s3049_s3, 16, %s2495_s12, [#allocation11]  }
  0x27   :  { %s2434_s15 = smov [#allocation13]   ;;  %s2435_s17 = smov [#allocation16]  }
  0x28   :  { %s83_s16 = sshll.u32 %s2434_s15, 4  ;;  %s105_s18 = sshll.u32 %s2435_s17, 4  ;;  %s84_s16 = int_to_ptr.vmem [resolvable:$true] %s83_s16  ;;  %s2530_s18 = int_to_ptr.vmem [resolvable:$true] %s105_s18 }
  0x29   :  { %s2242_s23 = scalar_lea.hbm %s3051_s5, 1024 }
  0x2a   :  { %p2243_p2 = scmp.ne.s32.totalorder %s3051_s5, %s2242_s23  ;;  %p2246_p3 = scmp.lt.u32.totalorder %s2242_s23, %s3051_s5 }
  0x2c   :  { %p2248_p4 = pnand %p2246_p3, %p2243_p2 }
  0x2e   :  { %2251 = shalt.err (!%p2248_p4)
}
  0x2f   :  { %s2252_s3 = scalar_lea.vmem %s84_s16, 1024  ;;  %p2257_p6 = scmp.lt.s32.totalorder %s84_s16, %s84_s16 }
  0x30   :  { %p2253_p5 = scmp.ne.s32.totalorder %s84_s16, %s2252_s3  ;;  %p2258_p7 = scmp.lt.s32.totalorder %s2252_s3, %s2252_s3 }
  0x32   :  { %p2259_p8 = por %p2258_p7, %p2257_p6 }
  0x34   :  { %p2260_p9 = pnand %p2259_p8, %p2253_p5 }
  0x36   :  { %2263 = shalt.err (!%p2260_p9)
}
  0x37   :  { %89 = dma.hbm_to_vmem [thread:$0]  %s3051_s5, 1024, %s84_s16, [#allocation14], %s2432_s21, %s2432_s21, %s2433_s22  }
  0x38   :  { %s2264_s11 = scalar_lea.hbm %s3053_s7, 1024 }
  0x39   :  { %p2265_p10 = scmp.ne.s32.totalorder %s3053_s7, %s2264_s11  ;;  %p2268_p11 = scmp.lt.u32.totalorder %s2264_s11, %s3053_s7 }
  0x3b   :  { %p2270_p12 = pnand %p2268_p11, %p2265_p10 }
  0x3d   :  { %2273 = shalt.err (!%p2270_p12)
}
  0x3e   :  { %s2274_s15 = scalar_lea.vmem %s2530_s18, 1024  ;;  %p2279_p0 = scmp.lt.s32.totalorder %s2530_s18, %s2530_s18 }
  0x3f   :  { %p2275_p13 = scmp.ne.s32.totalorder %s2530_s18, %s2274_s15  ;;  %p2280_p1 = scmp.lt.s32.totalorder %s2274_s15, %s2274_s15 }
  0x41   :  { %p2281_p2 = por %p2280_p1, %p2279_p0 }
  0x43   :  { %p2282_p3 = pnand %p2281_p2, %p2275_p13 }
  0x45   :  { %2285 = shalt.err (!%p2282_p3)
}
  0x46   :  { %111 = dma.hbm_to_vmem [thread:$0]  %s3053_s7, 1024, %s2530_s18, [#allocation17], %s2432_s21, %s2432_s21, %s2433_s22  }
  0x47   :  { %s2436_s17 = smov [#allocation4]   ;;  %s2437_s20 = smov [#allocation9]  }
  0x48   :  { %s25_s19 = sshll.u32 %s2436_s17, 4  ;;  %s49_s23 = sshll.u32 %s2437_s20, 4  ;;  %s26_s19 = int_to_ptr.vmem [resolvable:$true] %s25_s19  ;;  %s2567_s23 = int_to_ptr.vmem [resolvable:$true] %s49_s23 }
  0x49   :  { %s2286_s26 = scalar_lea.hbm %s3046_s0, 512 }
  0x4a   :  { %p2287_p4 = scmp.ne.s32.totalorder %s3046_s0, %s2286_s26  ;;  %p2290_p5 = scmp.lt.u32.totalorder %s2286_s26, %s3046_s0 }
  0x4c   :  { %p2292_p6 = pnand %p2290_p5, %p2287_p4 }
  0x4e   :  { %2295 = shalt.err (!%p2292_p6)
}
  0x4f   :  { %s2296_s7 = scalar_lea.vmem %s26_s19, 512  ;;  %p2301_p8 = scmp.lt.s32.totalorder %s26_s19, %s26_s19 }
  0x50   :  { %p2297_p7 = scmp.ne.s32.totalorder %s26_s19, %s2296_s7  ;;  %p2302_p9 = scmp.lt.s32.totalorder %s2296_s7, %s2296_s7 }
  0x52   :  { %p2303_p10 = por %p2302_p9, %p2301_p8 }
  0x54   :  { %p2304_p11 = pnand %p2303_p10, %p2297_p7 }
  0x56   :  { %2307 = shalt.err (!%p2304_p11)
}
  0x57   :  { %31 = dma.hbm_to_vmem [thread:$0]  %s3046_s0, 512, %s26_s19, [#allocation5], %s2432_s21, %s2432_s21, %s2433_s22  }
  0x58   :  { %s2308_s13 = scalar_lea.hbm %s3048_s2, 1024 }
  0x59   :  { %p2309_p12 = scmp.ne.s32.totalorder %s3048_s2, %s2308_s13  ;;  %p2312_p13 = scmp.lt.u32.totalorder %s2308_s13, %s3048_s2 }
  0x5b   :  { %p2314_p0 = pnand %p2312_p13, %p2309_p12 }
  0x5d   :  { %2317 = shalt.err (!%p2314_p0)
}
  0x5e   :  { %s2318_s5 = scalar_lea.vmem %s2567_s23, 1024  ;;  %p2323_p2 = scmp.lt.s32.totalorder %s2567_s23, %s2567_s23 }
  0x5f   :  { %p2319_p1 = scmp.ne.s32.totalorder %s2567_s23, %s2318_s5  ;;  %p2324_p3 = scmp.lt.s32.totalorder %s2318_s5, %s2318_s5 }
  0x61   :  { %p2325_p4 = por %p2324_p3, %p2323_p2 }
  0x63   :  { %p2326_p5 = pnand %p2325_p4, %p2319_p1 }
  0x65   :  { %2329 = shalt.err (!%p2326_p5)
}
  0x66   :  { %55 = dma.hbm_to_vmem [thread:$0]  %s3048_s2, 1024, %s2567_s23, [#allocation8], %s2432_s21, %s2432_s21, %s2433_s22  }
  0x67   :  { %s2438_s17 = smov [#allocation12]   ;;  %s2439_s20 = smov [#allocation15]  }
  0x68   :  { %s71_s19 = sshll.u32 %s2438_s17, 4  ;;  %s96_s24 = sshll.u32 %s2439_s20, 4  ;;  %s72_s19 = int_to_ptr.vmem [resolvable:$true] %s71_s19  ;;  %s97_s24 = int_to_ptr.vmem [resolvable:$true] %s96_s24 }
  0x69   :  { %s2330_s27 = scalar_lea.hbm %s3050_s4, 1024 }
  0x6a   :  { %p2331_p6 = scmp.ne.s32.totalorder %s3050_s4, %s2330_s27  ;;  %p2334_p7 = scmp.lt.u32.totalorder %s2330_s27, %s3050_s4 }
  0x6c   :  { %p2336_p8 = pnand %p2334_p7, %p2331_p6 }
  0x6e   :  { %2339 = shalt.err (!%p2336_p8)
}
  0x6f   :  { %s2340_s2 = scalar_lea.vmem %s72_s19, 1024  ;;  %p2345_p10 = scmp.lt.s32.totalorder %s72_s19, %s72_s19 }
  0x70   :  { %p2341_p9 = scmp.ne.s32.totalorder %s72_s19, %s2340_s2  ;;  %p2346_p11 = scmp.lt.s32.totalorder %s2340_s2, %s2340_s2 }
  0x72   :  { %p2347_p12 = por %p2346_p11, %p2345_p10 }
  0x74   :  { %p2348_p13 = pnand %p2347_p12, %p2341_p9 }
  0x76   :  { %2351 = shalt.err (!%p2348_p13)
}
  0x77   :  { %77 = dma.hbm_to_vmem [thread:$0]  %s3050_s4, 1024, %s72_s19, [#allocation11], %s2432_s21, %s2432_s21, %s2433_s22  }
  0x78   :  { %s2352_s11 = scalar_lea.hbm %s3052_s6, 16 }
  0x79   :  { %p2353_p0 = scmp.ne.s32.totalorder %s3052_s6, %s2352_s11  ;;  %p2356_p1 = scmp.lt.u32.totalorder %s2352_s11, %s3052_s6 }
  0x7b   :  { %p2358_p2 = pnand %p2356_p1, %p2353_p0 }
  0x7d   :  { %2361 = shalt.err (!%p2358_p2)
}
  0x7e   :  { %s2362_s15 = scalar_lea.vmem %s97_s24, 16  ;;  %s2366_s5 = scalar_lea.vmem %s97_s24, 32 }
  0x7f   :  { %p2363_p3 = scmp.ne.s32.totalorder %s97_s24, %s2362_s15  ;;  %p2367_p4 = scmp.lt.s32.totalorder %s97_s24, %s97_s24 }
  0x80   :  { %p2368_p5 = scmp.lt.s32.totalorder %s2366_s5, %s2362_s15 }
  0x82   :  { %p2369_p6 = por %p2368_p5, %p2367_p4 }
  0x84   :  { %p2370_p7 = pnand %p2369_p6, %p2363_p3 }
  0x86   :  { %2373 = shalt.err (!%p2370_p7)
}
  0x87   :  { %99 = dma.hbm_to_vmem [thread:$0]  %s3052_s6, 16, %s97_s24, [#allocation14]  }
  0x88   :  { %s2440_s22 = smov [#allocation18]   ;;  %s2374_s19 = scalar_lea.hbm %s3054_s8, 16 }
  0x89   :  { %s118_s0 = sshll.u32 %s2440_s22, 4  ;;  %p2375_p8 = scmp.ne.s32.totalorder %s3054_s8, %s2374_s19  ;;  %s119_s0 = int_to_ptr.vmem [resolvable:$true] %s118_s0 }
  0x8a   :  { %p2378_p9 = scmp.lt.u32.totalorder %s2374_s19, %s3054_s8 }
  0x8c   :  { %p2380_p10 = pnand %p2378_p9, %p2375_p8 }
  0x8e   :  { %2383 = shalt.err (!%p2380_p10)
}
  0x8f   :  { %s2384_s3 = scalar_lea.vmem %s119_s0, 16  ;;  %s2388_s6 = scalar_lea.vmem %s119_s0, 32 }
  0x90   :  { %p2385_p11 = scmp.ne.s32.totalorder %s119_s0, %s2384_s3  ;;  %p2389_p12 = scmp.lt.s32.totalorder %s119_s0, %s119_s0 }
  0x91   :  { %p2390_p13 = scmp.lt.s32.totalorder %s2388_s6, %s2384_s3 }
  0x93   :  { %p2391_p0 = por %p2390_p13, %p2389_p12 }
  0x95   :  { %p2392_p1 = pnand %p2391_p0, %p2385_p11 }
  0x97   :  { %2395 = shalt.err (!%p2392_p1)
}
  0x98   :  { %121 = dma.hbm_to_vmem [thread:$0]  %s3054_s8, 16, %s119_s0, [#allocation17]  }
  0x99   :  { %2418 = dma.done.wait [#allocation5], 512  }
  0x9a   :  { %2419 = vsyncadd [#allocation5], 4294966784 }
  0x9b   :  { %2420 = dma.done.wait [#allocation8], 2048  }
  0x9c   :  { %2421 = vsyncadd [#allocation8], 4294965248 }
  0x9d   :  { %2422 = dma.done.wait [#allocation11], 1040  }
  0x9e   :  { %2423 = vsyncadd [#allocation11], 4294966256 }
  0x9f   :  { %2424 = dma.done.wait [#allocation14], 1040  }
  0xa0   :  { %2425 = vsyncadd [#allocation14], 4294966256 }
  0xa1   :  { %2426 = dma.done.wait [#allocation17], 1040  }
  0xa2   :  { %2427 = vsyncadd [#allocation17], 4294966256  ;;  %v2441_v0 = vmov 0.0   ;;  %vm2442_vm0 = vmmov 0   ;;  %v2118_v1 = vld [vmem:[#allocation7] sm:$0xff]   ;;  %v2120_v3 = vld [vmem:[#allocation7 + $0x8] sm:$0xff]  }
  0xa3   :  { %1739 = vmatprep.subr.bf16.mxu1 %v2441_v0  ;;  %1755 = vmatprep.mubr.msk.bf16.mxu1 %vm2442_vm0, %v2441_v0  ;;  %v2646_v2 = vld [vmem:[#allocation9] sm:$0xff]   ;;  %v2649_v4 = vld [vmem:[#allocation9 + $0x8] sm:$0xff]   ;;  %v2122_v5 = vld [vmem:[#allocation7 + $0x10] sm:$0xff]   ;;  %v2443_v19 = vmov 0   ;;  %s2444_s8 = smov [#allocation19]  }
  0xa4   :  { %1715 = vmatprep.subr.bf16.mxu0 %v2118_v1  ;;  %1740 = vmatpush3.bf16.msra.mxu1 %v2646_v2  ;;  %v2653_v6 = vld [vmem:[#allocation9 + $0x10] sm:$0xff]   ;;  %v2124_v7 = vld [vmem:[#allocation7 + $0x18] sm:$0xff]   ;;  %v2126_v9 = vld [vmem:[#allocation7 + $0x20] sm:$0xff]   ;;  %s1474_s28 = sshll.u32 %s2444_s8, 4  ;;  %s1475_s28 = int_to_ptr.vmem [resolvable:$true] %s1474_s28 }
  0xa5   :  { %1716 = vmatpush3.bf16.msra.mxu0 %v2118_v1  ;;  %1741 = vmatprep.subr.bf16.mxu1 %v2441_v0  ;;  %v2657_v8 = vld [vmem:[#allocation9 + $0x18] sm:$0xff]   ;;  %v2660_v10 = vld [vmem:[#allocation9 + $0x20] sm:$0xff]   ;;  %v2128_v11 = vld [vmem:[#allocation7 + $0x28] sm:$0xff]   ;;  %s2396_s7 = scalar_lea.vmem %s1475_s28, 128  ;;  %p2401_p3 = scmp.lt.s32.totalorder %s1475_s28, %s1475_s28 }
  0xa6   :  { %1717 = vmatprep.subr.bf16.mxu0 %v2120_v3  ;;  %v2134_v12 = vld [vmem:[#allocation4] sm:$0xff]   ;;  %v2664_v13 = vld [vmem:[#allocation9 + $0x28] sm:$0xff]   ;;  %v2130_v14 = vld [vmem:[#allocation7 + $0x30] sm:$0xff]   ;;  %p2397_p2 = scmp.ne.s32.totalorder %s1475_s28, %s2396_s7  ;;  %p2402_p4 = scmp.lt.s32.totalorder %s2396_s7, %s2396_s7 }
  0xa7   :  { %1731 = vmatprep.mubr.bf16.mxu0 %v2134_v12  ;;  %v2668_v15 = vld [vmem:[#allocation9 + $0x30] sm:$0xff]   ;;  %v2132_v16 = vld [vmem:[#allocation7 + $0x38] sm:$0xff]   ;;  %v2135_v18 = vld [vmem:[#allocation4 + $0x8] sm:$0xff]  }
  0xa8   :  { %1742 = vmatpush3.bf16.msra.mxu1 %v2649_v4  ;;  %v2672_v17 = vld [vmem:[#allocation9 + $0x38] sm:$0xff]   ;;  %v2136_v20 = vld [vmem:[#allocation4 + $0x10] sm:$0xff]   ;;  %v2716_v22 = vld [vmem:[#allocation10] ss:$0 sm:$0xff]  ;;  %p2403_p5 = por %p2402_p4, %p2401_p3 }
  0xa9   :  { %1718 = vmatpush3.bf16.msra.mxu0 %v2120_v3  ;;  %1743 = vmatprep.subr.bf16.mxu1 %v2441_v0  ;;  %v2137_v21 = vld [vmem:[#allocation4 + $0x18] sm:$0xff]  }
  0xaa   :  { %1719 = vmatprep.subr.bf16.mxu0 %v2122_v5  ;;  %p2404_p6 = pnand %p2403_p5, %p2397_p2 }
  0xac   :  { %1744 = vmatpush3.bf16.msra.mxu1 %v2653_v6 }
  0xad   :  { %1720 = vmatpush3.bf16.msra.mxu0 %v2122_v5  ;;  %1745 = vmatprep.subr.bf16.mxu1 %v2441_v0 }
  0xae   :  { %1721 = vmatprep.subr.bf16.mxu0 %v2124_v7 }
  0xb0   :  { %1746 = vmatpush3.bf16.msra.mxu1 %v2657_v8 }
  0xb1   :  { %1722 = vmatpush3.bf16.msra.mxu0 %v2124_v7  ;;  %1747 = vmatprep.subr.bf16.mxu1 %v2441_v0 }
  0xb2   :  { %1723 = vmatprep.subr.bf16.mxu0 %v2126_v9 }
  0xb4   :  { %1748 = vmatpush3.bf16.msra.mxu1 %v2660_v10 }
  0xb5   :  { %1724 = vmatpush3.bf16.msra.mxu0 %v2126_v9  ;;  %1749 = vmatprep.subr.bf16.mxu1 %v2441_v0 }
  0xb6   :  { %1725 = vmatprep.subr.bf16.mxu0 %v2128_v11 }
  0xb8   :  { %1750 = vmatpush3.bf16.msra.mxu1 %v2664_v13 }
  0xb9   :  { %1726 = vmatpush3.bf16.msra.mxu0 %v2128_v11  ;;  %1751 = vmatprep.subr.bf16.mxu1 %v2441_v0 }
  0xba   :  { %1727 = vmatprep.subr.bf16.mxu0 %v2130_v14 }
  0xbc   :  { %1752 = vmatpush3.bf16.msra.mxu1 %v2668_v15 }
  0xbd   :  { %1728 = vmatpush3.bf16.msra.mxu0 %v2130_v14  ;;  %1753 = vmatprep.subr.bf16.mxu1 %v2441_v0 }
  0xbe   :  { %1729 = vmatprep.subr.bf16.mxu0 %v2132_v16 }
  0xc0   :  { %1754 = vmatpush3.bf16.msra.mxu1 %v2672_v17 }
  0xc1   :  { %1730 = vmatpush3.bf16.msra.mxu0 %v2132_v16  ;;  %1779 = vmatprep.subr.bf16.mxu1 %v2441_v0 }
  0xc2   :  { %1759 = vmatprep.subr.bf16.mxu0 %v2441_v0 }
  0xc3   :  { %1756 = vmatmul.mubr.bf16.vlgmr.msra.gmra.mrb[0].mxu1 %v2443_v19 }
  0xc4   :  { %1732 = vmatmul.mubr.bf16.vlgmr.msra.gmra.mrb[0].mxu0 %v2135_v18  ;;  %1780 = vmatpush3.bf16.msra.mxu1 %v2646_v2 }
  0xc5   :  { %1760 = vmatpush3.bf16.msra.mxu0 %v2646_v2  ;;  %1781 = vmatprep.subr.bf16.mxu1 %v2441_v0 }
  0xc6   :  { %1761 = vmatprep.subr.bf16.mxu0 %v2441_v0  ;;  %1795 = vmatprep.mubr.msk.bf16.mxu1 %vm2442_vm0, %v2441_v0 }
  0xc7   :  { %1735 = vmatprep.mubr.bf16.mxu0 %v2136_v20 }
  0xc8   :  { %1782 = vmatpush3.bf16.msra.mxu1 %v2649_v4 }
  0xc9   :  { %1762 = vmatpush3.bf16.msra.mxu0 %v2649_v4  ;;  %1783 = vmatprep.subr.bf16.mxu1 %v2441_v0 }
  0xca   :  { %1763 = vmatprep.subr.bf16.mxu0 %v2441_v0 }
  0xcc   :  { %1784 = vmatpush3.bf16.msra.mxu1 %v2653_v6  ;;  %1736 = vmatmul.mubr.bf16.gmra.mrb[4].mxu0 %v2137_v21  ;;  %v2142_v21 = vld [vmem:[#allocation12 + $0x18] sm:$0xff]  }
  0xcd   :  { %1764 = vmatpush3.bf16.msra.mxu0 %v2653_v6  ;;  %1785 = vmatprep.subr.bf16.mxu1 %v2441_v0 }
  0xce   :  { %1765 = vmatprep.subr.bf16.mxu0 %v2441_v0  ;;  %1775 = vmatprep.mubr.msk.bf16.mxu0 %vm2442_vm0, %v2441_v0 }
  0xd0   :  { %1786 = vmatpush3.bf16.msra.mxu1 %v2657_v8 }
  0xd1   :  { %1766 = vmatpush3.bf16.msra.mxu0 %v2657_v8  ;;  %1787 = vmatprep.subr.bf16.mxu1 %v2441_v0 }
  0xd2   :  { %1767 = vmatprep.subr.bf16.mxu0 %v2441_v0 }
  0xd4   :  { %1788 = vmatpush3.bf16.msra.mxu1 %v2660_v10 }
  0xd5   :  { %1768 = vmatpush3.bf16.msra.mxu0 %v2660_v10  ;;  %1789 = vmatprep.subr.bf16.mxu1 %v2441_v0 }
  0xd6   :  { %1769 = vmatprep.subr.bf16.mxu0 %v2441_v0 }
  0xd8   :  { %1790 = vmatpush3.bf16.msra.mxu1 %v2664_v13 }
  0xd9   :  { %1770 = vmatpush3.bf16.msra.mxu0 %v2664_v13  ;;  %1791 = vmatprep.subr.bf16.mxu1 %v2441_v0 }
  0xda   :  { %1771 = vmatprep.subr.bf16.mxu0 %v2441_v0 }
  0xdc   :  { %1792 = vmatpush3.bf16.msra.mxu1 %v2668_v15 }
  0xdd   :  { %1772 = vmatpush3.bf16.msra.mxu0 %v2668_v15  ;;  %1793 = vmatprep.subr.bf16.mxu1 %v2441_v0 }
  0xde   :  { %1773 = vmatprep.subr.bf16.mxu0 %v2441_v0 }
  0xe0   :  { %1794 = vmatpush3.bf16.msra.mxu1 %v2672_v17 }
  0xe1   :  { %1774 = vmatpush3.bf16.msra.mxu0 %v2672_v17  ;;  %1819 = vmatprep.subr.bf16.mxu1 %v2441_v0 }
  0xe2   :  { %1799 = vmatprep.subr.bf16.mxu0 %v2441_v0 }
 0x196   :  { %v425_v24 = vpop.f32.mrb[0].mxu1 }
 0x197   :  { %v2718_v23 = vpop.f32.mrb[0].mxu0  ;;  %v1757_v26 = vpop.f32.mrb[1].mxu1 }
 0x198   :  { %v303_v25 = vpop.f32.mrb[1].mxu0  ;;  %v428_v29 = vpop.f32.mrb[2].mxu1  ;;  %v312_v47 = vadd.f32 %v2718_v23, %v2716_v22  ;;  %v2143_v23 = vld [vmem:[#allocation12 + $0x20] sm:$0xff]   ;;  %v2146_v26 = vld [vmem:[#allocation12 + $0x38] sm:$0xff]  }
 0x199   :  { %v304_v27 = vadd.f32 %v2716_v22, %v303_v25  ;;  %v2721_v28 = vpop.f32.mrb[2].mxu0  ;;  %v1758_v31 = vpop.f32.mrb[3].mxu1  ;;  %v2145_v25 = vld [vmem:[#allocation12 + $0x30] sm:$0xff]   ;;  %v2830_v29 = vld [vmem:[#allocation13] sm:$0xff]  }
 0x19a   :  { %v306_v30 = vpop.f32.mrb[3].mxu0  ;;  %v315_v55 = vadd.f32 %v2721_v28, %v2716_v22  ;;  %v2838_v31 = vld [vmem:[#allocation13 + $0x10] sm:$0xff]  }
 0x19b   :  { %v431_v32 = vadd.f32 %v425_v24, %v304_v27  ;;  %v307_v39 = vadd.f32 %v2716_v22, %v306_v30  ;;  %v2144_v24 = vld [vmem:[#allocation12 + $0x28] sm:$0xff]  }
 0x19c   :  { %v2834_v30 = vld [vmem:[#allocation13 + $0x8] sm:$0xff]  }
 0x19d   :  { %2166 = vtanh.f32 %v431_v32  ;;  %v2842_v32 = vld [vmem:[#allocation13 + $0x18] sm:$0xff]  }
 0x19f   :  { %v2741_v35 = vpop.f32.mrb[4].mxu0 }
 0x1a0   :  { %v2743_v36 = vpop.f32.mrb[5].mxu0 }
 0x1a1   :  { %v2745_v37 = vpop.f32.mrb[6].mxu0  ;;  %v320_v63 = vadd.f32 %v2716_v22, %v2743_v36  ;;  %v2854_v36 = vld [vmem:[#allocation13 + $0x30] sm:$0xff]  }
 0x1a2   :  { %v2747_v38 = vpop.f32.mrb[7].mxu0 }
 0x1a7   :  { %v2167_v33 = vpop.eup %2166 }
 0x1a8   :  { %v433_v34 = vpack.c.bf16 %v2167_v33, %v2167_v33  ;;  %v2846_v33 = vld [vmem:[#allocation13 + $0x20] sm:$0xff]  }
 0x1aa   :  { %434 = vst [vmem:[#allocation2] sm:$0xf] %v433_v34  ;;  %1776 = vmatmul.mubr.bf16.vlgmr.msra.gmra.mrb[8].mxu0 %v433_v34  ;;  %v2850_v34 = vld [vmem:[#allocation13 + $0x28] sm:$0xff]  }
 0x1ab   :  { %1800 = vmatpush3.bf16.msra.mxu0 %v2646_v2  ;;  %1815 = vmatprep.mubr.msk.bf16.mxu0 %vm2442_vm0, %v2441_v0 }
 0x1ac   :  { %1801 = vmatprep.subr.bf16.mxu0 %v2441_v0 }
 0x1af   :  { %1802 = vmatpush3.bf16.msra.mxu0 %v2649_v4 }
 0x1b0   :  { %1803 = vmatprep.subr.bf16.mxu0 %v2441_v0 }
 0x1b3   :  { %1804 = vmatpush3.bf16.msra.mxu0 %v2653_v6 }
 0x1b4   :  { %1805 = vmatprep.subr.bf16.mxu0 %v2441_v0 }
 0x1b7   :  { %1806 = vmatpush3.bf16.msra.mxu0 %v2657_v8 }
 0x1b8   :  { %1807 = vmatprep.subr.bf16.mxu0 %v2441_v0 }
 0x1bb   :  { %1808 = vmatpush3.bf16.msra.mxu0 %v2660_v10 }
 0x1bc   :  { %1809 = vmatprep.subr.bf16.mxu0 %v2441_v0 }
 0x1bf   :  { %1810 = vmatpush3.bf16.msra.mxu0 %v2664_v13 }
 0x1c0   :  { %1811 = vmatprep.subr.bf16.mxu0 %v2441_v0 }
 0x1c3   :  { %1812 = vmatpush3.bf16.msra.mxu0 %v2668_v15 }
 0x1c4   :  { %1813 = vmatprep.subr.bf16.mxu0 %v2441_v0 }
 0x1c7   :  { %1814 = vmatpush3.bf16.msra.mxu0 %v2672_v17 }
 0x1c8   :  { %1839 = vmatprep.subr.bf16.mxu0 %v2441_v0 }
 0x27d   :  { %v471_v40 = vpop.f32.mrb[8].mxu0 }
 0x27e   :  { %v477_v41 = vadd.f32 %v471_v40, %v307_v39  ;;  %v1777_v42 = vpop.f32.mrb[9].mxu0  ;;  %v328_v39 = vadd.f32 %v2741_v35, %v2716_v22 }
 0x27f   :  { %v474_v43 = vpop.f32.mrb[10].mxu0 }
 0x280   :  { %2168 = vtanh.f32 %v477_v41  ;;  %v1778_v44 = vpop.f32.mrb[11].mxu0 }
 0x28a   :  { %v2169_v45 = vpop.eup %2168 }
 0x28b   :  { %v479_v46 = vpack.c.bf16 %v2169_v45, %v2169_v45 }
 0x28d   :  { %481 = vst [vmem:[#allocation2 + $0x4] sm:$0xf] %v479_v46  ;;  %1796 = vmatmul.mubr.bf16.vlgmr.msra.gmra.mrb[4].mxu1 %v479_v46 }
 0x28e   :  { %1820 = vmatpush3.bf16.msra.mxu1 %v2646_v2  ;;  %1835 = vmatprep.mubr.msk.bf16.mxu1 %vm2442_vm0, %v2441_v0 }
 0x28f   :  { %1821 = vmatprep.subr.bf16.mxu1 %v2441_v0 }
 0x292   :  { %1822 = vmatpush3.bf16.msra.mxu1 %v2649_v4 }
 0x293   :  { %1823 = vmatprep.subr.bf16.mxu1 %v2441_v0 }
 0x294   :  { %v2139_v20 = vld [vmem:[#allocation2] sm:$0xff]  }
 0x296   :  { %1824 = vmatpush3.bf16.msra.mxu1 %v2653_v6 }
 0x297   :  { %1825 = vmatprep.subr.bf16.mxu1 %v2441_v0 }
 0x29a   :  { %1826 = vmatpush3.bf16.msra.mxu1 %v2657_v8 }
 0x29b   :  { %1827 = vmatprep.subr.bf16.mxu1 %v2441_v0 }
 0x29e   :  { %1828 = vmatpush3.bf16.msra.mxu1 %v2660_v10 }
 0x29f   :  { %1829 = vmatprep.subr.bf16.mxu1 %v2441_v0 }
 0x2a2   :  { %1830 = vmatpush3.bf16.msra.mxu1 %v2664_v13 }
 0x2a3   :  { %1831 = vmatprep.subr.bf16.mxu1 %v2441_v0 }
 0x2a6   :  { %1832 = vmatpush3.bf16.msra.mxu1 %v2668_v15 }
 0x2a7   :  { %1833 = vmatprep.subr.bf16.mxu1 %v2441_v0 }
 0x2aa   :  { %1834 = vmatpush3.bf16.msra.mxu1 %v2672_v17 }
 0x2ab   :  { %1859 = vmatprep.subr.bf16.mxu1 %v2441_v0 }
 0x360   :  { %v518_v48 = vpop.f32.mrb[4].mxu1 }
 0x361   :  { %v524_v49 = vadd.f32 %v518_v48, %v312_v47  ;;  %v1797_v50 = vpop.f32.mrb[5].mxu1 }
 0x362   :  { %v521_v51 = vpop.f32.mrb[6].mxu1 }
 0x363   :  { %2170 = vtanh.f32 %v524_v49  ;;  %v1798_v52 = vpop.f32.mrb[7].mxu1 }
 0x36d   :  { %v2171_v53 = vpop.eup %2170 }
 0x36e   :  { %v526_v54 = vpack.c.bf16 %v2171_v53, %v2171_v53 }
 0x370   :  { %528 = vst [vmem:[#allocation2 + $0x8] sm:$0xf] %v526_v54  ;;  %1816 = vmatmul.mubr.bf16.vlgmr.msra.gmra.mrb[12].mxu0 %v526_v54 }
 0x371   :  { %1840 = vmatpush3.bf16.msra.mxu0 %v2646_v2  ;;  %1855 = vmatprep.mubr.msk.bf16.mxu0 %vm2442_vm0, %v2441_v0 }
 0x372   :  { %1841 = vmatprep.subr.bf16.mxu0 %v2441_v0 }
 0x375   :  { %1842 = vmatpush3.bf16.msra.mxu0 %v2649_v4 }
 0x376   :  { %1843 = vmatprep.subr.bf16.mxu0 %v2441_v0 }
 0x379   :  { %1844 = vmatpush3.bf16.msra.mxu0 %v2653_v6 }
 0x37a   :  { %1845 = vmatprep.subr.bf16.mxu0 %v2441_v0 }
 0x37d   :  { %1846 = vmatpush3.bf16.msra.mxu0 %v2657_v8 }
 0x37e   :  { %1847 = vmatprep.subr.bf16.mxu0 %v2441_v0 }
 0x381   :  { %1848 = vmatpush3.bf16.msra.mxu0 %v2660_v10 }
 0x382   :  { %1849 = vmatprep.subr.bf16.mxu0 %v2441_v0 }
 0x385   :  { %1850 = vmatpush3.bf16.msra.mxu0 %v2664_v13 }
 0x386   :  { %1851 = vmatprep.subr.bf16.mxu0 %v2441_v0 }
 0x389   :  { %1852 = vmatpush3.bf16.msra.mxu0 %v2668_v15 }
 0x38a   :  { %1853 = vmatprep.subr.bf16.mxu0 %v2441_v0 }
 0x38d   :  { %1854 = vmatpush3.bf16.msra.mxu0 %v2672_v17 }
 0x38e   :  { %1879 = vmatprep.subr.bf16.mxu0 %v2441_v0 }
 0x443   :  { %v565_v56 = vpop.f32.mrb[12].mxu0 }
 0x444   :  { %v571_v57 = vadd.f32 %v565_v56, %v315_v55  ;;  %v1817_v58 = vpop.f32.mrb[13].mxu0 }
 0x445   :  { %v568_v59 = vpop.f32.mrb[14].mxu0  ;;  %v2911_v58 = vld [vmem:[#allocation15] ss:$0 sm:$0xff] }
 0x446   :  { %2172 = vtanh.f32 %v571_v57  ;;  %v1818_v60 = vpop.f32.mrb[15].mxu0 }
 0x450   :  { %v2173_v61 = vpop.eup %2172 }
 0x451   :  { %v573_v62 = vpack.c.bf16 %v2173_v61, %v2173_v61 }
 0x453   :  { %575 = vst [vmem:[#allocation2 + $0xc] sm:$0xf] %v573_v62  ;;  %1836 = vmatmul.mubr.bf16.vlgmr.msra.gmra.mrb[8].mxu1 %v573_v62 }
 0x454   :  { %1860 = vmatpush3.bf16.msra.mxu1 %v2646_v2  ;;  %1875 = vmatprep.mubr.msk.bf16.mxu1 %vm2442_vm0, %v2441_v0 }
 0x455   :  { %1861 = vmatprep.subr.bf16.mxu1 %v2441_v0 }
 0x458   :  { %1862 = vmatpush3.bf16.msra.mxu1 %v2649_v4 }
 0x459   :  { %1863 = vmatprep.subr.bf16.mxu1 %v2441_v0 }
 0x45a   :  { %v2147_v27 = vld [vmem:[#allocation2 + $0x8] sm:$0xff]  }
 0x45c   :  { %1864 = vmatpush3.bf16.msra.mxu1 %v2653_v6 }
 0x45d   :  { %1865 = vmatprep.subr.bf16.mxu1 %v2441_v0 }
 0x460   :  { %1866 = vmatpush3.bf16.msra.mxu1 %v2657_v8 }
 0x461   :  { %1867 = vmatprep.subr.bf16.mxu1 %v2441_v0 }
 0x464   :  { %1868 = vmatpush3.bf16.msra.mxu1 %v2660_v10 }
 0x465   :  { %1869 = vmatprep.subr.bf16.mxu1 %v2441_v0 }
 0x468   :  { %1870 = vmatpush3.bf16.msra.mxu1 %v2664_v13 }
 0x469   :  { %1871 = vmatprep.subr.bf16.mxu1 %v2441_v0 }
 0x46c   :  { %1872 = vmatpush3.bf16.msra.mxu1 %v2668_v15 }
 0x46d   :  { %1873 = vmatprep.subr.bf16.mxu1 %v2441_v0 }
 0x470   :  { %1874 = vmatpush3.bf16.msra.mxu1 %v2672_v17 }
 0x526   :  { %v612_v1 = vpop.f32.mrb[8].mxu1 }
 0x527   :  { %v618_v3 = vadd.f32 %v612_v1, %v320_v63  ;;  %v1837_v5 = vpop.f32.mrb[9].mxu1 }
 0x528   :  { %v615_v7 = vpop.f32.mrb[10].mxu1 }
 0x529   :  { %2174 = vtanh.f32 %v618_v3  ;;  %v1838_v9 = vpop.f32.mrb[11].mxu1 }
 0x533   :  { %v2175_v11 = vpop.eup %2174 }
 0x534   :  { %v620_v12 = vpack.c.bf16 %v2175_v11, %v2175_v11 }
 0x536   :  { %622 = vst [vmem:[#allocation2 + $0x10] sm:$0xf] %v620_v12  ;;  %1856 = vmatmul.mubr.bf16.vlgmr.msra.gmra.mrb[16].mxu0 %v620_v12 }
 0x537   :  { %1880 = vmatpush3.bf16.msra.mxu0 %v2646_v2  ;;  %1895 = vmatprep.mubr.msk.bf16.mxu0 %vm2442_vm0, %v2441_v0  ;;  %v2138_v2 = vld [vmem:[#allocation12] sm:$0xff]  }
 0x538   :  { %1881 = vmatprep.subr.bf16.mxu0 %v2441_v0  ;;  %1899 = vmatprep.subr.bf16.mxu1 %v2138_v2 }
 0x53b   :  { %1882 = vmatpush3.bf16.msra.mxu0 %v2649_v4  ;;  %v323_v4 = vadd.f32 %v2716_v22, %v2747_v38  ;;  %v2858_v38 = vld [vmem:[#allocation13 + $0x38] sm:$0xff]  }
 0x53c   :  { %1883 = vmatprep.subr.bf16.mxu0 %v2441_v0 }
 0x53f   :  { %1884 = vmatpush3.bf16.msra.mxu0 %v2653_v6 }
 0x540   :  { %1885 = vmatprep.subr.bf16.mxu0 %v2441_v0 }
 0x543   :  { %1886 = vmatpush3.bf16.msra.mxu0 %v2657_v8 }
 0x544   :  { %1887 = vmatprep.subr.bf16.mxu0 %v2441_v0 }
 0x547   :  { %1888 = vmatpush3.bf16.msra.mxu0 %v2660_v10 }
 0x548   :  { %1889 = vmatprep.subr.bf16.mxu0 %v2441_v0 }
 0x54b   :  { %1890 = vmatpush3.bf16.msra.mxu0 %v2664_v13 }
 0x54c   :  { %1891 = vmatprep.subr.bf16.mxu0 %v2441_v0 }
 0x54f   :  { %1892 = vmatpush3.bf16.msra.mxu0 %v2668_v15  ;;  %v2140_v15 = vld [vmem:[#allocation12 + $0x8] sm:$0xff]  }
 0x550   :  { %1893 = vmatprep.subr.bf16.mxu0 %v2441_v0 }
 0x553   :  { %1894 = vmatpush3.bf16.msra.mxu0 %v2672_v17  ;;  %v2141_v17 = vld [vmem:[#allocation12 + $0x10] sm:$0xff]  }
 0x554   :  { %1923 = vmatprep.subr.bf16.mxu0 %v2441_v0 }
 0x609   :  { %v659_v6 = vpop.f32.mrb[16].mxu0 }
 0x60a   :  { %v665_v8 = vadd.f32 %v659_v6, %v323_v4  ;;  %v1857_v10 = vpop.f32.mrb[17].mxu0 }
 0x60b   :  { %v662_v14 = vpop.f32.mrb[18].mxu0 }
 0x60c   :  { %2176 = vtanh.f32 %v665_v8  ;;  %v1858_v13 = vpop.f32.mrb[19].mxu0 }
 0x616   :  { %v2177_v16 = vpop.eup %2176 }
 0x617   :  { %v667_v18 = vpack.c.bf16 %v2177_v16, %v2177_v16 }
 0x619   :  { %669 = vst [vmem:[#allocation2 + $0x14] sm:$0xf] %v667_v18  ;;  %1876 = vmatmul.mubr.bf16.vlgmr.msra.gmra.mrb[12].mxu1 %v667_v18 }
 0x61a   :  { %1900 = vmatpush3.bf16.msra.mxu1 %v2138_v2  ;;  %1915 = vmatprep.mubr.bf16.mxu1 %v2139_v20 }
 0x61b   :  { %1901 = vmatprep.subr.bf16.mxu1 %v2140_v15 }
 0x61e   :  { %1902 = vmatpush3.bf16.msra.mxu1 %v2140_v15 }
 0x61f   :  { %1903 = vmatprep.subr.bf16.mxu1 %v2141_v17 }
 0x620   :  { %v2148_v28 = vld [vmem:[#allocation2 + $0x10] sm:$0xff]  }
 0x622   :  { %1904 = vmatpush3.bf16.msra.mxu1 %v2141_v17 }
 0x623   :  { %1905 = vmatprep.subr.bf16.mxu1 %v2142_v21 }
 0x626   :  { %1906 = vmatpush3.bf16.msra.mxu1 %v2142_v21 }
 0x627   :  { %1907 = vmatprep.subr.bf16.mxu1 %v2143_v23 }
 0x62a   :  { %1908 = vmatpush3.bf16.msra.mxu1 %v2143_v23 }
 0x62b   :  { %1909 = vmatprep.subr.bf16.mxu1 %v2144_v24 }
 0x62e   :  { %1910 = vmatpush3.bf16.msra.mxu1 %v2144_v24 }
 0x62f   :  { %1911 = vmatprep.subr.bf16.mxu1 %v2145_v25 }
 0x632   :  { %1912 = vmatpush3.bf16.msra.mxu1 %v2145_v25 }
 0x633   :  { %1913 = vmatprep.subr.bf16.mxu1 %v2146_v26 }
 0x636   :  { %1914 = vmatpush3.bf16.msra.mxu1 %v2146_v26 }
 0x637   :  { %1943 = vmatprep.subr.bf16.mxu1 %v2441_v0 }
 0x639   :  { %1916 = vmatmul.mubr.bf16.vlgmr.msra.gmra.mrb[16].mxu1 %v2147_v27 }
 0x63a   :  { %1919 = vmatprep.mubr.bf16.mxu1 %v2148_v28  ;;  %1944 = vmatpush3.bf16.msra.mxu1 %v2830_v29 }
 0x63b   :  { %1945 = vmatprep.subr.bf16.mxu1 %v2441_v0 }
 0x63e   :  { %1946 = vmatpush3.bf16.msra.mxu1 %v2834_v30 }
 0x63f   :  { %1947 = vmatprep.subr.bf16.mxu1 %v2441_v0 }
 0x642   :  { %1948 = vmatpush3.bf16.msra.mxu1 %v2838_v31 }
 0x643   :  { %1949 = vmatprep.subr.bf16.mxu1 %v2441_v0 }
 0x646   :  { %1950 = vmatpush3.bf16.msra.mxu1 %v2842_v32 }
 0x647   :  { %1951 = vmatprep.subr.bf16.mxu1 %v2441_v0 }
 0x64a   :  { %1952 = vmatpush3.bf16.msra.mxu1 %v2846_v33 }
 0x64b   :  { %1953 = vmatprep.subr.bf16.mxu1 %v2441_v0 }
 0x64e   :  { %1954 = vmatpush3.bf16.msra.mxu1 %v2850_v34 }
 0x64f   :  { %1955 = vmatprep.subr.bf16.mxu1 %v2441_v0 }
 0x652   :  { %1956 = vmatpush3.bf16.msra.mxu1 %v2854_v36 }
 0x653   :  { %1957 = vmatprep.subr.bf16.mxu1 %v2441_v0 }
 0x656   :  { %1958 = vmatpush3.bf16.msra.mxu1 %v2858_v38 }
 0x657   :  { %1983 = vmatprep.subr.bf16.mxu1 %v2441_v0 }
 0x6ec   :  { %v706_v40 = vpop.f32.mrb[12].mxu1 }
 0x6ed   :  { %v712_v41 = vadd.f32 %v706_v40, %v328_v39  ;;  %v1877_v42 = vpop.f32.mrb[13].mxu1 }
 0x6ee   :  { %v709_v43 = vpop.f32.mrb[14].mxu1 }
 0x6ef   :  { %2178 = vtanh.f32 %v712_v41  ;;  %v1878_v44 = vpop.f32.mrb[15].mxu1 }
 0x6f9   :  { %v2179_v45 = vpop.eup %2178 }
 0x6fa   :  { %v714_v46 = vpack.c.bf16 %v2179_v45, %v2179_v45 }
 0x6fc   :  { %716 = vst [vmem:[#allocation2 + $0x18] sm:$0xf] %v714_v46  ;;  %1896 = vmatmul.mubr.bf16.vlgmr.msra.gmra.mrb[20].mxu0 %v714_v46 }
 0x6fd   :  { %1924 = vmatpush3.bf16.msra.mxu0 %v2830_v29  ;;  %1939 = vmatprep.mubr.msk.bf16.mxu0 %vm2442_vm0, %v2441_v0 }
 0x6fe   :  { %1925 = vmatprep.subr.bf16.mxu0 %v2441_v0 }
 0x701   :  { %1926 = vmatpush3.bf16.msra.mxu0 %v2834_v30 }
 0x702   :  { %1927 = vmatprep.subr.bf16.mxu0 %v2441_v0 }
 0x705   :  { %1928 = vmatpush3.bf16.msra.mxu0 %v2838_v31 }
 0x706   :  { %1929 = vmatprep.subr.bf16.mxu0 %v2441_v0 }
 0x709   :  { %1930 = vmatpush3.bf16.msra.mxu0 %v2842_v32 }
 0x70a   :  { %1931 = vmatprep.subr.bf16.mxu0 %v2441_v0 }
 0x70c   :  { %v2874_v35 = vpop.f32.mrb[16].mxu1 }
 0x70d   :  { %v917_v47 = vpop.f32.mrb[17].mxu1  ;;  %1932 = vmatpush3.bf16.msra.mxu0 %v2846_v33  ;;  %v926_v13 = vadd.f32 %v2874_v35, %v2911_v58 }
 0x70e   :  { %v2877_v48 = vpop.f32.mrb[18].mxu1  ;;  %1933 = vmatprep.subr.bf16.mxu0 %v2441_v0  ;;  %v918_v59 = vadd.f32 %v2911_v58, %v917_v47 }
 0x70f   :  { %v2880_v49 = vpop.f32.mrb[19].mxu1  ;;  %v929_v24 = vadd.f32 %v2877_v48, %v2911_v58 }
 0x710   :  { %v921_v11 = vadd.f32 %v2911_v58, %v2880_v49 }
 0x711   :  { %1934 = vmatpush3.bf16.msra.mxu0 %v2850_v34 }
 0x712   :  { %1935 = vmatprep.subr.bf16.mxu0 %v2441_v0 }
 0x715   :  { %1936 = vmatpush3.bf16.msra.mxu0 %v2854_v36 }
 0x716   :  { %1937 = vmatprep.subr.bf16.mxu0 %v2441_v0 }
 0x719   :  { %1938 = vmatpush3.bf16.msra.mxu0 %v2858_v38 }
 0x71a   :  { %1963 = vmatprep.subr.bf16.mxu0 %v2441_v0 }
 0x71c   :  { %1940 = vmatmul.mubr.bf16.vlgmr.msra.gmra.mrb[24].mxu0 %v2443_v19  ;;  %v331_v19 = vadd.f32 %v2745_v37, %v2716_v22 }
 0x71d   :  { %1964 = vmatpush3.bf16.msra.mxu0 %v2830_v29  ;;  %1979 = vmatprep.mubr.msk.bf16.mxu0 %vm2442_vm0, %v2441_v0 }
 0x71e   :  { %1965 = vmatprep.subr.bf16.mxu0 %v2441_v0 }
 0x721   :  { %1966 = vmatpush3.bf16.msra.mxu0 %v2834_v30 }
 0x722   :  { %1967 = vmatprep.subr.bf16.mxu0 %v2441_v0 }
 0x725   :  { %1968 = vmatpush3.bf16.msra.mxu0 %v2838_v31 }
 0x726   :  { %1969 = vmatprep.subr.bf16.mxu0 %v2441_v0 }
 0x729   :  { %1970 = vmatpush3.bf16.msra.mxu0 %v2842_v32 }
 0x72a   :  { %1971 = vmatprep.subr.bf16.mxu0 %v2441_v0 }
 0x72d   :  { %1972 = vmatpush3.bf16.msra.mxu0 %v2846_v33 }
 0x72e   :  { %1973 = vmatprep.subr.bf16.mxu0 %v2441_v0 }
 0x731   :  { %1974 = vmatpush3.bf16.msra.mxu0 %v2850_v34 }
 0x732   :  { %1975 = vmatprep.subr.bf16.mxu0 %v2441_v0 }
 0x735   :  { %1976 = vmatpush3.bf16.msra.mxu0 %v2854_v36 }
 0x736   :  { %1977 = vmatprep.subr.bf16.mxu0 %v2441_v0 }
 0x739   :  { %1978 = vmatpush3.bf16.msra.mxu0 %v2858_v38 }
 0x73a   :  { %2003 = vmatprep.subr.bf16.mxu0 %v2441_v0 }
 0x7cf   :  { %v753_v50 = vpop.f32.mrb[20].mxu0 }
 0x7d0   :  { %v759_v51 = vadd.f32 %v753_v50, %v331_v19  ;;  %v1897_v52 = vpop.f32.mrb[21].mxu0 }
 0x7d1   :  { %v756_v53 = vpop.f32.mrb[22].mxu0 }
 0x7d2   :  { %2180 = vtanh.f32 %v759_v51  ;;  %v1898_v54 = vpop.f32.mrb[23].mxu0  ;;  %v2161_v51 = vld [vmem:[#allocation16 + $0x18] sm:$0xff]  }
 0x7dc   :  { %v2181_v55 = vpop.eup %2180 }
 0x7dd   :  { %v761_v56 = vpack.c.bf16 %v2181_v55, %v2181_v55 }
 0x7df   :  { %763 = vst [vmem:[#allocation2 + $0x1c] sm:$0xf] %v761_v56 }
 0x7e6   :  { %v2157_v57 = vld [vmem:[#allocation2 + $0x18] sm:$0xff]  }
 0x7e7   :  { %1920 = vmatmul.mubr.bf16.gmra.mrb[20].mxu1 %v2157_v57 }
 0x7e8   :  { %1959 = vmatprep.mubr.msk.bf16.mxu1 %vm2442_vm0, %v2441_v0 }
 0x7ef   :  { %v1039_v60 = vpop.f32.mrb[24].mxu0 }
 0x7f0   :  { %v1045_v22 = vadd.f32 %v1039_v60, %v918_v59  ;;  %v1941_v37 = vpop.f32.mrb[25].mxu0 }
 0x7f1   :  { %v1042_v61 = vpop.f32.mrb[26].mxu0  ;;  %v2163_v37 = vld [vmem:[#allocation16 + $0x28] sm:$0xff]  }
 0x7f2   :  { %2182 = vtanh.f32 %v1045_v22  ;;  %v1942_v62 = vpop.f32.mrb[27].mxu0  ;;  %v2162_v22 = vld [vmem:[#allocation16 + $0x20] sm:$0xff]   ;;  %v2164_v61 = vld [vmem:[#allocation16 + $0x30] sm:$0xff]  }
 0x7f3   :  { %v2165_v62 = vld [vmem:[#allocation16 + $0x38] sm:$0xff]  }
 0x7fc   :  { %v2183_v63 = vpop.eup %2182 }
 0x7fd   :  { %v1047_v1 = vpack.c.bf16 %v2183_v63, %v2183_v63 }
 0x7ff   :  { %1960 = vmatmul.mubr.bf16.vlgmr.msra.gmra.mrb[24].mxu1 %v1047_v1 }
 0x800   :  { %1984 = vmatpush3.bf16.msra.mxu1 %v2830_v29  ;;  %1999 = vmatprep.mubr.msk.bf16.mxu1 %vm2442_vm0, %v2441_v0 }
 0x801   :  { %1985 = vmatprep.subr.bf16.mxu1 %v2441_v0 }
 0x804   :  { %1986 = vmatpush3.bf16.msra.mxu1 %v2834_v30 }
 0x805   :  { %1987 = vmatprep.subr.bf16.mxu1 %v2441_v0 }
 0x808   :  { %1988 = vmatpush3.bf16.msra.mxu1 %v2838_v31 }
 0x809   :  { %1989 = vmatprep.subr.bf16.mxu1 %v2441_v0 }
 0x80c   :  { %1990 = vmatpush3.bf16.msra.mxu1 %v2842_v32 }
 0x80d   :  { %1991 = vmatprep.subr.bf16.mxu1 %v2441_v0 }
 0x810   :  { %1992 = vmatpush3.bf16.msra.mxu1 %v2846_v33 }
 0x811   :  { %1993 = vmatprep.subr.bf16.mxu1 %v2441_v0 }
 0x814   :  { %1994 = vmatpush3.bf16.msra.mxu1 %v2850_v34 }
 0x815   :  { %1995 = vmatprep.subr.bf16.mxu1 %v2441_v0 }
 0x818   :  { %1996 = vmatpush3.bf16.msra.mxu1 %v2854_v36 }
 0x819   :  { %1997 = vmatprep.subr.bf16.mxu1 %v2441_v0 }
 0x81c   :  { %1998 = vmatpush3.bf16.msra.mxu1 %v2858_v38 }
 0x81d   :  { %2023 = vmatprep.subr.bf16.mxu1 %v2441_v0 }
 0x8ba   :  { %v2932_v3 = vpop.f32.mrb[20].mxu1 }
 0x8bb   :  { %v2934_v5 = vpop.f32.mrb[21].mxu1  ;;  %v942_v52 = vadd.f32 %v2932_v3, %v2911_v58 }
 0x8bc   :  { %v2936_v7 = vpop.f32.mrb[22].mxu1  ;;  %v934_v42 = vadd.f32 %v2911_v58, %v2934_v5 }
 0x8bd   :  { %v2938_v9 = vpop.f32.mrb[23].mxu1  ;;  %v945_v63 = vadd.f32 %v2936_v7, %v2911_v58 }
 0x8d2   :  { %v1083_v12 = vpop.f32.mrb[24].mxu1 }
 0x8d3   :  { %v1089_v2 = vadd.f32 %v1083_v12, %v921_v11  ;;  %v1961_v4 = vpop.f32.mrb[25].mxu1 }
 0x8d4   :  { %v1086_v6 = vpop.f32.mrb[26].mxu1  ;;  %v1529_v4 = vld [vmem:[#allocation18] ss:$0 sm:$0xff] }
 0x8d5   :  { %2184 = vtanh.f32 %v1089_v2  ;;  %v1962_v8 = vpop.f32.mrb[27].mxu1 }
 0x8df   :  { %v2185_v10 = vpop.eup %2184 }
 0x8e0   :  { %v1091_v14 = vpack.c.bf16 %v2185_v10, %v2185_v10 }
 0x8e2   :  { %1980 = vmatmul.mubr.bf16.vlgmr.msra.gmra.mrb[28].mxu0 %v1091_v14 }
 0x8e3   :  { %2004 = vmatpush3.bf16.msra.mxu0 %v2830_v29  ;;  %2019 = vmatprep.mubr.msk.bf16.mxu0 %vm2442_vm0, %v2441_v0 }
 0x8e4   :  { %2005 = vmatprep.subr.bf16.mxu0 %v2441_v0 }
 0x8e7   :  { %2006 = vmatpush3.bf16.msra.mxu0 %v2834_v30 }
 0x8e8   :  { %2007 = vmatprep.subr.bf16.mxu0 %v2441_v0 }
 0x8eb   :  { %2008 = vmatpush3.bf16.msra.mxu0 %v2838_v31 }
 0x8ec   :  { %2009 = vmatprep.subr.bf16.mxu0 %v2441_v0 }
 0x8ef   :  { %2010 = vmatpush3.bf16.msra.mxu0 %v2842_v32 }
 0x8f0   :  { %2011 = vmatprep.subr.bf16.mxu0 %v2441_v0 }
 0x8f3   :  { %2012 = vmatpush3.bf16.msra.mxu0 %v2846_v33 }
 0x8f4   :  { %2013 = vmatprep.subr.bf16.mxu0 %v2441_v0 }
 0x8f7   :  { %2014 = vmatpush3.bf16.msra.mxu0 %v2850_v34 }
 0x8f8   :  { %2015 = vmatprep.subr.bf16.mxu0 %v2441_v0 }
 0x8fb   :  { %2016 = vmatpush3.bf16.msra.mxu0 %v2854_v36 }
 0x8fc   :  { %2017 = vmatprep.subr.bf16.mxu0 %v2441_v0 }
 0x8ff   :  { %2018 = vmatpush3.bf16.msra.mxu0 %v2858_v38 }
 0x900   :  { %2043 = vmatprep.subr.bf16.mxu0 %v2441_v0 }
 0x9b5   :  { %v1127_v16 = vpop.f32.mrb[28].mxu0 }
 0x9b6   :  { %v1133_v18 = vadd.f32 %v1127_v16, %v926_v13  ;;  %v1981_v15 = vpop.f32.mrb[29].mxu0 }
 0x9b7   :  { %v1130_v20 = vpop.f32.mrb[30].mxu0 }
 0x9b8   :  { %2186 = vtanh.f32 %v1133_v18  ;;  %v1982_v17 = vpop.f32.mrb[31].mxu0 }
 0x9c2   :  { %v2187_v21 = vpop.eup %2186 }
 0x9c3   :  { %v1135_v23 = vpack.c.bf16 %v2187_v21, %v2187_v21 }
 0x9c5   :  { %2000 = vmatmul.mubr.bf16.vlgmr.msra.gmra.mrb[28].mxu1 %v1135_v23 }
 0x9c6   :  { %2024 = vmatpush3.bf16.msra.mxu1 %v2830_v29  ;;  %2039 = vmatprep.mubr.msk.bf16.mxu1 %vm2442_vm0, %v2441_v0 }
 0x9c7   :  { %2025 = vmatprep.subr.bf16.mxu1 %v2441_v0 }
 0x9ca   :  { %2026 = vmatpush3.bf16.msra.mxu1 %v2834_v30 }
 0x9cb   :  { %2027 = vmatprep.subr.bf16.mxu1 %v2441_v0 }
 0x9ce   :  { %2028 = vmatpush3.bf16.msra.mxu1 %v2838_v31 }
 0x9cf   :  { %2029 = vmatprep.subr.bf16.mxu1 %v2441_v0 }
 0x9d2   :  { %2030 = vmatpush3.bf16.msra.mxu1 %v2842_v32 }
 0x9d3   :  { %2031 = vmatprep.subr.bf16.mxu1 %v2441_v0 }
 0x9d6   :  { %2032 = vmatpush3.bf16.msra.mxu1 %v2846_v33 }
 0x9d7   :  { %2033 = vmatprep.subr.bf16.mxu1 %v2441_v0 }
 0x9da   :  { %2034 = vmatpush3.bf16.msra.mxu1 %v2850_v34 }
 0x9db   :  { %2035 = vmatprep.subr.bf16.mxu1 %v2441_v0 }
 0x9de   :  { %2036 = vmatpush3.bf16.msra.mxu1 %v2854_v36 }
 0x9df   :  { %2037 = vmatprep.subr.bf16.mxu1 %v2441_v0 }
 0x9e2   :  { %2038 = vmatpush3.bf16.msra.mxu1 %v2858_v38 }
 0x9e3   :  { %2063 = vmatprep.subr.bf16.mxu1 %v2441_v0 }
 0xa98   :  { %v1171_v25 = vpop.f32.mrb[28].mxu1 }
 0xa99   :  { %v1177_v26 = vadd.f32 %v1171_v25, %v929_v24  ;;  %v2001_v27 = vpop.f32.mrb[29].mxu1 }
 0xa9a   :  { %v1174_v28 = vpop.f32.mrb[30].mxu1 }
 0xa9b   :  { %2188 = vtanh.f32 %v1177_v26  ;;  %v2002_v39 = vpop.f32.mrb[31].mxu1 }
 0xaa5   :  { %v2189_v40 = vpop.eup %2188 }
 0xaa6   :  { %v1179_v41 = vpack.c.bf16 %v2189_v40, %v2189_v40 }
 0xaa8   :  { %2020 = vmatmul.mubr.bf16.vlgmr.msra.gmra.mrb[32].mxu0 %v1179_v41 }
 0xaa9   :  { %2044 = vmatpush3.bf16.msra.mxu0 %v2830_v29  ;;  %2059 = vmatprep.mubr.msk.bf16.mxu0 %vm2442_vm0, %v2441_v0 }
 0xaaa   :  { %2045 = vmatprep.subr.bf16.mxu0 %v2441_v0 }
 0xaad   :  { %2046 = vmatpush3.bf16.msra.mxu0 %v2834_v30 }
 0xaae   :  { %2047 = vmatprep.subr.bf16.mxu0 %v2441_v0 }
 0xab1   :  { %2048 = vmatpush3.bf16.msra.mxu0 %v2838_v31 }
 0xab2   :  { %2049 = vmatprep.subr.bf16.mxu0 %v2441_v0 }
 0xab5   :  { %2050 = vmatpush3.bf16.msra.mxu0 %v2842_v32 }
 0xab6   :  { %2051 = vmatprep.subr.bf16.mxu0 %v2441_v0 }
 0xab9   :  { %2052 = vmatpush3.bf16.msra.mxu0 %v2846_v33 }
 0xaba   :  { %2053 = vmatprep.subr.bf16.mxu0 %v2441_v0 }
 0xabd   :  { %2054 = vmatpush3.bf16.msra.mxu0 %v2850_v34 }
 0xabe   :  { %2055 = vmatprep.subr.bf16.mxu0 %v2441_v0 }
 0xac1   :  { %2056 = vmatpush3.bf16.msra.mxu0 %v2854_v36 }
 0xac2   :  { %2057 = vmatprep.subr.bf16.mxu0 %v2441_v0 }
 0xac5   :  { %2058 = vmatpush3.bf16.msra.mxu0 %v2858_v38 }
 0xac6   :  { %2083 = vmatprep.subr.bf16.mxu0 %v2441_v0 }
 0xb7b   :  { %v1215_v43 = vpop.f32.mrb[32].mxu0 }
 0xb7c   :  { %v1221_v44 = vadd.f32 %v1215_v43, %v934_v42  ;;  %v2021_v45 = vpop.f32.mrb[33].mxu0 }
 0xb7d   :  { %v1218_v46 = vpop.f32.mrb[34].mxu0 }
 0xb7e   :  { %2190 = vtanh.f32 %v1221_v44  ;;  %v2022_v35 = vpop.f32.mrb[35].mxu0 }
 0xb88   :  { %v2191_v47 = vpop.eup %2190 }
 0xb89   :  { %v1223_v48 = vpack.c.bf16 %v2191_v47, %v2191_v47 }
 0xb8b   :  { %2040 = vmatmul.mubr.bf16.vlgmr.msra.gmra.mrb[32].mxu1 %v1223_v48 }
 0xb8c   :  { %2064 = vmatpush3.bf16.msra.mxu1 %v2830_v29  ;;  %2079 = vmatprep.mubr.msk.bf16.mxu1 %vm2442_vm0, %v2441_v0  ;;  %v937_v29 = vadd.f32 %v2911_v58, %v2938_v9 }
 0xb8d   :  { %2065 = vmatprep.subr.bf16.mxu1 %v2441_v0 }
 0xb90   :  { %2066 = vmatpush3.bf16.msra.mxu1 %v2834_v30 }
 0xb91   :  { %2067 = vmatprep.subr.bf16.mxu1 %v2441_v0 }
 0xb94   :  { %2068 = vmatpush3.bf16.msra.mxu1 %v2838_v31 }
 0xb95   :  { %2069 = vmatprep.subr.bf16.mxu1 %v2441_v0 }
 0xb98   :  { %2070 = vmatpush3.bf16.msra.mxu1 %v2842_v32 }
 0xb99   :  { %2071 = vmatprep.subr.bf16.mxu1 %v2441_v0 }
 0xb9c   :  { %2072 = vmatpush3.bf16.msra.mxu1 %v2846_v33 }
 0xb9d   :  { %2073 = vmatprep.subr.bf16.mxu1 %v2441_v0 }
 0xba0   :  { %2074 = vmatpush3.bf16.msra.mxu1 %v2850_v34  ;;  %v2158_v34 = vld [vmem:[#allocation16] sm:$0xff]  }
 0xba1   :  { %2075 = vmatprep.subr.bf16.mxu1 %v2441_v0 }
 0xba4   :  { %2076 = vmatpush3.bf16.msra.mxu1 %v2854_v36  ;;  %v2159_v36 = vld [vmem:[#allocation16 + $0x8] sm:$0xff]  }
 0xba5   :  { %2077 = vmatprep.subr.bf16.mxu1 %v2441_v0 }
 0xba8   :  { %2078 = vmatpush3.bf16.msra.mxu1 %v2858_v38  ;;  %v2160_v38 = vld [vmem:[#allocation16 + $0x10] sm:$0xff]  }
 0xc5e   :  { %v1259_v30 = vpop.f32.mrb[32].mxu1 }
 0xc5f   :  { %v1265_v31 = vadd.f32 %v1259_v30, %v937_v29  ;;  %v2041_v32 = vpop.f32.mrb[33].mxu1 }
 0xc60   :  { %v1262_v49 = vpop.f32.mrb[34].mxu1 }
 0xc61   :  { %2192 = vtanh.f32 %v1265_v31  ;;  %v2042_v33 = vpop.f32.mrb[35].mxu1 }
 0xc6b   :  { %v2193_v19 = vpop.eup %2192 }
 0xc6c   :  { %v1267_v50 = vpack.c.bf16 %v2193_v19, %v2193_v19 }
 0xc6e   :  { %2060 = vmatmul.mubr.bf16.vlgmr.msra.gmra.mrb[36].mxu0 %v1267_v50 }
 0xc6f   :  { %2099 = vmatprep.mubr.msk.bf16.mxu0 %vm2442_vm0, %v2441_v0  ;;  %2084 = vmatpush3.bf16.msra.mxu0 %v2158_v34 }
 0xc70   :  { %2085 = vmatprep.subr.bf16.mxu0 %v2441_v0 }
 0xc73   :  { %2086 = vmatpush3.bf16.msra.mxu0 %v2159_v36 }
 0xc74   :  { %2087 = vmatprep.subr.bf16.mxu0 %v2441_v0 }
 0xc77   :  { %2088 = vmatpush3.bf16.msra.mxu0 %v2160_v38 }
 0xc78   :  { %2089 = vmatprep.subr.bf16.mxu0 %v2441_v0 }
 0xc7b   :  { %2090 = vmatpush3.bf16.msra.mxu0 %v2161_v51 }
 0xc7c   :  { %2091 = vmatprep.subr.bf16.mxu0 %v2441_v0 }
 0xc7f   :  { %2092 = vmatpush3.bf16.msra.mxu0 %v2162_v22 }
 0xc80   :  { %2093 = vmatprep.subr.bf16.mxu0 %v2441_v0 }
 0xc83   :  { %2094 = vmatpush3.bf16.msra.mxu0 %v2163_v37 }
 0xc84   :  { %2095 = vmatprep.subr.bf16.mxu0 %v2441_v0 }
 0xc87   :  { %2096 = vmatpush3.bf16.msra.mxu0 %v2164_v61 }
 0xc88   :  { %2097 = vmatprep.subr.bf16.mxu0 %v2441_v0 }
 0xc8b   :  { %2098 = vmatpush3.bf16.msra.mxu0 %v2165_v62 }
 0xd41   :  { %v1303_v53 = vpop.f32.mrb[36].mxu0 }
 0xd42   :  { %v1309_v54 = vadd.f32 %v1303_v53, %v942_v52  ;;  %v2061_v55 = vpop.f32.mrb[37].mxu0 }
 0xd43   :  { %v1306_v56 = vpop.f32.mrb[38].mxu0 }
 0xd44   :  { %2194 = vtanh.f32 %v1309_v54  ;;  %v2062_v57 = vpop.f32.mrb[39].mxu0 }
 0xd4e   :  { %v2195_v59 = vpop.eup %2194 }
 0xd4f   :  { %v1311_v60 = vpack.c.bf16 %v2195_v59, %v2195_v59 }
 0xd51   :  { %2080 = vmatmul.mubr.bf16.vlgmr.msra.gmra.mrb[36].mxu1 %v1311_v60 }
 0xe24   :  { %v1347_v1 = vpop.f32.mrb[36].mxu1 }
 0xe25   :  { %v1353_v3 = vadd.f32 %v1347_v1, %v945_v63  ;;  %v2081_v5 = vpop.f32.mrb[37].mxu1 }
 0xe26   :  { %v1350_v9 = vpop.f32.mrb[38].mxu1 }
 0xe27   :  { %2196 = vtanh.f32 %v1353_v3  ;;  %v2082_v11 = vpop.f32.mrb[39].mxu1 }
 0xe31   :  { %v2197_v12 = vpop.eup %2196 }
 0xe32   :  { %v1355_v2 = vpack.c.bf16 %v2197_v12, %v2197_v12 }
 0xe34   :  { %2100 = vmatmul.mubr.bf16.vlgmr.msra.gmra.mrb[40].mxu0 %v1355_v2 }
 0xf07   :  { %v1461_v6 = vpop.f32.mrb[40].mxu0 }
 0xf08   :  { %v1462_v8 = vadd.f32 %v1529_v4, %v1461_v6  ;;  %v2101_v0 = vpop.f32.mrb[41].mxu0 }
 0xf09   :  { %v1464_v10 = vpop.f32.mrb[42].mxu0 }
 0xf0a   :  { %1467 = vst [vmem:[#allocation19] sm:$0xff] %v1462_v8  ;;  %v2102_v14 = vpop.f32.mrb[43].mxu0 }
 0xf0b   :  { %2407 = shalt.err (!%p2404_p6)
}
 0xf0c   :  { %s2408_s18 = scalar_lea.hbm %s3055_s9, 128 }
 0xf0d   :  { %p2409_p7 = scmp.ne.s32.totalorder %s3055_s9, %s2408_s18  ;;  %p2412_p8 = scmp.lt.u32.totalorder %s2408_s18, %s3055_s9 }
 0xf0f   :  { %p2414_p9 = pnand %p2412_p8, %p2409_p7 }
 0xf11   :  { %2417 = shalt.err (!%p2414_p9)
}
 0xf12   :  { %1477 = dma.vmem_to_hbm [thread:$0]  %s1475_s28, 128, %s3055_s9, [#allocation6]  }
 0xf13   :  { %2428 = dma.done.wait [#allocation6], 128  }
 0xf14   :  { %2429 = vsyncadd [#allocation6], 4294967168 }
 0xf15   :  { %1481 = vsyncpa [#allocation5], 1 }
 0xf16   :  { %1482 = vsyncpa [#allocation8], 1 }
 0xf17   :  { %1483 = vsyncpa [#allocation11], 1 }
 0xf18   :  { %1484 = vsyncpa [#allocation14], 1 }
 0xf19   :  { %1485 = vsyncpa [#allocation17], 1 }
 0xf1a   :  { %1486 = vsyncpa [#allocation6], 1 }

// kernel: tpu_custom_call.1
= control target key start
LH: loop header
LB: loop body
LE: loop exit
PB: predicated region body
PF: predicated region fallthrough
CT: control target
= control target key end

     0   :  { %14 = vsyncpa [#allocation5], 0  ;;  %s3046_s0 = inlined_call_operand.hbm [shape: bf16[8,8,128], index: 0, kind: input, shape index: {}]   ;;  %s3047_s1 = inlined_call_operand.hbm [shape: bf16[128,128], index: 1, kind: input, shape index: {}]   ;;  %s3048_s2 = inlined_call_operand.hbm [shape: bf16[128,128], index: 2, kind: input, shape index: {}]   ;;  %s3049_s3 = inlined_call_operand.hbm [shape: f32[1,128], index: 3, kind: input, shape index: {}]   ;;  %s3050_s4 = inlined_call_operand.hbm [shape: bf16[128,128], index: 4, kind: input, shape index: {}]   ;;  %s3051_s5 = inlined_call_operand.hbm [shape: bf16[128,128], index: 5, kind: input, shape index: {}]   ;;  %s3052_s6 = inlined_call_operand.hbm [shape: f32[1,128], index: 6, kind: input, shape index: {}]   ;;  %s3053_s7 = inlined_call_operand.hbm [shape: bf16[128,128], index: 7, kind: input, shape index: {}]   ;;  %s3054_s8 = inlined_call_operand.hbm [shape: f32[1,128], index: 8, kind: input, shape index: {}]   ;;  %s3055_s9 = inlined_call_operand.hbm [shape: f32[8,128], index: 9, kind: output, shape index: {}]  }
   0x1   :  { %15 = vsyncpa [#allocation8], 0 }
   0x2   :  { %16 = vsyncpa [#allocation11], 0 }
   0x3   :  { %17 = vsyncpa [#allocation14], 0 }
   0x4   :  { %18 = vsyncpa [#allocation17], 0 }
   0x5   :  { %19 = vsyncpa [#allocation6], 0  ;;  %s2430_s30 = smov [#allocation7]   ;;  %s2431_s11 = smov [#allocation10]  }
   0x6   :  { %s37_s10 = sshll.u32 %s2430_s30, 4  ;;  %s62_s12 = sshll.u32 %s2431_s11, 4  ;;  %s38_s10 = int_to_ptr.vmem [resolvable:$true] %s37_s10  ;;  %s2495_s12 = int_to_ptr.vmem [resolvable:$true] %s62_s12 }
   0x7   :  { %s2198_s15 = scalar_lea.hbm %s3047_s1, 1024 }
   0x8   :  { %p2199_p0 = scmp.ne.s32.totalorder %s3047_s1, %s2198_s15  ;;  %p2202_p1 = scmp.lt.u32.totalorder %s2198_s15, %s3047_s1 }
   0xa   :  { %p2204_p2 = pnand %p2202_p1, %p2199_p0 }
   0xc   :  { %2207 = shalt.err (!%p2204_p2)
}
   0xd   :  { %s2208_s20 = scalar_lea.vmem %s38_s10, 1024  ;;  %p2213_p4 = scmp.lt.s32.totalorder %s38_s10, %s38_s10 }
   0xe   :  { %p2209_p3 = scmp.ne.s32.totalorder %s38_s10, %s2208_s20  ;;  %p2214_p5 = scmp.lt.s32.totalorder %s2208_s20, %s2208_s20 }
  0x10   :  { %p2215_p6 = por %p2214_p5, %p2213_p4 }
  0x12   :  { %p2216_p7 = pnand %p2215_p6, %p2209_p3 }
  0x14   :  { %2219 = shalt.err (!%p2216_p7)
}
  0x15   :  { %s2432_s21 = smov 64   ;;  %s2433_s22 = smov 4  }
  0x16   :  { %43 = dma.hbm_to_vmem [thread:$0]  %s3047_s1, 1024, %s38_s10, [#allocation8], %s2432_s21, %s2432_s21, %s2433_s22  }
  0x17   :  { %s2220_s27 = scalar_lea.hbm %s3049_s3, 16 }
  0x18   :  { %p2221_p8 = scmp.ne.s32.totalorder %s3049_s3, %s2220_s27  ;;  %p2224_p9 = scmp.lt.u32.totalorder %s2220_s27, %s3049_s3 }
  0x1a   :  { %p2226_p10 = pnand %p2224_p9, %p2221_p8 }
  0x1c   :  { %2229 = shalt.err (!%p2226_p10)
}
  0x1d   :  { %s2230_s13 = scalar_lea.vmem %s2495_s12, 16  ;;  %s2234_s1 = scalar_lea.vmem %s2495_s12, 32 }
  0x1e   :  { %p2231_p11 = scmp.ne.s32.totalorder %s2495_s12, %s2230_s13  ;;  %p2235_p12 = scmp.lt.s32.totalorder %s2495_s12, %s2495_s12 }
  0x1f   :  { %p2236_p13 = scmp.lt.s32.totalorder %s2234_s1, %s2230_s13 }
  0x21   :  { %p2237_p0 = por %p2236_p13, %p2235_p12 }
  0x23   :  { %p2238_p1 = pnand %p2237_p0, %p2231_p11 }
  0x25   :  { %2241 = shalt.err (!%p2238_p1)
}
  0x26   :  { %65 = dma.hbm_to_vmem [thread:$0]  %s3049_s3, 16, %s2495_s12, [#allocation11]  }
  0x27   :  { %s2434_s15 = smov [#allocation13]   ;;  %s2435_s17 = smov [#allocation16]  }
  0x28   :  { %s83_s16 = sshll.u32 %s2434_s15, 4  ;;  %s105_s18 = sshll.u32 %s2435_s17, 4  ;;  %s84_s16 = int_to_ptr.vmem [resolvable:$true] %s83_s16  ;;  %s2530_s18 = int_to_ptr.vmem [resolvable:$true] %s105_s18 }
  0x29   :  { %s2242_s23 = scalar_lea.hbm %s3051_s5, 1024 }
  0x2a   :  { %p2243_p2 = scmp.ne.s32.totalorder %s3051_s5, %s2242_s23  ;;  %p2246_p3 = scmp.lt.u32.totalorder %s2242_s23, %s3051_s5 }
  0x2c   :  { %p2248_p4 = pnand %p2246_p3, %p2243_p2 }
  0x2e   :  { %2251 = shalt.err (!%p2248_p4)
}
  0x2f   :  { %s2252_s3 = scalar_lea.vmem %s84_s16, 1024  ;;  %p2257_p6 = scmp.lt.s32.totalorder %s84_s16, %s84_s16 }
  0x30   :  { %p2253_p5 = scmp.ne.s32.totalorder %s84_s16, %s2252_s3  ;;  %p2258_p7 = scmp.lt.s32.totalorder %s2252_s3, %s2252_s3 }
  0x32   :  { %p2259_p8 = por %p2258_p7, %p2257_p6 }
  0x34   :  { %p2260_p9 = pnand %p2259_p8, %p2253_p5 }
  0x36   :  { %2263 = shalt.err (!%p2260_p9)
}
  0x37   :  { %89 = dma.hbm_to_vmem [thread:$0]  %s3051_s5, 1024, %s84_s16, [#allocation14], %s2432_s21, %s2432_s21, %s2433_s22  }
  0x38   :  { %s2264_s11 = scalar_lea.hbm %s3053_s7, 1024 }
  0x39   :  { %p2265_p10 = scmp.ne.s32.totalorder %s3053_s7, %s2264_s11  ;;  %p2268_p11 = scmp.lt.u32.totalorder %s2264_s11, %s3053_s7 }
  0x3b   :  { %p2270_p12 = pnand %p2268_p11, %p2265_p10 }
  0x3d   :  { %2273 = shalt.err (!%p2270_p12)
}
  0x3e   :  { %s2274_s15 = scalar_lea.vmem %s2530_s18, 1024  ;;  %p2279_p0 = scmp.lt.s32.totalorder %s2530_s18, %s2530_s18 }
  0x3f   :  { %p2275_p13 = scmp.ne.s32.totalorder %s2530_s18, %s2274_s15  ;;  %p2280_p1 = scmp.lt.s32.totalorder %s2274_s15, %s2274_s15 }
  0x41   :  { %p2281_p2 = por %p2280_p1, %p2279_p0 }
  0x43   :  { %p2282_p3 = pnand %p2281_p2, %p2275_p13 }
  0x45   :  { %2285 = shalt.err (!%p2282_p3)
}
  0x46   :  { %111 = dma.hbm_to_vmem [thread:$0]  %s3053_s7, 1024, %s2530_s18, [#allocation17], %s2432_s21, %s2432_s21, %s2433_s22  }
  0x47   :  { %s2436_s17 = smov [#allocation4]   ;;  %s2437_s20 = smov [#allocation9]  }
  0x48   :  { %s25_s19 = sshll.u32 %s2436_s17, 4  ;;  %s49_s23 = sshll.u32 %s2437_s20, 4  ;;  %s26_s19 = int_to_ptr.vmem [resolvable:$true] %s25_s19  ;;  %s2567_s23 = int_to_ptr.vmem [resolvable:$true] %s49_s23 }
  0x49   :  { %s2286_s26 = scalar_lea.hbm %s3046_s0, 512 }
  0x4a   :  { %p2287_p4 = scmp.ne.s32.totalorder %s3046_s0, %s2286_s26  ;;  %p2290_p5 = scmp.lt.u32.totalorder %s2286_s26, %s3046_s0 }
  0x4c   :  { %p2292_p6 = pnand %p2290_p5, %p2287_p4 }
  0x4e   :  { %2295 = shalt.err (!%p2292_p6)
}
  0x4f   :  { %s2296_s7 = scalar_lea.vmem %s26_s19, 512  ;;  %p2301_p8 = scmp.lt.s32.totalorder %s26_s19, %s26_s19 }
  0x50   :  { %p2297_p7 = scmp.ne.s32.totalorder %s26_s19, %s2296_s7  ;;  %p2302_p9 = scmp.lt.s32.totalorder %s2296_s7, %s2296_s7 }
  0x52   :  { %p2303_p10 = por %p2302_p9, %p2301_p8 }
  0x54   :  { %p2304_p11 = pnand %p2303_p10, %p2297_p7 }
  0x56   :  { %2307 = shalt.err (!%p2304_p11)
}
  0x57   :  { %31 = dma.hbm_to_vmem [thread:$0]  %s3046_s0, 512, %s26_s19, [#allocation5], %s2432_s21, %s2432_s21, %s2433_s22  }
  0x58   :  { %s2308_s13 = scalar_lea.hbm %s3048_s2, 1024 }
  0x59   :  { %p2309_p12 = scmp.ne.s32.totalorder %s3048_s2, %s2308_s13  ;;  %p2312_p13 = scmp.lt.u32.totalorder %s2308_s13, %s3048_s2 }
  0x5b   :  { %p2314_p0 = pnand %p2312_p13, %p2309_p12 }
  0x5d   :  { %2317 = shalt.err (!%p2314_p0)
}
  0x5e   :  { %s2318_s5 = scalar_lea.vmem %s2567_s23, 1024  ;;  %p2323_p2 = scmp.lt.s32.totalorder %s2567_s23, %s2567_s23 }
  0x5f   :  { %p2319_p1 = scmp.ne.s32.totalorder %s2567_s23, %s2318_s5  ;;  %p2324_p3 = scmp.lt.s32.totalorder %s2318_s5, %s2318_s5 }
  0x61   :  { %p2325_p4 = por %p2324_p3, %p2323_p2 }
  0x63   :  { %p2326_p5 = pnand %p2325_p4, %p2319_p1 }
  0x65   :  { %2329 = shalt.err (!%p2326_p5)
}
  0x66   :  { %55 = dma.hbm_to_vmem [thread:$0]  %s3048_s2, 1024, %s2567_s23, [#allocation8], %s2432_s21, %s2432_s21, %s2433_s22  }
  0x67   :  { %s2438_s17 = smov [#allocation12]   ;;  %s2439_s20 = smov [#allocation15]  }
  0x68   :  { %s71_s19 = sshll.u32 %s2438_s17, 4  ;;  %s96_s24 = sshll.u32 %s2439_s20, 4  ;;  %s72_s19 = int_to_ptr.vmem [resolvable:$true] %s71_s19  ;;  %s97_s24 = int_to_ptr.vmem [resolvable:$true] %s96_s24 }
  0x69   :  { %s2330_s27 = scalar_lea.hbm %s3050_s4, 1024 }
  0x6a   :  { %p2331_p6 = scmp.ne.s32.totalorder %s3050_s4, %s2330_s27  ;;  %p2334_p7 = scmp.lt.u32.totalorder %s2330_s27, %s3050_s4 }
  0x6c   :  { %p2336_p8 = pnand %p2334_p7, %p2331_p6 }
  0x6e   :  { %2339 = shalt.err (!%p2336_p8)
}
  0x6f   :  { %s2340_s2 = scalar_lea.vmem %s72_s19, 1024  ;;  %p2345_p10 = scmp.lt.s32.totalorder %s72_s19, %s72_s19 }
  0x70   :  { %p2341_p9 = scmp.ne.s32.totalorder %s72_s19, %s2340_s2  ;;  %p2346_p11 = scmp.lt.s32.totalorder %s2340_s2, %s2340_s2 }
  0x72   :  { %p2347_p12 = por %p2346_p11, %p2345_p10 }
  0x74   :  { %p2348_p13 = pnand %p2347_p12, %p2341_p9 }
  0x76   :  { %2351 = shalt.err (!%p2348_p13)
}
  0x77   :  { %77 = dma.hbm_to_vmem [thread:$0]  %s3050_s4, 1024, %s72_s19, [#allocation11], %s2432_s21, %s2432_s21, %s2433_s22  }
  0x78   :  { %s2352_s11 = scalar_lea.hbm %s3052_s6, 16 }
  0x79   :  { %p2353_p0 = scmp.ne.s32.totalorder %s3052_s6, %s2352_s11  ;;  %p2356_p1 = scmp.lt.u32.totalorder %s2352_s11, %s3052_s6 }
  0x7b   :  { %p2358_p2 = pnand %p2356_p1, %p2353_p0 }
  0x7d   :  { %2361 = shalt.err (!%p2358_p2)
}
  0x7e   :  { %s2362_s15 = scalar_lea.vmem %s97_s24, 16  ;;  %s2366_s5 = scalar_lea.vmem %s97_s24, 32 }
  0x7f   :  { %p2363_p3 = scmp.ne.s32.totalorder %s97_s24, %s2362_s15  ;;  %p2367_p4 = scmp.lt.s32.totalorder %s97_s24, %s97_s24 }
  0x80   :  { %p2368_p5 = scmp.lt.s32.totalorder %s2366_s5, %s2362_s15 }
  0x82   :  { %p2369_p6 = por %p2368_p5, %p2367_p4 }
  0x84   :  { %p2370_p7 = pnand %p2369_p6, %p2363_p3 }
  0x86   :  { %2373 = shalt.err (!%p2370_p7)
}
  0x87   :  { %99 = dma.hbm_to_vmem [thread:$0]  %s3052_s6, 16, %s97_s24, [#allocation14]  }
  0x88   :  { %s2440_s22 = smov [#allocation18]   ;;  %s2374_s19 = scalar_lea.hbm %s3054_s8, 16 }
  0x89   :  { %s118_s0 = sshll.u32 %s2440_s22, 4  ;;  %p2375_p8 = scmp.ne.s32.totalorder %s3054_s8, %s2374_s19  ;;  %s119_s0 = int_to_ptr.vmem [resolvable:$true] %s118_s0 }
  0x8a   :  { %p2378_p9 = scmp.lt.u32.totalorder %s2374_s19, %s3054_s8 }
  0x8c   :  { %p2380_p10 = pnand %p2378_p9, %p2375_p8 }
  0x8e   :  { %2383 = shalt.err (!%p2380_p10)
}
  0x8f   :  { %s2384_s3 = scalar_lea.vmem %s119_s0, 16  ;;  %s2388_s6 = scalar_lea.vmem %s119_s0, 32 }
  0x90   :  { %p2385_p11 = scmp.ne.s32.totalorder %s119_s0, %s2384_s3  ;;  %p2389_p12 = scmp.lt.s32.totalorder %s119_s0, %s119_s0 }
  0x91   :  { %p2390_p13 = scmp.lt.s32.totalorder %s2388_s6, %s2384_s3 }
  0x93   :  { %p2391_p0 = por %p2390_p13, %p2389_p12 }
  0x95   :  { %p2392_p1 = pnand %p2391_p0, %p2385_p11 }
  0x97   :  { %2395 = shalt.err (!%p2392_p1)
}
  0x98   :  { %121 = dma.hbm_to_vmem [thread:$0]  %s3054_s8, 16, %s119_s0, [#allocation17]  }
  0x99   :  { %2418 = dma.done.wait [#allocation5], 512  }
  0x9a   :  { %2419 = vsyncadd [#allocation5], 4294966784 }
  0x9b   :  { %2420 = dma.done.wait [#allocation8], 2048  }
  0x9c   :  { %2421 = vsyncadd [#allocation8], 4294965248 }
  0x9d   :  { %2422 = dma.done.wait [#allocation11], 1040  }
  0x9e   :  { %2423 = vsyncadd [#allocation11], 4294966256 }
  0x9f   :  { %2424 = dma.done.wait [#allocation14], 1040  }
  0xa0   :  { %2425 = vsyncadd [#allocation14], 4294966256 }
  0xa1   :  { %2426 = dma.done.wait [#allocation17], 1040  }
  0xa2   :  { %2427 = vsyncadd [#allocation17], 4294966256  ;;  %v2441_v0 = vmov 0.0   ;;  %vm2442_vm0 = vmmov 0   ;;  %v2118_v1 = vld [vmem:[#allocation7] sm:$0xff]   ;;  %v2120_v3 = vld [vmem:[#allocation7 + $0x8] sm:$0xff]  }
  0xa3   :  { %1739 = vmatprep.subr.bf16.mxu1 %v2441_v0  ;;  %1755 = vmatprep.mubr.msk.bf16.mxu1 %vm2442_vm0, %v2441_v0  ;;  %v2646_v2 = vld [vmem:[#allocation9] sm:$0xff]   ;;  %v2649_v4 = vld [vmem:[#allocation9 + $0x8] sm:$0xff]   ;;  %v2122_v5 = vld [vmem:[#allocation7 + $0x10] sm:$0xff]   ;;  %v2443_v19 = vmov 0   ;;  %s2444_s8 = smov [#allocation19]  }
  0xa4   :  { %1715 = vmatprep.subr.bf16.mxu0 %v2118_v1  ;;  %1740 = vmatpush3.bf16.msra.mxu1 %v2646_v2  ;;  %v2653_v6 = vld [vmem:[#allocation9 + $0x10] sm:$0xff]   ;;  %v2124_v7 = vld [vmem:[#allocation7 + $0x18] sm:$0xff]   ;;  %v2126_v9 = vld [vmem:[#allocation7 + $0x20] sm:$0xff]   ;;  %s1474_s28 = sshll.u32 %s2444_s8, 4  ;;  %s1475_s28 = int_to_ptr.vmem [resolvable:$true] %s1474_s28 }
  0xa5   :  { %1716 = vmatpush3.bf16.msra.mxu0 %v2118_v1  ;;  %1741 = vmatprep.subr.bf16.mxu1 %v2441_v0  ;;  %v2657_v8 = vld [vmem:[#allocation9 + $0x18] sm:$0xff]   ;;  %v2660_v10 = vld [vmem:[#allocation9 + $0x20] sm:$0xff]   ;;  %v2128_v11 = vld [vmem:[#allocation7 + $0x28] sm:$0xff]   ;;  %s2396_s7 = scalar_lea.vmem %s1475_s28, 128  ;;  %p2401_p3 = scmp.lt.s32.totalorder %s1475_s28, %s1475_s28 }
  0xa6   :  { %1717 = vmatprep.subr.bf16.mxu0 %v2120_v3  ;;  %v2134_v12 = vld [vmem:[#allocation4] sm:$0xff]   ;;  %v2664_v13 = vld [vmem:[#allocation9 + $0x28] sm:$0xff]   ;;  %v2130_v14 = vld [vmem:[#allocation7 + $0x30] sm:$0xff]   ;;  %p2397_p2 = scmp.ne.s32.totalorder %s1475_s28, %s2396_s7  ;;  %p2402_p4 = scmp.lt.s32.totalorder %s2396_s7, %s2396_s7 }
  0xa7   :  { %1731 = vmatprep.mubr.bf16.mxu0 %v2134_v12  ;;  %v2668_v15 = vld [vmem:[#allocation9 + $0x30] sm:$0xff]   ;;  %v2132_v16 = vld [vmem:[#allocation7 + $0x38] sm:$0xff]   ;;  %v2135_v18 = vld [vmem:[#allocation4 + $0x8] sm:$0xff]  }
  0xa8   :  { %1742 = vmatpush3.bf16.msra.mxu1 %v2649_v4  ;;  %v2672_v17 = vld [vmem:[#allocation9 + $0x38] sm:$0xff]   ;;  %v2136_v20 = vld [vmem:[#allocation4 + $0x10] sm:$0xff]   ;;  %v2716_v22 = vld [vmem:[#allocation10] ss:$0 sm:$0xff]  ;;  %p2403_p5 = por %p2402_p4, %p2401_p3 }
  0xa9   :  { %1718 = vmatpush3.bf16.msra.mxu0 %v2120_v3  ;;  %1743 = vmatprep.subr.bf16.mxu1 %v2441_v0  ;;  %v2137_v21 = vld [vmem:[#allocation4 + $0x18] sm:$0xff]  }
  0xaa   :  { %1719 = vmatprep.subr.bf16.mxu0 %v2122_v5  ;;  %p2404_p6 = pnand %p2403_p5, %p2397_p2 }
  0xac   :  { %1744 = vmatpush3.bf16.msra.mxu1 %v2653_v6 }
  0xad   :  { %1720 = vmatpush3.bf16.msra.mxu0 %v2122_v5  ;;  %1745 = vmatprep.subr.bf16.mxu1 %v2441_v0 }
  0xae   :  { %1721 = vmatprep.subr.bf16.mxu0 %v2124_v7 }
  0xb0   :  { %1746 = vmatpush3.bf16.msra.mxu1 %v2657_v8 }
  0xb1   :  { %1722 = vmatpush3.bf16.msra.mxu0 %v2124_v7  ;;  %1747 = vmatprep.subr.bf16.mxu1 %v2441_v0 }
  0xb2   :  { %1723 = vmatprep.subr.bf16.mxu0 %v2126_v9 }
  0xb4   :  { %1748 = vmatpush3.bf16.msra.mxu1 %v2660_v10 }
  0xb5   :  { %1724 = vmatpush3.bf16.msra.mxu0 %v2126_v9  ;;  %1749 = vmatprep.subr.bf16.mxu1 %v2441_v0 }
  0xb6   :  { %1725 = vmatprep.subr.bf16.mxu0 %v2128_v11 }
  0xb8   :  { %1750 = vmatpush3.bf16.msra.mxu1 %v2664_v13 }
  0xb9   :  { %1726 = vmatpush3.bf16.msra.mxu0 %v2128_v11  ;;  %1751 = vmatprep.subr.bf16.mxu1 %v2441_v0 }
  0xba   :  { %1727 = vmatprep.subr.bf16.mxu0 %v2130_v14 }
  0xbc   :  { %1752 = vmatpush3.bf16.msra.mxu1 %v2668_v15 }
  0xbd   :  { %1728 = vmatpush3.bf16.msra.mxu0 %v2130_v14  ;;  %1753 = vmatprep.subr.bf16.mxu1 %v2441_v0 }
  0xbe   :  { %1729 = vmatprep.subr.bf16.mxu0 %v2132_v16 }
  0xc0   :  { %1754 = vmatpush3.bf16.msra.mxu1 %v2672_v17 }
  0xc1   :  { %1730 = vmatpush3.bf16.msra.mxu0 %v2132_v16  ;;  %1779 = vmatprep.subr.bf16.mxu1 %v2441_v0 }
  0xc2   :  { %1759 = vmatprep.subr.bf16.mxu0 %v2441_v0 }
  0xc3   :  { %1756 = vmatmul.mubr.bf16.vlgmr.msra.gmra.mrb[0].mxu1 %v2443_v19 }
  0xc4   :  { %1732 = vmatmul.mubr.bf16.vlgmr.msra.gmra.mrb[0].mxu0 %v2135_v18  ;;  %1780 = vmatpush3.bf16.msra.mxu1 %v2646_v2 }
  0xc5   :  { %1760 = vmatpush3.bf16.msra.mxu0 %v2646_v2  ;;  %1781 = vmatprep.subr.bf16.mxu1 %v2441_v0 }
  0xc6   :  { %1761 = vmatprep.subr.bf16.mxu0 %v2441_v0  ;;  %1795 = vmatprep.mubr.msk.bf16.mxu1 %vm2442_vm0, %v2441_v0 }
  0xc7   :  { %1735 = vmatprep.mubr.bf16.mxu0 %v2136_v20 }
  0xc8   :  { %1782 = vmatpush3.bf16.msra.mxu1 %v2649_v4 }
  0xc9   :  { %1762 = vmatpush3.bf16.msra.mxu0 %v2649_v4  ;;  %1783 = vmatprep.subr.bf16.mxu1 %v2441_v0 }
  0xca   :  { %1763 = vmatprep.subr.bf16.mxu0 %v2441_v0 }
  0xcc   :  { %1784 = vmatpush3.bf16.msra.mxu1 %v2653_v6  ;;  %1736 = vmatmul.mubr.bf16.gmra.mrb[4].mxu0 %v2137_v21  ;;  %v2142_v21 = vld [vmem:[#allocation12 + $0x18] sm:$0xff]  }
  0xcd   :  { %1764 = vmatpush3.bf16.msra.mxu0 %v2653_v6  ;;  %1785 = vmatprep.subr.bf16.mxu1 %v2441_v0 }
  0xce   :  { %1765 = vmatprep.subr.bf16.mxu0 %v2441_v0  ;;  %1775 = vmatprep.mubr.msk.bf16.mxu0 %vm2442_vm0, %v2441_v0 }
  0xd0   :  { %1786 = vmatpush3.bf16.msra.mxu1 %v2657_v8 }
  0xd1   :  { %1766 = vmatpush3.bf16.msra.mxu0 %v2657_v8  ;;  %1787 = vmatprep.subr.bf16.mxu1 %v2441_v0 }
  0xd2   :  { %1767 = vmatprep.subr.bf16.mxu0 %v2441_v0 }
  0xd4   :  { %1788 = vmatpush3.bf16.msra.mxu1 %v2660_v10 }
  0xd5   :  { %1768 = vmatpush3.bf16.msra.mxu0 %v2660_v10  ;;  %1789 = vmatprep.subr.bf16.mxu1 %v2441_v0 }
  0xd6   :  { %1769 = vmatprep.subr.bf16.mxu0 %v2441_v0 }
  0xd8   :  { %1790 = vmatpush3.bf16.msra.mxu1 %v2664_v13 }
  0xd9   :  { %1770 = vmatpush3.bf16.msra.mxu0 %v2664_v13  ;;  %1791 = vmatprep.subr.bf16.mxu1 %v2441_v0 }
  0xda   :  { %1771 = vmatprep.subr.bf16.mxu0 %v2441_v0 }
  0xdc   :  { %1792 = vmatpush3.bf16.msra.mxu1 %v2668_v15 }
  0xdd   :  { %1772 = vmatpush3.bf16.msra.mxu0 %v2668_v15  ;;  %1793 = vmatprep.subr.bf16.mxu1 %v2441_v0 }
  0xde   :  { %1773 = vmatprep.subr.bf16.mxu0 %v2441_v0 }
  0xe0   :  { %1794 = vmatpush3.bf16.msra.mxu1 %v2672_v17 }
  0xe1   :  { %1774 = vmatpush3.bf16.msra.mxu0 %v2672_v17  ;;  %1819 = vmatprep.subr.bf16.mxu1 %v2441_v0 }
  0xe2   :  { %1799 = vmatprep.subr.bf16.mxu0 %v2441_v0 }
 0x196   :  { %v425_v24 = vpop.f32.mrb[0].mxu1 }
 0x197   :  { %v2718_v23 = vpop.f32.mrb[0].mxu0  ;;  %v1757_v26 = vpop.f32.mrb[1].mxu1 }
 0x198   :  { %v303_v25 = vpop.f32.mrb[1].mxu0  ;;  %v428_v29 = vpop.f32.mrb[2].mxu1  ;;  %v312_v47 = vadd.f32 %v2718_v23, %v2716_v22  ;;  %v2143_v23 = vld [vmem:[#allocation12 + $0x20] sm:$0xff]   ;;  %v2146_v26 = vld [vmem:[#allocation12 + $0x38] sm:$0xff]  }
 0x199   :  { %v304_v27 = vadd.f32 %v2716_v22, %v303_v25  ;;  %v2721_v28 = vpop.f32.mrb[2].mxu0  ;;  %v1758_v31 = vpop.f32.mrb[3].mxu1  ;;  %v2145_v25 = vld [vmem:[#allocation12 + $0x30] sm:$0xff]   ;;  %v2830_v29 = vld [vmem:[#allocation13] sm:$0xff]  }
 0x19a   :  { %v306_v30 = vpop.f32.mrb[3].mxu0  ;;  %v315_v55 = vadd.f32 %v2721_v28, %v2716_v22  ;;  %v2838_v31 = vld [vmem:[#allocation13 + $0x10] sm:$0xff]  }
 0x19b   :  { %v431_v32 = vadd.f32 %v425_v24, %v304_v27  ;;  %v307_v39 = vadd.f32 %v2716_v22, %v306_v30  ;;  %v2144_v24 = vld [vmem:[#allocation12 + $0x28] sm:$0xff]  }
 0x19c   :  { %v2834_v30 = vld [vmem:[#allocation13 + $0x8] sm:$0xff]  }
 0x19d   :  { %2166 = vtanh.f32 %v431_v32  ;;  %v2842_v32 = vld [vmem:[#allocation13 + $0x18] sm:$0xff]  }
 0x19f   :  { %v2741_v35 = vpop.f32.mrb[4].mxu0 }
 0x1a0   :  { %v2743_v36 = vpop.f32.mrb[5].mxu0 }
 0x1a1   :  { %v2745_v37 = vpop.f32.mrb[6].mxu0  ;;  %v320_v63 = vadd.f32 %v2716_v22, %v2743_v36  ;;  %v2854_v36 = vld [vmem:[#allocation13 + $0x30] sm:$0xff]  }
 0x1a2   :  { %v2747_v38 = vpop.f32.mrb[7].mxu0 }
 0x1a7   :  { %v2167_v33 = vpop.eup %2166 }
 0x1a8   :  { %v433_v34 = vpack.c.bf16 %v2167_v33, %v2167_v33  ;;  %v2846_v33 = vld [vmem:[#allocation13 + $0x20] sm:$0xff]  }
 0x1aa   :  { %434 = vst [vmem:[#allocation2] sm:$0xf] %v433_v34  ;;  %1776 = vmatmul.mubr.bf16.vlgmr.msra.gmra.mrb[8].mxu0 %v433_v34  ;;  %v2850_v34 = vld [vmem:[#allocation13 + $0x28] sm:$0xff]  }
 0x1ab   :  { %1800 = vmatpush3.bf16.msra.mxu0 %v2646_v2  ;;  %1815 = vmatprep.mubr.msk.bf16.mxu0 %vm2442_vm0, %v2441_v0 }
 0x1ac   :  { %1801 = vmatprep.subr.bf16.mxu0 %v2441_v0 }
 0x1af   :  { %1802 = vmatpush3.bf16.msra.mxu0 %v2649_v4 }
 0x1b0   :  { %1803 = vmatprep.subr.bf16.mxu0 %v2441_v0 }
 0x1b3   :  { %1804 = vmatpush3.bf16.msra.mxu0 %v2653_v6 }
 0x1b4   :  { %1805 = vmatprep.subr.bf16.mxu0 %v2441_v0 }
 0x1b7   :  { %1806 = vmatpush3.bf16.msra.mxu0 %v2657_v8 }
 0x1b8   :  { %1807 = vmatprep.subr.bf16.mxu0 %v2441_v0 }
 0x1bb   :  { %1808 = vmatpush3.bf16.msra.mxu0 %v2660_v10 }
 0x1bc   :  { %1809 = vmatprep.subr.bf16.mxu0 %v2441_v0 }
 0x1bf   :  { %1810 = vmatpush3.bf16.msra.mxu0 %v2664_v13 }
 0x1c0   :  { %1811 = vmatprep.subr.bf16.mxu0 %v2441_v0 }
 0x1c3   :  { %1812 = vmatpush3.bf16.msra.mxu0 %v2668_v15 }
 0x1c4   :  { %1813 = vmatprep.subr.bf16.mxu0 %v2441_v0 }
 0x1c7   :  { %1814 = vmatpush3.bf16.msra.mxu0 %v2672_v17 }
 0x1c8   :  { %1839 = vmatprep.subr.bf16.mxu0 %v2441_v0 }
 0x27d   :  { %v471_v40 = vpop.f32.mrb[8].mxu0 }
 0x27e   :  { %v477_v41 = vadd.f32 %v471_v40, %v307_v39  ;;  %v1777_v42 = vpop.f32.mrb[9].mxu0  ;;  %v328_v39 = vadd.f32 %v2741_v35, %v2716_v22 }
 0x27f   :  { %v474_v43 = vpop.f32.mrb[10].mxu0 }
 0x280   :  { %2168 = vtanh.f32 %v477_v41  ;;  %v1778_v44 = vpop.f32.mrb[11].mxu0 }
 0x28a   :  { %v2169_v45 = vpop.eup %2168 }
 0x28b   :  { %v479_v46 = vpack.c.bf16 %v2169_v45, %v2169_v45 }
 0x28d   :  { %481 = vst [vmem:[#allocation2 + $0x4] sm:$0xf] %v479_v46  ;;  %1796 = vmatmul.mubr.bf16.vlgmr.msra.gmra.mrb[4].mxu1 %v479_v46 }
 0x28e   :  { %1820 = vmatpush3.bf16.msra.mxu1 %v2646_v2  ;;  %1835 = vmatprep.mubr.msk.bf16.mxu1 %vm2442_vm0, %v2441_v0 }
 0x28f   :  { %1821 = vmatprep.subr.bf16.mxu1 %v2441_v0 }
 0x292   :  { %1822 = vmatpush3.bf16.msra.mxu1 %v2649_v4 }
 0x293   :  { %1823 = vmatprep.subr.bf16.mxu1 %v2441_v0 }
 0x294   :  { %v2139_v20 = vld [vmem:[#allocation2] sm:$0xff]  }
 0x296   :  { %1824 = vmatpush3.bf16.msra.mxu1 %v2653_v6 }
 0x297   :  { %1825 = vmatprep.subr.bf16.mxu1 %v2441_v0 }
 0x29a   :  { %1826 = vmatpush3.bf16.msra.mxu1 %v2657_v8 }
 0x29b   :  { %1827 = vmatprep.subr.bf16.mxu1 %v2441_v0 }
 0x29e   :  { %1828 = vmatpush3.bf16.msra.mxu1 %v2660_v10 }
 0x29f   :  { %1829 = vmatprep.subr.bf16.mxu1 %v2441_v0 }
 0x2a2   :  { %1830 = vmatpush3.bf16.msra.mxu1 %v2664_v13 }
 0x2a3   :  { %1831 = vmatprep.subr.bf16.mxu1 %v2441_v0 }
 0x2a6   :  { %1832 = vmatpush3.bf16.msra.mxu1 %v2668_v15 }
 0x2a7   :  { %1833 = vmatprep.subr.bf16.mxu1 %v2441_v0 }
 0x2aa   :  { %1834 = vmatpush3.bf16.msra.mxu1 %v2672_v17 }
 0x2ab   :  { %1859 = vmatprep.subr.bf16.mxu1 %v2441_v0 }
 0x360   :  { %v518_v48 = vpop.f32.mrb[4].mxu1 }
 0x361   :  { %v524_v49 = vadd.f32 %v518_v48, %v312_v47  ;;  %v1797_v50 = vpop.f32.mrb[5].mxu1 }
 0x362   :  { %v521_v51 = vpop.f32.mrb[6].mxu1 }
 0x363   :  { %2170 = vtanh.f32 %v524_v49  ;;  %v1798_v52 = vpop.f32.mrb[7].mxu1 }
 0x36d   :  { %v2171_v53 = vpop.eup %2170 }
 0x36e   :  { %v526_v54 = vpack.c.bf16 %v2171_v53, %v2171_v53 }
 0x370   :  { %528 = vst [vmem:[#allocation2 + $0x8] sm:$0xf] %v526_v54  ;;  %1816 = vmatmul.mubr.bf16.vlgmr.msra.gmra.mrb[12].mxu0 %v526_v54 }
 0x371   :  { %1840 = vmatpush3.bf16.msra.mxu0 %v2646_v2  ;;  %1855 = vmatprep.mubr.msk.bf16.mxu0 %vm2442_vm0, %v2441_v0 }
 0x372   :  { %1841 = vmatprep.subr.bf16.mxu0 %v2441_v0 }
 0x375   :  { %1842 = vmatpush3.bf16.msra.mxu0 %v2649_v4 }
 0x376   :  { %1843 = vmatprep.subr.bf16.mxu0 %v2441_v0 }
 0x379   :  { %1844 = vmatpush3.bf16.msra.mxu0 %v2653_v6 }
 0x37a   :  { %1845 = vmatprep.subr.bf16.mxu0 %v2441_v0 }
 0x37d   :  { %1846 = vmatpush3.bf16.msra.mxu0 %v2657_v8 }
 0x37e   :  { %1847 = vmatprep.subr.bf16.mxu0 %v2441_v0 }
 0x381   :  { %1848 = vmatpush3.bf16.msra.mxu0 %v2660_v10 }
 0x382   :  { %1849 = vmatprep.subr.bf16.mxu0 %v2441_v0 }
 0x385   :  { %1850 = vmatpush3.bf16.msra.mxu0 %v2664_v13 }
 0x386   :  { %1851 = vmatprep.subr.bf16.mxu0 %v2441_v0 }
 0x389   :  { %1852 = vmatpush3.bf16.msra.mxu0 %v2668_v15 }
 0x38a   :  { %1853 = vmatprep.subr.bf16.mxu0 %v2441_v0 }
 0x38d   :  { %1854 = vmatpush3.bf16.msra.mxu0 %v2672_v17 }
 0x38e   :  { %1879 = vmatprep.subr.bf16.mxu0 %v2441_v0 }
 0x443   :  { %v565_v56 = vpop.f32.mrb[12].mxu0 }
 0x444   :  { %v571_v57 = vadd.f32 %v565_v56, %v315_v55  ;;  %v1817_v58 = vpop.f32.mrb[13].mxu0 }
 0x445   :  { %v568_v59 = vpop.f32.mrb[14].mxu0  ;;  %v2911_v58 = vld [vmem:[#allocation15] ss:$0 sm:$0xff] }
 0x446   :  { %2172 = vtanh.f32 %v571_v57  ;;  %v1818_v60 = vpop.f32.mrb[15].mxu0 }
 0x450   :  { %v2173_v61 = vpop.eup %2172 }
 0x451   :  { %v573_v62 = vpack.c.bf16 %v2173_v61, %v2173_v61 }
 0x453   :  { %575 = vst [vmem:[#allocation2 + $0xc] sm:$0xf] %v573_v62  ;;  %1836 = vmatmul.mubr.bf16.vlgmr.msra.gmra.mrb[8].mxu1 %v573_v62 }
 0x454   :  { %1860 = vmatpush3.bf16.msra.mxu1 %v2646_v2  ;;  %1875 = vmatprep.mubr.msk.bf16.mxu1 %vm2442_vm0, %v2441_v0 }
 0x455   :  { %1861 = vmatprep.subr.bf16.mxu1 %v2441_v0 }
 0x458   :  { %1862 = vmatpush3.bf16.msra.mxu1 %v2649_v4 }
 0x459   :  { %1863 = vmatprep.subr.bf16.mxu1 %v2441_v0 }
 0x45a   :  { %v2147_v27 = vld [vmem:[#allocation2 + $0x8] sm:$0xff]  }
 0x45c   :  { %1864 = vmatpush3.bf16.msra.mxu1 %v2653_v6 }
 0x45d   :  { %1865 = vmatprep.subr.bf16.mxu1 %v2441_v0 }
 0x460   :  { %1866 = vmatpush3.bf16.msra.mxu1 %v2657_v8 }
 0x461   :  { %1867 = vmatprep.subr.bf16.mxu1 %v2441_v0 }
 0x464   :  { %1868 = vmatpush3.bf16.msra.mxu1 %v2660_v10 }
 0x465   :  { %1869 = vmatprep.subr.bf16.mxu1 %v2441_v0 }
 0x468   :  { %1870 = vmatpush3.bf16.msra.mxu1 %v2664_v13 }
 0x469   :  { %1871 = vmatprep.subr.bf16.mxu1 %v2441_v0 }
 0x46c   :  { %1872 = vmatpush3.bf16.msra.mxu1 %v2668_v15 }
 0x46d   :  { %1873 = vmatprep.subr.bf16.mxu1 %v2441_v0 }
 0x470   :  { %1874 = vmatpush3.bf16.msra.mxu1 %v2672_v17 }
 0x526   :  { %v612_v1 = vpop.f32.mrb[8].mxu1 }
 0x527   :  { %v618_v3 = vadd.f32 %v612_v1, %v320_v63  ;;  %v1837_v5 = vpop.f32.mrb[9].mxu1 }
 0x528   :  { %v615_v7 = vpop.f32.mrb[10].mxu1 }
 0x529   :  { %2174 = vtanh.f32 %v618_v3  ;;  %v1838_v9 = vpop.f32.mrb[11].mxu1 }
 0x533   :  { %v2175_v11 = vpop.eup %2174 }
 0x534   :  { %v620_v12 = vpack.c.bf16 %v2175_v11, %v2175_v11 }
 0x536   :  { %622 = vst [vmem:[#allocation2 + $0x10] sm:$0xf] %v620_v12  ;;  %1856 = vmatmul.mubr.bf16.vlgmr.msra.gmra.mrb[16].mxu0 %v620_v12 }
 0x537   :  { %1880 = vmatpush3.bf16.msra.mxu0 %v2646_v2  ;;  %1895 = vmatprep.mubr.msk.bf16.mxu0 %vm2442_vm0, %v2441_v0  ;;  %v2138_v2 = vld [vmem:[#allocation12] sm:$0xff]  }
 0x538   :  { %1881 = vmatprep.subr.bf16.mxu0 %v2441_v0  ;;  %1899 = vmatprep.subr.bf16.mxu1 %v2138_v2 }
 0x53b   :  { %1882 = vmatpush3.bf16.msra.mxu0 %v2649_v4  ;;  %v323_v4 = vadd.f32 %v2716_v22, %v2747_v38  ;;  %v2858_v38 = vld [vmem:[#allocation13 + $0x38] sm:$0xff]  }
 0x53c   :  { %1883 = vmatprep.subr.bf16.mxu0 %v2441_v0 }
 0x53f   :  { %1884 = vmatpush3.bf16.msra.mxu0 %v2653_v6 }
 0x540   :  { %1885 = vmatprep.subr.bf16.mxu0 %v2441_v0 }
 0x543   :  { %1886 = vmatpush3.bf16.msra.mxu0 %v2657_v8 }
 0x544   :  { %1887 = vmatprep.subr.bf16.mxu0 %v2441_v0 }
 0x547   :  { %1888 = vmatpush3.bf16.msra.mxu0 %v2660_v10 }
 0x548   :  { %1889 = vmatprep.subr.bf16.mxu0 %v2441_v0 }
 0x54b   :  { %1890 = vmatpush3.bf16.msra.mxu0 %v2664_v13 }
 0x54c   :  { %1891 = vmatprep.subr.bf16.mxu0 %v2441_v0 }
 0x54f   :  { %1892 = vmatpush3.bf16.msra.mxu0 %v2668_v15  ;;  %v2140_v15 = vld [vmem:[#allocation12 + $0x8] sm:$0xff]  }
 0x550   :  { %1893 = vmatprep.subr.bf16.mxu0 %v2441_v0 }
 0x553   :  { %1894 = vmatpush3.bf16.msra.mxu0 %v2672_v17  ;;  %v2141_v17 = vld [vmem:[#allocation12 + $0x10] sm:$0xff]  }
 0x554   :  { %1923 = vmatprep.subr.bf16.mxu0 %v2441_v0 }
 0x609   :  { %v659_v6 = vpop.f32.mrb[16].mxu0 }
 0x60a   :  { %v665_v8 = vadd.f32 %v659_v6, %v323_v4  ;;  %v1857_v10 = vpop.f32.mrb[17].mxu0 }
 0x60b   :  { %v662_v14 = vpop.f32.mrb[18].mxu0 }
 0x60c   :  { %2176 = vtanh.f32 %v665_v8  ;;  %v1858_v13 = vpop.f32.mrb[19].mxu0 }
 0x616   :  { %v2177_v16 = vpop.eup %2176 }
 0x617   :  { %v667_v18 = vpack.c.bf16 %v2177_v16, %v2177_v16 }
 0x619   :  { %669 = vst [vmem:[#allocation2 + $0x14] sm:$0xf] %v667_v18  ;;  %1876 = vmatmul.mubr.bf16.vlgmr.msra.gmra.mrb[12].mxu1 %v667_v18 }
 0x61a   :  { %1900 = vmatpush3.bf16.msra.mxu1 %v2138_v2  ;;  %1915 = vmatprep.mubr.bf16.mxu1 %v2139_v20 }
 0x61b   :  { %1901 = vmatprep.subr.bf16.mxu1 %v2140_v15 }
 0x61e   :  { %1902 = vmatpush3.bf16.msra.mxu1 %v2140_v15 }
 0x61f   :  { %1903 = vmatprep.subr.bf16.mxu1 %v2141_v17 }
 0x620   :  { %v2148_v28 = vld [vmem:[#allocation2 + $0x10] sm:$0xff]  }
 0x622   :  { %1904 = vmatpush3.bf16.msra.mxu1 %v2141_v17 }
 0x623   :  { %1905 = vmatprep.subr.bf16.mxu1 %v2142_v21 }
 0x626   :  { %1906 = vmatpush3.bf16.msra.mxu1 %v2142_v21 }
 0x627   :  { %1907 = vmatprep.subr.bf16.mxu1 %v2143_v23 }
 0x62a   :  { %1908 = vmatpush3.bf16.msra.mxu1 %v2143_v23 }
 0x62b   :  { %1909 = vmatprep.subr.bf16.mxu1 %v2144_v24 }
 0x62e   :  { %1910 = vmatpush3.bf16.msra.mxu1 %v2144_v24 }
 0x62f   :  { %1911 = vmatprep.subr.bf16.mxu1 %v2145_v25 }
 0x632   :  { %1912 = vmatpush3.bf16.msra.mxu1 %v2145_v25 }
 0x633   :  { %1913 = vmatprep.subr.bf16.mxu1 %v2146_v26 }
 0x636   :  { %1914 = vmatpush3.bf16.msra.mxu1 %v2146_v26 }
 0x637   :  { %1943 = vmatprep.subr.bf16.mxu1 %v2441_v0 }
 0x639   :  { %1916 = vmatmul.mubr.bf16.vlgmr.msra.gmra.mrb[16].mxu1 %v2147_v27 }
 0x63a   :  { %1919 = vmatprep.mubr.bf16.mxu1 %v2148_v28  ;;  %1944 = vmatpush3.bf16.msra.mxu1 %v2830_v29 }
 0x63b   :  { %1945 = vmatprep.subr.bf16.mxu1 %v2441_v0 }
 0x63e   :  { %1946 = vmatpush3.bf16.msra.mxu1 %v2834_v30 }
 0x63f   :  { %1947 = vmatprep.subr.bf16.mxu1 %v2441_v0 }
 0x642   :  { %1948 = vmatpush3.bf16.msra.mxu1 %v2838_v31 }
 0x643   :  { %1949 = vmatprep.subr.bf16.mxu1 %v2441_v0 }
 0x646   :  { %1950 = vmatpush3.bf16.msra.mxu1 %v2842_v32 }
 0x647   :  { %1951 = vmatprep.subr.bf16.mxu1 %v2441_v0 }
 0x64a   :  { %1952 = vmatpush3.bf16.msra.mxu1 %v2846_v33 }
 0x64b   :  { %1953 = vmatprep.subr.bf16.mxu1 %v2441_v0 }
 0x64e   :  { %1954 = vmatpush3.bf16.msra.mxu1 %v2850_v34 }
 0x64f   :  { %1955 = vmatprep.subr.bf16.mxu1 %v2441_v0 }
 0x652   :  { %1956 = vmatpush3.bf16.msra.mxu1 %v2854_v36 }
 0x653   :  { %1957 = vmatprep.subr.bf16.mxu1 %v2441_v0 }
 0x656   :  { %1958 = vmatpush3.bf16.msra.mxu1 %v2858_v38 }
 0x657   :  { %1983 = vmatprep.subr.bf16.mxu1 %v2441_v0 }
 0x6ec   :  { %v706_v40 = vpop.f32.mrb[12].mxu1 }
 0x6ed   :  { %v712_v41 = vadd.f32 %v706_v40, %v328_v39  ;;  %v1877_v42 = vpop.f32.mrb[13].mxu1 }
 0x6ee   :  { %v709_v43 = vpop.f32.mrb[14].mxu1 }
 0x6ef   :  { %2178 = vtanh.f32 %v712_v41  ;;  %v1878_v44 = vpop.f32.mrb[15].mxu1 }
 0x6f9   :  { %v2179_v45 = vpop.eup %2178 }
 0x6fa   :  { %v714_v46 = vpack.c.bf16 %v2179_v45, %v2179_v45 }
 0x6fc   :  { %716 = vst [vmem:[#allocation2 + $0x18] sm:$0xf] %v714_v46  ;;  %1896 = vmatmul.mubr.bf16.vlgmr.msra.gmra.mrb[20].mxu0 %v714_v46 }
 0x6fd   :  { %1924 = vmatpush3.bf16.msra.mxu0 %v2830_v29  ;;  %1939 = vmatprep.mubr.msk.bf16.mxu0 %vm2442_vm0, %v2441_v0 }
 0x6fe   :  { %1925 = vmatprep.subr.bf16.mxu0 %v2441_v0 }
 0x701   :  { %1926 = vmatpush3.bf16.msra.mxu0 %v2834_v30 }
 0x702   :  { %1927 = vmatprep.subr.bf16.mxu0 %v2441_v0 }
 0x705   :  { %1928 = vmatpush3.bf16.msra.mxu0 %v2838_v31 }
 0x706   :  { %1929 = vmatprep.subr.bf16.mxu0 %v2441_v0 }
 0x709   :  { %1930 = vmatpush3.bf16.msra.mxu0 %v2842_v32 }
 0x70a   :  { %1931 = vmatprep.subr.bf16.mxu0 %v2441_v0 }
 0x70c   :  { %v2874_v35 = vpop.f32.mrb[16].mxu1 }
 0x70d   :  { %v917_v47 = vpop.f32.mrb[17].mxu1  ;;  %1932 = vmatpush3.bf16.msra.mxu0 %v2846_v33  ;;  %v926_v13 = vadd.f32 %v2874_v35, %v2911_v58 }
 0x70e   :  { %v2877_v48 = vpop.f32.mrb[18].mxu1  ;;  %1933 = vmatprep.subr.bf16.mxu0 %v2441_v0  ;;  %v918_v59 = vadd.f32 %v2911_v58, %v917_v47 }
 0x70f   :  { %v2880_v49 = vpop.f32.mrb[19].mxu1  ;;  %v929_v24 = vadd.f32 %v2877_v48, %v2911_v58 }
 0x710   :  { %v921_v11 = vadd.f32 %v2911_v58, %v2880_v49 }
 0x711   :  { %1934 = vmatpush3.bf16.msra.mxu0 %v2850_v34 }
 0x712   :  { %1935 = vmatprep.subr.bf16.mxu0 %v2441_v0 }
 0x715   :  { %1936 = vmatpush3.bf16.msra.mxu0 %v2854_v36 }
 0x716   :  { %1937 = vmatprep.subr.bf16.mxu0 %v2441_v0 }
 0x719   :  { %1938 = vmatpush3.bf16.msra.mxu0 %v2858_v38 }
 0x71a   :  { %1963 = vmatprep.subr.bf16.mxu0 %v2441_v0 }
 0x71c   :  { %1940 = vmatmul.mubr.bf16.vlgmr.msra.gmra.mrb[24].mxu0 %v2443_v19  ;;  %v331_v19 = vadd.f32 %v2745_v37, %v2716_v22 }
 0x71d   :  { %1964 = vmatpush3.bf16.msra.mxu0 %v2830_v29  ;;  %1979 = vmatprep.mubr.msk.bf16.mxu0 %vm2442_vm0, %v2441_v0 }
 0x71e   :  { %1965 = vmatprep.subr.bf16.mxu0 %v2441_v0 }
 0x721   :  { %1966 = vmatpush3.bf16.msra.mxu0 %v2834_v30 }
 0x722   :  { %1967 = vmatprep.subr.bf16.mxu0 %v2441_v0 }
 0x725   :  { %1968 = vmatpush3.bf16.msra.mxu0 %v2838_v31 }
 0x726   :  { %1969 = vmatprep.subr.bf16.mxu0 %v2441_v0 }
 0x729   :  { %1970 = vmatpush3.bf16.msra.mxu0 %v2842_v32 }
 0x72a   :  { %1971 = vmatprep.subr.bf16.mxu0 %v2441_v0 }
 0x72d   :  { %1972 = vmatpush3.bf16.msra.mxu0 %v2846_v33 }
 0x72e   :  { %1973 = vmatprep.subr.bf16.mxu0 %v2441_v0 }
 0x731   :  { %1974 = vmatpush3.bf16.msra.mxu0 %v2850_v34 }
 0x732   :  { %1975 = vmatprep.subr.bf16.mxu0 %v2441_v0 }
 0x735   :  { %1976 = vmatpush3.bf16.msra.mxu0 %v2854_v36 }
 0x736   :  { %1977 = vmatprep.subr.bf16.mxu0 %v2441_v0 }
 0x739   :  { %1978 = vmatpush3.bf16.msra.mxu0 %v2858_v38 }
 0x73a   :  { %2003 = vmatprep.subr.bf16.mxu0 %v2441_v0 }
 0x7cf   :  { %v753_v50 = vpop.f32.mrb[20].mxu0 }
 0x7d0   :  { %v759_v51 = vadd.f32 %v753_v50, %v331_v19  ;;  %v1897_v52 = vpop.f32.mrb[21].mxu0 }
 0x7d1   :  { %v756_v53 = vpop.f32.mrb[22].mxu0 }
 0x7d2   :  { %2180 = vtanh.f32 %v759_v51  ;;  %v1898_v54 = vpop.f32.mrb[23].mxu0  ;;  %v2161_v51 = vld [vmem:[#allocation16 + $0x18] sm:$0xff]  }
 0x7dc   :  { %v2181_v55 = vpop.eup %2180 }
 0x7dd   :  { %v761_v56 = vpack.c.bf16 %v2181_v55, %v2181_v55 }
 0x7df   :  { %763 = vst [vmem:[#allocation2 + $0x1c] sm:$0xf] %v761_v56 }
 0x7e6   :  { %v2157_v57 = vld [vmem:[#allocation2 + $0x18] sm:$0xff]  }
 0x7e7   :  { %1920 = vmatmul.mubr.bf16.gmra.mrb[20].mxu1 %v2157_v57 }
 0x7e8   :  { %1959 = vmatprep.mubr.msk.bf16.mxu1 %vm2442_vm0, %v2441_v0 }
 0x7ef   :  { %v1039_v60 = vpop.f32.mrb[24].mxu0 }
 0x7f0   :  { %v1045_v22 = vadd.f32 %v1039_v60, %v918_v59  ;;  %v1941_v37 = vpop.f32.mrb[25].mxu0 }
 0x7f1   :  { %v1042_v61 = vpop.f32.mrb[26].mxu0  ;;  %v2163_v37 = vld [vmem:[#allocation16 + $0x28] sm:$0xff]  }
 0x7f2   :  { %2182 = vtanh.f32 %v1045_v22  ;;  %v1942_v62 = vpop.f32.mrb[27].mxu0  ;;  %v2162_v22 = vld [vmem:[#allocation16 + $0x20] sm:$0xff]   ;;  %v2164_v61 = vld [vmem:[#allocation16 + $0x30] sm:$0xff]  }
 0x7f3   :  { %v2165_v62 = vld [vmem:[#allocation16 + $0x38] sm:$0xff]  }
 0x7fc   :  { %v2183_v63 = vpop.eup %2182 }
 0x7fd   :  { %v1047_v1 = vpack.c.bf16 %v2183_v63, %v2183_v63 }
 0x7ff   :  { %1960 = vmatmul.mubr.bf16.vlgmr.msra.gmra.mrb[24].mxu1 %v1047_v1 }
 0x800   :  { %1984 = vmatpush3.bf16.msra.mxu1 %v2830_v29  ;;  %1999 = vmatprep.mubr.msk.bf16.mxu1 %vm2442_vm0, %v2441_v0 }
 0x801   :  { %1985 = vmatprep.subr.bf16.mxu1 %v2441_v0 }
 0x804   :  { %1986 = vmatpush3.bf16.msra.mxu1 %v2834_v30 }
 0x805   :  { %1987 = vmatprep.subr.bf16.mxu1 %v2441_v0 }
 0x808   :  { %1988 = vmatpush3.bf16.msra.mxu1 %v2838_v31 }
 0x809   :  { %1989 = vmatprep.subr.bf16.mxu1 %v2441_v0 }
 0x80c   :  { %1990 = vmatpush3.bf16.msra.mxu1 %v2842_v32 }
 0x80d   :  { %1991 = vmatprep.subr.bf16.mxu1 %v2441_v0 }
 0x810   :  { %1992 = vmatpush3.bf16.msra.mxu1 %v2846_v33 }
 0x811   :  { %1993 = vmatprep.subr.bf16.mxu1 %v2441_v0 }
 0x814   :  { %1994 = vmatpush3.bf16.msra.mxu1 %v2850_v34 }
 0x815   :  { %1995 = vmatprep.subr.bf16.mxu1 %v2441_v0 }
 0x818   :  { %1996 = vmatpush3.bf16.msra.mxu1 %v2854_v36 }
 0x819   :  { %1997 = vmatprep.subr.bf16.mxu1 %v2441_v0 }
 0x81c   :  { %1998 = vmatpush3.bf16.msra.mxu1 %v2858_v38 }
 0x81d   :  { %2023 = vmatprep.subr.bf16.mxu1 %v2441_v0 }
 0x8ba   :  { %v2932_v3 = vpop.f32.mrb[20].mxu1 }
 0x8bb   :  { %v2934_v5 = vpop.f32.mrb[21].mxu1  ;;  %v942_v52 = vadd.f32 %v2932_v3, %v2911_v58 }
 0x8bc   :  { %v2936_v7 = vpop.f32.mrb[22].mxu1  ;;  %v934_v42 = vadd.f32 %v2911_v58, %v2934_v5 }
 0x8bd   :  { %v2938_v9 = vpop.f32.mrb[23].mxu1  ;;  %v945_v63 = vadd.f32 %v2936_v7, %v2911_v58 }
 0x8d2   :  { %v1083_v12 = vpop.f32.mrb[24].mxu1 }
 0x8d3   :  { %v1089_v2 = vadd.f32 %v1083_v12, %v921_v11  ;;  %v1961_v4 = vpop.f32.mrb[25].mxu1 }
 0x8d4   :  { %v1086_v6 = vpop.f32.mrb[26].mxu1  ;;  %v1529_v4 = vld [vmem:[#allocation18] ss:$0 sm:$0xff] }
 0x8d5   :  { %2184 = vtanh.f32 %v1089_v2  ;;  %v1962_v8 = vpop.f32.mrb[27].mxu1 }
 0x8df   :  { %v2185_v10 = vpop.eup %2184 }
 0x8e0   :  { %v1091_v14 = vpack.c.bf16 %v2185_v10, %v2185_v10 }
 0x8e2   :  { %1980 = vmatmul.mubr.bf16.vlgmr.msra.gmra.mrb[28].mxu0 %v1091_v14 }
 0x8e3   :  { %2004 = vmatpush3.bf16.msra.mxu0 %v2830_v29  ;;  %2019 = vmatprep.mubr.msk.bf16.mxu0 %vm2442_vm0, %v2441_v0 }
 0x8e4   :  { %2005 = vmatprep.subr.bf16.mxu0 %v2441_v0 }
 0x8e7   :  { %2006 = vmatpush3.bf16.msra.mxu0 %v2834_v30 }
 0x8e8   :  { %2007 = vmatprep.subr.bf16.mxu0 %v2441_v0 }
 0x8eb   :  { %2008 = vmatpush3.bf16.msra.mxu0 %v2838_v31 }
 0x8ec   :  { %2009 = vmatprep.subr.bf16.mxu0 %v2441_v0 }
 0x8ef   :  { %2010 = vmatpush3.bf16.msra.mxu0 %v2842_v32 }
 0x8f0   :  { %2011 = vmatprep.subr.bf16.mxu0 %v2441_v0 }
 0x8f3   :  { %2012 = vmatpush3.bf16.msra.mxu0 %v2846_v33 }
 0x8f4   :  { %2013 = vmatprep.subr.bf16.mxu0 %v2441_v0 }
 0x8f7   :  { %2014 = vmatpush3.bf16.msra.mxu0 %v2850_v34 }
 0x8f8   :  { %2015 = vmatprep.subr.bf16.mxu0 %v2441_v0 }
 0x8fb   :  { %2016 = vmatpush3.bf16.msra.mxu0 %v2854_v36 }
 0x8fc   :  { %2017 = vmatprep.subr.bf16.mxu0 %v2441_v0 }
 0x8ff   :  { %2018 = vmatpush3.bf16.msra.mxu0 %v2858_v38 }
 0x900   :  { %2043 = vmatprep.subr.bf16.mxu0 %v2441_v0 }
 0x9b5   :  { %v1127_v16 = vpop.f32.mrb[28].mxu0 }
 0x9b6   :  { %v1133_v18 = vadd.f32 %v1127_v16, %v926_v13  ;;  %v1981_v15 = vpop.f32.mrb[29].mxu0 }
 0x9b7   :  { %v1130_v20 = vpop.f32.mrb[30].mxu0 }
 0x9b8   :  { %2186 = vtanh.f32 %v1133_v18  ;;  %v1982_v17 = vpop.f32.mrb[31].mxu0 }
 0x9c2   :  { %v2187_v21 = vpop.eup %2186 }
 0x9c3   :  { %v1135_v23 = vpack.c.bf16 %v2187_v21, %v2187_v21 }
 0x9c5   :  { %2000 = vmatmul.mubr.bf16.vlgmr.msra.gmra.mrb[28].mxu1 %v1135_v23 }
 0x9c6   :  { %2024 = vmatpush3.bf16.msra.mxu1 %v2830_v29  ;;  %2039 = vmatprep.mubr.msk.bf16.mxu1 %vm2442_vm0, %v2441_v0 }
 0x9c7   :  { %2025 = vmatprep.subr.bf16.mxu1 %v2441_v0 }
 0x9ca   :  { %2026 = vmatpush3.bf16.msra.mxu1 %v2834_v30 }
 0x9cb   :  { %2027 = vmatprep.subr.bf16.mxu1 %v2441_v0 }
 0x9ce   :  { %2028 = vmatpush3.bf16.msra.mxu1 %v2838_v31 }
 0x9cf   :  { %2029 = vmatprep.subr.bf16.mxu1 %v2441_v0 }
 0x9d2   :  { %2030 = vmatpush3.bf16.msra.mxu1 %v2842_v32 }
 0x9d3   :  { %2031 = vmatprep.subr.bf16.mxu1 %v2441_v0 }
 0x9d6   :  { %2032 = vmatpush3.bf16.msra.mxu1 %v2846_v33 }
 0x9d7   :  { %2033 = vmatprep.subr.bf16.mxu1 %v2441_v0 }
 0x9da   :  { %2034 = vmatpush3.bf16.msra.mxu1 %v2850_v34 }
 0x9db   :  { %2035 = vmatprep.subr.bf16.mxu1 %v2441_v0 }
 0x9de   :  { %2036 = vmatpush3.bf16.msra.mxu1 %v2854_v36 }
 0x9df   :  { %2037 = vmatprep.subr.bf16.mxu1 %v2441_v0 }
 0x9e2   :  { %2038 = vmatpush3.bf16.msra.mxu1 %v2858_v38 }
 0x9e3   :  { %2063 = vmatprep.subr.bf16.mxu1 %v2441_v0 }
 0xa98   :  { %v1171_v25 = vpop.f32.mrb[28].mxu1 }
 0xa99   :  { %v1177_v26 = vadd.f32 %v1171_v25, %v929_v24  ;;  %v2001_v27 = vpop.f32.mrb[29].mxu1 }
 0xa9a   :  { %v1174_v28 = vpop.f32.mrb[30].mxu1 }
 0xa9b   :  { %2188 = vtanh.f32 %v1177_v26  ;;  %v2002_v39 = vpop.f32.mrb[31].mxu1 }
 0xaa5   :  { %v2189_v40 = vpop.eup %2188 }
 0xaa6   :  { %v1179_v41 = vpack.c.bf16 %v2189_v40, %v2189_v40 }
 0xaa8   :  { %2020 = vmatmul.mubr.bf16.vlgmr.msra.gmra.mrb[32].mxu0 %v1179_v41 }
 0xaa9   :  { %2044 = vmatpush3.bf16.msra.mxu0 %v2830_v29  ;;  %2059 = vmatprep.mubr.msk.bf16.mxu0 %vm2442_vm0, %v2441_v0 }
 0xaaa   :  { %2045 = vmatprep.subr.bf16.mxu0 %v2441_v0 }
 0xaad   :  { %2046 = vmatpush3.bf16.msra.mxu0 %v2834_v30 }
 0xaae   :  { %2047 = vmatprep.subr.bf16.mxu0 %v2441_v0 }
 0xab1   :  { %2048 = vmatpush3.bf16.msra.mxu0 %v2838_v31 }
 0xab2   :  { %2049 = vmatprep.subr.bf16.mxu0 %v2441_v0 }
 0xab5   :  { %2050 = vmatpush3.bf16.msra.mxu0 %v2842_v32 }
 0xab6   :  { %2051 = vmatprep.subr.bf16.mxu0 %v2441_v0 }
 0xab9   :  { %2052 = vmatpush3.bf16.msra.mxu0 %v2846_v33 }
 0xaba   :  { %2053 = vmatprep.subr.bf16.mxu0 %v2441_v0 }
 0xabd   :  { %2054 = vmatpush3.bf16.msra.mxu0 %v2850_v34 }
 0xabe   :  { %2055 = vmatprep.subr.bf16.mxu0 %v2441_v0 }
 0xac1   :  { %2056 = vmatpush3.bf16.msra.mxu0 %v2854_v36 }
 0xac2   :  { %2057 = vmatprep.subr.bf16.mxu0 %v2441_v0 }
 0xac5   :  { %2058 = vmatpush3.bf16.msra.mxu0 %v2858_v38 }
 0xac6   :  { %2083 = vmatprep.subr.bf16.mxu0 %v2441_v0 }
 0xb7b   :  { %v1215_v43 = vpop.f32.mrb[32].mxu0 }
 0xb7c   :  { %v1221_v44 = vadd.f32 %v1215_v43, %v934_v42  ;;  %v2021_v45 = vpop.f32.mrb[33].mxu0 }
 0xb7d   :  { %v1218_v46 = vpop.f32.mrb[34].mxu0 }
 0xb7e   :  { %2190 = vtanh.f32 %v1221_v44  ;;  %v2022_v35 = vpop.f32.mrb[35].mxu0 }
 0xb88   :  { %v2191_v47 = vpop.eup %2190 }
 0xb89   :  { %v1223_v48 = vpack.c.bf16 %v2191_v47, %v2191_v47 }
 0xb8b   :  { %2040 = vmatmul.mubr.bf16.vlgmr.msra.gmra.mrb[32].mxu1 %v1223_v48 }
 0xb8c   :  { %2064 = vmatpush3.bf16.msra.mxu1 %v2830_v29  ;;  %2079 = vmatprep.mubr.msk.bf16.mxu1 %vm2442_vm0, %v2441_v0  ;;  %v937_v29 = vadd.f32 %v2911_v58, %v2938_v9 }
 0xb8d   :  { %2065 = vmatprep.subr.bf16.mxu1 %v2441_v0 }
 0xb90   :  { %2066 = vmatpush3.bf16.msra.mxu1 %v2834_v30 }
 0xb91   :  { %2067 = vmatprep.subr.bf16.mxu1 %v2441_v0 }
 0xb94   :  { %2068 = vmatpush3.bf16.msra.mxu1 %v2838_v31 }
 0xb95   :  { %2069 = vmatprep.subr.bf16.mxu1 %v2441_v0 }
 0xb98   :  { %2070 = vmatpush3.bf16.msra.mxu1 %v2842_v32 }
 0xb99   :  { %2071 = vmatprep.subr.bf16.mxu1 %v2441_v0 }
 0xb9c   :  { %2072 = vmatpush3.bf16.msra.mxu1 %v2846_v33 }
 0xb9d   :  { %2073 = vmatprep.subr.bf16.mxu1 %v2441_v0 }
 0xba0   :  { %2074 = vmatpush3.bf16.msra.mxu1 %v2850_v34  ;;  %v2158_v34 = vld [vmem:[#allocation16] sm:$0xff]  }
 0xba1   :  { %2075 = vmatprep.subr.bf16.mxu1 %v2441_v0 }
 0xba4   :  { %2076 = vmatpush3.bf16.msra.mxu1 %v2854_v36  ;;  %v2159_v36 = vld [vmem:[#allocation16 + $0x8] sm:$0xff]  }
 0xba5   :  { %2077 = vmatprep.subr.bf16.mxu1 %v2441_v0 }
 0xba8   :  { %2078 = vmatpush3.bf16.msra.mxu1 %v2858_v38  ;;  %v2160_v38 = vld [vmem:[#allocation16 + $0x10] sm:$0xff]  }
 0xc5e   :  { %v1259_v30 = vpop.f32.mrb[32].mxu1 }
 0xc5f   :  { %v1265_v31 = vadd.f32 %v1259_v30, %v937_v29  ;;  %v2041_v32 = vpop.f32.mrb[33].mxu1 }
 0xc60   :  { %v1262_v49 = vpop.f32.mrb[34].mxu1 }
 0xc61   :  { %2192 = vtanh.f32 %v1265_v31  ;;  %v2042_v33 = vpop.f32.mrb[35].mxu1 }
 0xc6b   :  { %v2193_v19 = vpop.eup %2192 }
 0xc6c   :  { %v1267_v50 = vpack.c.bf16 %v2193_v19, %v2193_v19 }
 0xc6e   :  { %2060 = vmatmul.mubr.bf16.vlgmr.msra.gmra.mrb[36].mxu0 %v1267_v50 }
 0xc6f   :  { %2099 = vmatprep.mubr.msk.bf16.mxu0 %vm2442_vm0, %v2441_v0  ;;  %2084 = vmatpush3.bf16.msra.mxu0 %v2158_v34 }
 0xc70   :  { %2085 = vmatprep.subr.bf16.mxu0 %v2441_v0 }
 0xc73   :  { %2086 = vmatpush3.bf16.msra.mxu0 %v2159_v36 }
 0xc74   :  { %2087 = vmatprep.subr.bf16.mxu0 %v2441_v0 }
 0xc77   :  { %2088 = vmatpush3.bf16.msra.mxu0 %v2160_v38 }
 0xc78   :  { %2089 = vmatprep.subr.bf16.mxu0 %v2441_v0 }
 0xc7b   :  { %2090 = vmatpush3.bf16.msra.mxu0 %v2161_v51 }
 0xc7c   :  { %2091 = vmatprep.subr.bf16.mxu0 %v2441_v0 }
 0xc7f   :  { %2092 = vmatpush3.bf16.msra.mxu0 %v2162_v22 }
 0xc80   :  { %2093 = vmatprep.subr.bf16.mxu0 %v2441_v0 }
 0xc83   :  { %2094 = vmatpush3.bf16.msra.mxu0 %v2163_v37 }
 0xc84   :  { %2095 = vmatprep.subr.bf16.mxu0 %v2441_v0 }
 0xc87   :  { %2096 = vmatpush3.bf16.msra.mxu0 %v2164_v61 }
 0xc88   :  { %2097 = vmatprep.subr.bf16.mxu0 %v2441_v0 }
 0xc8b   :  { %2098 = vmatpush3.bf16.msra.mxu0 %v2165_v62 }
 0xd41   :  { %v1303_v53 = vpop.f32.mrb[36].mxu0 }
 0xd42   :  { %v1309_v54 = vadd.f32 %v1303_v53, %v942_v52  ;;  %v2061_v55 = vpop.f32.mrb[37].mxu0 }
 0xd43   :  { %v1306_v56 = vpop.f32.mrb[38].mxu0 }
 0xd44   :  { %2194 = vtanh.f32 %v1309_v54  ;;  %v2062_v57 = vpop.f32.mrb[39].mxu0 }
 0xd4e   :  { %v2195_v59 = vpop.eup %2194 }
 0xd4f   :  { %v1311_v60 = vpack.c.bf16 %v2195_v59, %v2195_v59 }
 0xd51   :  { %2080 = vmatmul.mubr.bf16.vlgmr.msra.gmra.mrb[36].mxu1 %v1311_v60 }
 0xe24   :  { %v1347_v1 = vpop.f32.mrb[36].mxu1 }
 0xe25   :  { %v1353_v3 = vadd.f32 %v1347_v1, %v945_v63  ;;  %v2081_v5 = vpop.f32.mrb[37].mxu1 }
 0xe26   :  { %v1350_v9 = vpop.f32.mrb[38].mxu1 }
 0xe27   :  { %2196 = vtanh.f32 %v1353_v3  ;;  %v2082_v11 = vpop.f32.mrb[39].mxu1 }
 0xe31   :  { %v2197_v12 = vpop.eup %2196 }
 0xe32   :  { %v1355_v2 = vpack.c.bf16 %v2197_v12, %v2197_v12 }
 0xe34   :  { %2100 = vmatmul.mubr.bf16.vlgmr.msra.gmra.mrb[40].mxu0 %v1355_v2 }
 0xf07   :  { %v1461_v6 = vpop.f32.mrb[40].mxu0 }
 0xf08   :  { %v1462_v8 = vadd.f32 %v1529_v4, %v1461_v6  ;;  %v2101_v0 = vpop.f32.mrb[41].mxu0 }
 0xf09   :  { %v1464_v10 = vpop.f32.mrb[42].mxu0 }
 0xf0a   :  { %1467 = vst [vmem:[#allocation19] sm:$0xff] %v1462_v8  ;;  %v2102_v14 = vpop.f32.mrb[43].mxu0 }
 0xf0b   :  { %2407 = shalt.err (!%p2404_p6)
}
 0xf0c   :  { %s2408_s18 = scalar_lea.hbm %s3055_s9, 128 }
 0xf0d   :  { %p2409_p7 = scmp.ne.s32.totalorder %s3055_s9, %s2408_s18  ;;  %p2412_p8 = scmp.lt.u32.totalorder %s2408_s18, %s3055_s9 }
 0xf0f   :  { %p2414_p9 = pnand %p2412_p8, %p2409_p7 }
 0xf11   :  { %2417 = shalt.err (!%p2414_p9)
}
 0xf12   :  { %1477 = dma.vmem_to_hbm [thread:$0]  %s1475_s28, 128, %s3055_s9, [#allocation6]  }
 0xf13   :  { %2428 = dma.done.wait [#allocation6], 128  }
 0xf14   :  { %2429 = vsyncadd [#allocation6], 4294967168 }
 0xf15   :  { %1481 = vsyncpa [#allocation5], 1 }
 0xf16   :  { %1482 = vsyncpa [#allocation8], 1 }
 0xf17   :  { %1483 = vsyncpa [#allocation11], 1 }
 0xf18   :  { %1484 = vsyncpa [#allocation14], 1 }
 0xf19   :  { %1485 = vsyncpa [#allocation17], 1 }
 0xf1a   :  { %1486 = vsyncpa [#allocation6], 1 }

</bundles_post_ra>
